<compile_context>
chip_gen: v6e
topology: v6e:2x2x1
jax: 0.10.0
libtpu: 0.0.40
codegen_flags: <defaults>
</compile_context>

<pallas_src>
import numpy as np
import jax
import jax.numpy as jnp
from jax.experimental import pallas as pl
from jax.experimental.pallas import tpu as pltpu


def _gaussian_kernel_1d(ksize: int, sigma: float) -> np.ndarray:
    """Matches tgm.get_gaussian_kernel (normalized 1D Gaussian)."""
    x = np.arange(ksize, dtype=np.float64) - ksize // 2
    if ksize % 2 == 0:
        x = x + 0.5
    gauss = np.exp(-(x ** 2) / (2.0 * sigma ** 2))
    return gauss / gauss.sum()


def _choose_tiles(BC: int, H: int, W: int, pad: int):
    """Pick (planes-per-step, rows-per-step) to fit VMEM and amortize overhead."""
    Hp, Wp = H + 2 * pad, W + 2 * pad
    budget = 40 * 1024 * 1024  # working-set target, below the 48 MiB limit requested

    # Per-plane resident bytes: 2 padded f32 scratch planes + double-buffered
    # input blocks (<= 4 B/elt assumed).
    resident_per_plane = 4 * (2 * Hp * Wp + 2 * 2 * H * W)
    # Rough live f32 bytes per output row during compute (bands + products +
    # 5 vertical intermediates + combine temporaries).
    row_bytes_per_plane = 4 * 20 * Wp

    # Planes per grid step.
    cap = max(1, budget // (resident_per_plane + row_bytes_per_plane * min(H, 128)))
    cap = min(cap, 8)
    if BC >= 2:
        cap = min(cap, max(1, BC // 2))  # keep >=2 steps on leading (parallel) axis
    TBC = max(d for d in range(1, cap + 1) if BC % d == 0)

    # Row tile: full H if cheap, else the largest multiple-of-8 divisor of H
    # that keeps temporaries within budget.
    rows_budget = (budget - TBC * resident_per_plane) // max(1, TBC * row_bytes_per_plane)
    if H <= max(rows_budget, 8):
        TH = H
    else:
        cands = [d for d in range(8, H, 8) if H % d == 0 and d <= rows_budget]
        TH = max(cands) if cands else H
    return TBC, TH


def _make_ssim_kernel(w1, H, W, pad, TBC, TH, C1, C2):
    ws = len(w1)
    Wp = W + 2 * pad
    THp = TH + 2 * pad

    def kernel(x1_ref, x2_ref, o_ref, x1p_ref, x2p_ref):
        h = pl.program_id(1)

        # Once per plane-block: zero the padding border and write the f32 interior.
        @pl.when(h == 0)
        def _fill():
            if pad > 0:
                zr = jnp.zeros((TBC, pad, Wp), jnp.float32)
                zc = jnp.zeros((TBC, H + 2 * pad, pad), jnp.float32)
                for r in (x1p_ref, x2p_ref):
                    r[:, :pad, :] = zr
                    r[:, pad + H:, :] = zr
                    r[:, :, :pad] = zc
                    r[:, :, pad + W:] = zc
            x1p_ref[:, pad:pad + H, pad:pad + W] = x1_ref[...].astype(jnp.float32)
            x2p_ref[:, pad:pad + H, pad:pad + W] = x2_ref[...].astype(jnp.float32)

        # Row band of padded planes needed for output rows [h*TH, h*TH + TH).
        r0 = pl.multiple_of(h * TH, TH)
        b1 = x1p_ref[:, pl.ds(r0, THp), :]   # (TBC, TH + 2*pad, Wp)
        b2 = x2p_ref[:, pl.ds(r0, THp), :]
        p11 = b1 * b1
        p22 = b2 * b2
        p12 = b1 * b2

        # Vertical (sublane-axis) 1D Gaussian pass: (TBC, THp, Wp) -> (TBC, TH, Wp)
        def vpass(q):
            acc = w1[0] * q[:, 0:TH, :]
            for ky in range(1, ws):
                acc = acc + w1[ky] * q[:, ky:ky + TH, :]
            return acc

        v_mu1 = vpass(b1)
        v_mu2 = vpass(b2)
        v_s11 = vpass(p11)
        v_s22 = vpass(p22)
        v_s12 = vpass(p12)

        # Horizontal (lane-axis) 1D Gaussian pass: (TBC, TH, Wp) -> (TBC, TH, W)
        def hpass(q):
            acc = w1[0] * q[:, :, 0:W]
            for kx in range(1, ws):
                acc = acc + w1[kx] * q[:, :, kx:kx + W]
            return acc

        mu1 = hpass(v_mu1)
        mu2 = hpass(v_mu2)
        s11 = hpass(v_s11)
        s22 = hpass(v_s22)
        s12 = hpass(v_s12)

        mu1_sq = mu1 * mu1
        mu2_sq = mu2 * mu2
        mu1_mu2 = mu1 * mu2
        sigma1_sq = s11 - mu1_sq
        sigma2_sq = s22 - mu2_sq
        sigma12 = s12 - mu1_mu2

        numer = (2.0 * mu1_mu2 + C1) * (2.0 * sigma12 + C2)
        denom = (mu1_sq + mu2_sq + C1) * (sigma1_sq + sigma2_sq + C2)
        ssim_map = numer * pl.reciprocal(denom, approx=True)  # EUP slot, VALU-free
        loss = jnp.clip(1.0 - ssim_map, 0.0, 1.0) * 0.5
        o_ref[...] = loss.astype(o_ref.dtype)

    return kernel


def ssim_loss(img1: jax.Array, img2: jax.Array, *, window_size: int = 5,
              max_val: float = 1.0, reduction: str = "none") -> jax.Array:
    assert img1.shape == img2.shape and img1.ndim == 4
    assert img1.dtype == img2.dtype
    assert window_size % 2 == 1, "window_size must be odd (matches conv2d 'same' padding)"
    B, C, H, W = img1.shape
    pad = (window_size - 1) // 2
    C1 = (0.01 * max_val) ** 2
    C2 = (0.03 * max_val) ** 2
    w1 = [float(v) for v in _gaussian_kernel_1d(window_size, 1.5)]

    BC = B * C
    Hp, Wp = H + 2 * pad, W + 2 * pad

    # Free reshapes only — padding & f32 cast happen inside the kernel.
    x1 = img1.reshape(BC, H, W)
    x2 = img2.reshape(BC, H, W)

    TBC, TH = _choose_tiles(BC, H, W, pad)
    grid = (BC // TBC, H // TH)

    kernel = _make_ssim_kernel(w1, H, W, pad, TBC, TH, C1, C2)

    out = pl.pallas_call(
        kernel,
        out_shape=jax.ShapeDtypeStruct((BC, H, W), img1.dtype),
        grid_spec=pltpu.PrefetchScalarGridSpec(
            num_scalar_prefetch=0,
            grid=grid,
            in_specs=[
                pl.BlockSpec((TBC, H, W), lambda bc, h: (bc, 0, 0)),
                pl.BlockSpec((TBC, H, W), lambda bc, h: (bc, 0, 0)),
            ],
            out_specs=pl.BlockSpec((TBC, TH, W), lambda bc, h: (bc, h, 0)),
            scratch_shapes=[
                pltpu.VMEM((TBC, Hp, Wp), jnp.float32),
                pltpu.VMEM((TBC, Hp, Wp), jnp.float32),
            ],
        ),
        compiler_params=pltpu.CompilerParams(
            dimension_semantics=("parallel", "arbitrary"),
            vmem_limit_bytes=48 * 1024 * 1024,
        ),
    )(x1, x2)

    out = out.reshape(B, C, H, W)
    # TODO(synk): for reduction='mean'/'sum', accumulate the reduction inside the
    # kernel (scalar accumulator) to avoid writing the full loss map to HBM.
    if reduction == "mean":
        return jnp.mean(out)
    if reduction == "sum":
        return jnp.sum(out)
    return out


def _ssim_loss_ref(img1, img2, window_size=5, max_val=1.0):
    """Pure-jnp reference (same math as the PyTorch module)."""
    B, C, H, W = img1.shape
    pad = (window_size - 1) // 2
    C1 = (0.01 * max_val) ** 2
    C2 = (0.03 * max_val) ** 2
    k1 = _gaussian_kernel_1d(window_size, 1.5)
    w2 = np.outer(k1, k1)
    x1 = img1.astype(jnp.float32)
    x2 = img2.astype(jnp.float32)

    def filt(x):
        xp = jnp.pad(x, ((0, 0), (0, 0), (pad, pad), (pad, pad)))
        out = jnp.zeros((B, C, H, W), jnp.float32)
        for ky in range(window_size):
            for kx in range(window_size):
                out = out + float(w2[ky, kx]) * xp[:, :, ky:ky + H, kx:kx + W]
        return out

    mu1, mu2 = filt(x1), filt(x2)
    mu1_sq, mu2_sq, mu1_mu2 = mu1 * mu1, mu2 * mu2, mu1 * mu2
    sigma1_sq = filt(x1 * x1) - mu1_sq
    sigma2_sq = filt(x2 * x2) - mu2_sq
    sigma12 = filt(x1 * x2) - mu1_mu2
    ssim_map = ((2 * mu1_mu2 + C1) * (2 * sigma12 + C2)) / (
        (mu1_sq + mu2_sq + C1) * (sigma1_sq + sigma2_sq + C2))
    return jnp.clip(1.0 - ssim_map, 0.0, 1.0) / 2.0


if __name__ == "__main__":
    key = jax.random.PRNGKey(0)
    k1, k2 = jax.random.split(key)
    B, Cc, H, W = 2, 4, 16, 16
    img1 = jax.random.uniform(k1, (B, Cc, H, W), dtype=jnp.float32)
    img2 = jax.random.uniform(k2, (B, Cc, H, W), dtype=jnp.float32)

    loss = ssim_loss(img1, img2, window_size=5, reduction="none")
    loss = jax.block_until_ready(loss)
    assert loss.shape == (B, Cc, H, W)

    ref = jax.block_until_ready(_ssim_loss_ref(img1, img2, window_size=5))
    max_err = float(jnp.max(jnp.abs(loss.astype(jnp.float32) - ref)))
    assert max_err < 2e-2, f"max abs err vs reference: {max_err}"

    print("KERNEL_OK")
</pallas_src>

<mosaic_0001>
module attributes {stable_mosaic.version = 11 : i64} {
  func.func @kernel(%arg0: i32, %arg1: i32, %arg2: memref<4x16x16xf32, #tpu.memory_space<vmem>>, %arg3: memref<4x16x16xf32, #tpu.memory_space<vmem>>, %arg4: memref<4x16x16xf32, #tpu.memory_space<vmem>>, %arg5: memref<4x20x20xf32, #tpu.memory_space<vmem>>, %arg6: memref<4x20x20xf32, #tpu.memory_space<vmem>>) attributes {dimension_semantics = [#tpu.dimension_semantics<parallel>, #tpu.dimension_semantics<arbitrary>], iteration_bounds = array<i64: 2, 1>, scalar_prefetch = 0 : i64, scratch_operands = 2 : i64, tpu.core_type = #tpu.core_type<tc>, window_params = [{transform_indices = @transform_0, window_bounds = array<i64: 4, 16, 16>}, {transform_indices = @transform_1, window_bounds = array<i64: 4, 16, 16>}, {transform_indices = @transform_2, window_bounds = array<i64: 4, 16, 16>}]} {
    %c0_i32 = arith.constant 0 : i32
    %0 = arith.cmpi eq, %arg1, %c0_i32 : i32
    %1 = arith.extui %0 : i1 to i32
    %c0_i32_0 = arith.constant 0 : i32
    %2 = arith.cmpi ne, %1, %c0_i32_0 : i32
    scf.if %2 {
      %cst_66 = arith.constant 0.000000e+00 : f32
      %235 = vector.broadcast %cst_66 : f32 to vector<4x2x20xf32>
      %cst_67 = arith.constant 0.000000e+00 : f32
      %236 = vector.broadcast %cst_67 : f32 to vector<4x20x2xf32>
      %c0_68 = arith.constant 0 : index
      %c0_69 = arith.constant 0 : index
      %c0_70 = arith.constant 0 : index
      %237 = vector.load %arg5[%c0_68, %c0_69, %c0_70] : memref<4x20x20xf32, #tpu.memory_space<vmem>>, vector<4x2x20xf32>
      tpu.vector_store %arg5[%c0_68, %c0_69, %c0_70], %235 {strides = array<i32>} : memref<4x20x20xf32, #tpu.memory_space<vmem>>, vector<4x2x20xf32>,
      %c0_71 = arith.constant 0 : index
      %c18 = arith.constant 18 : index
      %c0_72 = arith.constant 0 : index
      %238 = vector.load %arg5[%c0_71, %c18, %c0_72] : memref<4x20x20xf32, #tpu.memory_space<vmem>>, vector<4x2x20xf32>
      tpu.vector_store %arg5[%c0_71, %c18, %c0_72], %235 {strides = array<i32>} : memref<4x20x20xf32, #tpu.memory_space<vmem>>, vector<4x2x20xf32>,
      %c0_73 = arith.constant 0 : index
      %c0_74 = arith.constant 0 : index
      %c0_75 = arith.constant 0 : index
      %239 = vector.load %arg5[%c0_73, %c0_74, %c0_75] : memref<4x20x20xf32, #tpu.memory_space<vmem>>, vector<4x20x2xf32>
      tpu.vector_store %arg5[%c0_73, %c0_74, %c0_75], %236 {strides = array<i32>} : memref<4x20x20xf32, #tpu.memory_space<vmem>>, vector<4x20x2xf32>,
      %c0_76 = arith.constant 0 : index
      %c0_77 = arith.constant 0 : index
      %c18_78 = arith.constant 18 : index
      %240 = vector.load %arg5[%c0_76, %c0_77, %c18_78] : memref<4x20x20xf32, #tpu.memory_space<vmem>>, vector<4x20x2xf32>
      tpu.vector_store %arg5[%c0_76, %c0_77, %c18_78], %236 {strides = array<i32>} : memref<4x20x20xf32, #tpu.memory_space<vmem>>, vector<4x20x2xf32>,
      %c0_79 = arith.constant 0 : index
      %c0_80 = arith.constant 0 : index
      %c0_81 = arith.constant 0 : index
      %241 = vector.load %arg6[%c0_79, %c0_80, %c0_81] : memref<4x20x20xf32, #tpu.memory_space<vmem>>, vector<4x2x20xf32>
      tpu.vector_store %arg6[%c0_79, %c0_80, %c0_81], %235 {strides = array<i32>} : memref<4x20x20xf32, #tpu.memory_space<vmem>>, vector<4x2x20xf32>,
      %c0_82 = arith.constant 0 : index
      %c18_83 = arith.constant 18 : index
      %c0_84 = arith.constant 0 : index
      %242 = vector.load %arg6[%c0_82, %c18_83, %c0_84] : memref<4x20x20xf32, #tpu.memory_space<vmem>>, vector<4x2x20xf32>
      tpu.vector_store %arg6[%c0_82, %c18_83, %c0_84], %235 {strides = array<i32>} : memref<4x20x20xf32, #tpu.memory_space<vmem>>, vector<4x2x20xf32>,
      %c0_85 = arith.constant 0 : index
      %c0_86 = arith.constant 0 : index
      %c0_87 = arith.constant 0 : index
      %243 = vector.load %arg6[%c0_85, %c0_86, %c0_87] : memref<4x20x20xf32, #tpu.memory_space<vmem>>, vector<4x20x2xf32>
      tpu.vector_store %arg6[%c0_85, %c0_86, %c0_87], %236 {strides = array<i32>} : memref<4x20x20xf32, #tpu.memory_space<vmem>>, vector<4x20x2xf32>,
      %c0_88 = arith.constant 0 : index
      %c0_89 = arith.constant 0 : index
      %c18_90 = arith.constant 18 : index
      %244 = vector.load %arg6[%c0_88, %c0_89, %c18_90] : memref<4x20x20xf32, #tpu.memory_space<vmem>>, vector<4x20x2xf32>
      tpu.vector_store %arg6[%c0_88, %c0_89, %c18_90], %236 {strides = array<i32>} : memref<4x20x20xf32, #tpu.memory_space<vmem>>, vector<4x20x2xf32>,
      %c0_91 = arith.constant 0 : index
      %c0_92 = arith.constant 0 : index
      %c0_93 = arith.constant 0 : index
      %245 = vector.load %arg2[%c0_91, %c0_92, %c0_93] : memref<4x16x16xf32, #tpu.memory_space<vmem>>, vector<4x16x16xf32>
      %c0_94 = arith.constant 0 : index
      %c2 = arith.constant 2 : index
      %c2_95 = arith.constant 2 : index
      %246 = vector.load %arg5[%c0_94, %c2, %c2_95] : memref<4x20x20xf32, #tpu.memory_space<vmem>>, vector<4x16x16xf32>
      tpu.vector_store %arg5[%c0_94, %c2, %c2_95], %245 {strides = array<i32>} : memref<4x20x20xf32, #tpu.memory_space<vmem>>, vector<4x16x16xf32>,
      %c0_96 = arith.constant 0 : index
      %c0_97 = arith.constant 0 : index
      %c0_98 = arith.constant 0 : index
      %247 = vector.load %arg3[%c0_96, %c0_97, %c0_98] : memref<4x16x16xf32, #tpu.memory_space<vmem>>, vector<4x16x16xf32>
      %c0_99 = arith.constant 0 : index
      %c2_100 = arith.constant 2 : index
      %c2_101 = arith.constant 2 : index
      %248 = vector.load %arg6[%c0_99, %c2_100, %c2_101] : memref<4x20x20xf32, #tpu.memory_space<vmem>>, vector<4x16x16xf32>
      tpu.vector_store %arg6[%c0_99, %c2_100, %c2_101], %247 {strides = array<i32>} : memref<4x20x20xf32, #tpu.memory_space<vmem>>, vector<4x16x16xf32>,
    } else {
    }
    %c16_i32 = arith.constant 16 : i32
    %3 = arith.muli %arg1, %c16_i32 : i32
    %4 = tpu.assume_multiple %3, 16 : i32
    %c0 = arith.constant 0 : index
    %5 = arith.index_cast %4 : i32 to index
    %c0_1 = arith.constant 0 : index
    %6 = vector.load %arg5[%c0, %5, %c0_1] : memref<4x20x20xf32, #tpu.memory_space<vmem>>, vector<4x20x20xf32>
    %c0_2 = arith.constant 0 : index
    %7 = arith.index_cast %4 : i32 to index
    %c0_3 = arith.constant 0 : index
    %8 = vector.load %arg6[%c0_2, %7, %c0_3] : memref<4x20x20xf32, #tpu.memory_space<vmem>>, vector<4x20x20xf32>
    %9 = arith.mulf %6, %6 : vector<4x20x20xf32>
    %10 = arith.mulf %8, %8 : vector<4x20x20xf32>
    %11 = arith.mulf %6, %8 : vector<4x20x20xf32>
    %12 = vector.extract_strided_slice %6 {offsets = [0, 0, 0], sizes = [4, 16, 20], strides = [1, 1, 1]} : vector<4x20x20xf32> to vector<4x16x20xf32>
    %cst = arith.constant 0.120078385 : f32
    %13 = vector.broadcast %cst : f32 to vector<4x16x20xf32>
    %14 = arith.mulf %13, %12 : vector<4x16x20xf32>
    %15 = vector.extract_strided_slice %6 {offsets = [0, 1, 0], sizes = [4, 16, 20], strides = [1, 1, 1]} : vector<4x20x20xf32> to vector<4x16x20xf32>
    %cst_4 = arith.constant 0.233880758 : f32
    %16 = vector.broadcast %cst_4 : f32 to vector<4x16x20xf32>
    %17 = arith.mulf %16, %15 : vector<4x16x20xf32>
    %18 = arith.addf %14, %17 : vector<4x16x20xf32>
    %19 = vector.extract_strided_slice %6 {offsets = [0, 2, 0], sizes = [4, 16, 20], strides = [1, 1, 1]} : vector<4x20x20xf32> to vector<4x16x20xf32>
    %cst_5 = arith.constant 0.292081714 : f32
    %20 = vector.broadcast %cst_5 : f32 to vector<4x16x20xf32>
    %21 = arith.mulf %20, %19 : vector<4x16x20xf32>
    %22 = arith.addf %18, %21 : vector<4x16x20xf32>
    %23 = vector.extract_strided_slice %6 {offsets = [0, 3, 0], sizes = [4, 16, 20], strides = [1, 1, 1]} : vector<4x20x20xf32> to vector<4x16x20xf32>
    %cst_6 = arith.constant 0.233880758 : f32
    %24 = vector.broadcast %cst_6 : f32 to vector<4x16x20xf32>
    %25 = arith.mulf %24, %23 : vector<4x16x20xf32>
    %26 = arith.addf %22, %25 : vector<4x16x20xf32>
    %27 = vector.extract_strided_slice %6 {offsets = [0, 4, 0], sizes = [4, 16, 20], strides = [1, 1, 1]} : vector<4x20x20xf32> to vector<4x16x20xf32>
    %cst_7 = arith.constant 0.120078385 : f32
    %28 = vector.broadcast %cst_7 : f32 to vector<4x16x20xf32>
    %29 = arith.mulf %28, %27 : vector<4x16x20xf32>
    %30 = arith.addf %26, %29 : vector<4x16x20xf32>
    %31 = vector.extract_strided_slice %8 {offsets = [0, 0, 0], sizes = [4, 16, 20], strides = [1, 1, 1]} : vector<4x20x20xf32> to vector<4x16x20xf32>
    %cst_8 = arith.constant 0.120078385 : f32
    %32 = vector.broadcast %cst_8 : f32 to vector<4x16x20xf32>
    %33 = arith.mulf %32, %31 : vector<4x16x20xf32>
    %34 = vector.extract_strided_slice %8 {offsets = [0, 1, 0], sizes = [4, 16, 20], strides = [1, 1, 1]} : vector<4x20x20xf32> to vector<4x16x20xf32>
    %cst_9 = arith.constant 0.233880758 : f32
    %35 = vector.broadcast %cst_9 : f32 to vector<4x16x20xf32>
    %36 = arith.mulf %35, %34 : vector<4x16x20xf32>
    %37 = arith.addf %33, %36 : vector<4x16x20xf32>
    %38 = vector.extract_strided_slice %8 {offsets = [0, 2, 0], sizes = [4, 16, 20], strides = [1, 1, 1]} : vector<4x20x20xf32> to vector<4x16x20xf32>
    %cst_10 = arith.constant 0.292081714 : f32
    %39 = vector.broadcast %cst_10 : f32 to vector<4x16x20xf32>
    %40 = arith.mulf %39, %38 : vector<4x16x20xf32>
    %41 = arith.addf %37, %40 : vector<4x16x20xf32>
    %42 = vector.extract_strided_slice %8 {offsets = [0, 3, 0], sizes = [4, 16, 20], strides = [1, 1, 1]} : vector<4x20x20xf32> to vector<4x16x20xf32>
    %cst_11 = arith.constant 0.233880758 : f32
    %43 = vector.broadcast %cst_11 : f32 to vector<4x16x20xf32>
    %44 = arith.mulf %43, %42 : vector<4x16x20xf32>
    %45 = arith.addf %41, %44 : vector<4x16x20xf32>
    %46 = vector.extract_strided_slice %8 {offsets = [0, 4, 0], sizes = [4, 16, 20], strides = [1, 1, 1]} : vector<4x20x20xf32> to vector<4x16x20xf32>
    %cst_12 = arith.constant 0.120078385 : f32
    %47 = vector.broadcast %cst_12 : f32 to vector<4x16x20xf32>
    %48 = arith.mulf %47, %46 : vector<4x16x20xf32>
    %49 = arith.addf %45, %48 : vector<4x16x20xf32>
    %50 = vector.extract_strided_slice %9 {offsets = [0, 0, 0], sizes = [4, 16, 20], strides = [1, 1, 1]} : vector<4x20x20xf32> to vector<4x16x20xf32>
    %cst_13 = arith.constant 0.120078385 : f32
    %51 = vector.broadcast %cst_13 : f32 to vector<4x16x20xf32>
    %52 = arith.mulf %51, %50 : vector<4x16x20xf32>
    %53 = vector.extract_strided_slice %9 {offsets = [0, 1, 0], sizes = [4, 16, 20], strides = [1, 1, 1]} : vector<4x20x20xf32> to vector<4x16x20xf32>
    %cst_14 = arith.constant 0.233880758 : f32
    %54 = vector.broadcast %cst_14 : f32 to vector<4x16x20xf32>
    %55 = arith.mulf %54, %53 : vector<4x16x20xf32>
    %56 = arith.addf %52, %55 : vector<4x16x20xf32>
    %57 = vector.extract_strided_slice %9 {offsets = [0, 2, 0], sizes = [4, 16, 20], strides = [1, 1, 1]} : vector<4x20x20xf32> to vector<4x16x20xf32>
    %cst_15 = arith.constant 0.292081714 : f32
    %58 = vector.broadcast %cst_15 : f32 to vector<4x16x20xf32>
    %59 = arith.mulf %58, %57 : vector<4x16x20xf32>
    %60 = arith.addf %56, %59 : vector<4x16x20xf32>
    %61 = vector.extract_strided_slice %9 {offsets = [0, 3, 0], sizes = [4, 16, 20], strides = [1, 1, 1]} : vector<4x20x20xf32> to vector<4x16x20xf32>
    %cst_16 = arith.constant 0.233880758 : f32
    %62 = vector.broadcast %cst_16 : f32 to vector<4x16x20xf32>
    %63 = arith.mulf %62, %61 : vector<4x16x20xf32>
    %64 = arith.addf %60, %63 : vector<4x16x20xf32>
    %65 = vector.extract_strided_slice %9 {offsets = [0, 4, 0], sizes = [4, 16, 20], strides = [1, 1, 1]} : vector<4x20x20xf32> to vector<4x16x20xf32>
    %cst_17 = arith.constant 0.120078385 : f32
    %66 = vector.broadcast %cst_17 : f32 to vector<4x16x20xf32>
    %67 = arith.mulf %66, %65 : vector<4x16x20xf32>
    %68 = arith.addf %64, %67 : vector<4x16x20xf32>
    %69 = vector.extract_strided_slice %10 {offsets = [0, 0, 0], sizes = [4, 16, 20], strides = [1, 1, 1]} : vector<4x20x20xf32> to vector<4x16x20xf32>
    %cst_18 = arith.constant 0.120078385 : f32
    %70 = vector.broadcast %cst_18 : f32 to vector<4x16x20xf32>
    %71 = arith.mulf %70, %69 : vector<4x16x20xf32>
    %72 = vector.extract_strided_slice %10 {offsets = [0, 1, 0], sizes = [4, 16, 20], strides = [1, 1, 1]} : vector<4x20x20xf32> to vector<4x16x20xf32>
    %cst_19 = arith.constant 0.233880758 : f32
    %73 = vector.broadcast %cst_19 : f32 to vector<4x16x20xf32>
    %74 = arith.mulf %73, %72 : vector<4x16x20xf32>
    %75 = arith.addf %71, %74 : vector<4x16x20xf32>
    %76 = vector.extract_strided_slice %10 {offsets = [0, 2, 0], sizes = [4, 16, 20], strides = [1, 1, 1]} : vector<4x20x20xf32> to vector<4x16x20xf32>
    %cst_20 = arith.constant 0.292081714 : f32
    %77 = vector.broadcast %cst_20 : f32 to vector<4x16x20xf32>
    %78 = arith.mulf %77, %76 : vector<4x16x20xf32>
    %79 = arith.addf %75, %78 : vector<4x16x20xf32>
    %80 = vector.extract_strided_slice %10 {offsets = [0, 3, 0], sizes = [4, 16, 20], strides = [1, 1, 1]} : vector<4x20x20xf32> to vector<4x16x20xf32>
    %cst_21 = arith.constant 0.233880758 : f32
    %81 = vector.broadcast %cst_21 : f32 to vector<4x16x20xf32>
    %82 = arith.mulf %81, %80 : vector<4x16x20xf32>
    %83 = arith.addf %79, %82 : vector<4x16x20xf32>
    %84 = vector.extract_strided_slice %10 {offsets = [0, 4, 0], sizes = [4, 16, 20], strides = [1, 1, 1]} : vector<4x20x20xf32> to vector<4x16x20xf32>
    %cst_22 = arith.constant 0.120078385 : f32
    %85 = vector.broadcast %cst_22 : f32 to vector<4x16x20xf32>
    %86 = arith.mulf %85, %84 : vector<4x16x20xf32>
    %87 = arith.addf %83, %86 : vector<4x16x20xf32>
    %88 = vector.extract_strided_slice %11 {offsets = [0, 0, 0], sizes = [4, 16, 20], strides = [1, 1, 1]} : vector<4x20x20xf32> to vector<4x16x20xf32>
    %cst_23 = arith.constant 0.120078385 : f32
    %89 = vector.broadcast %cst_23 : f32 to vector<4x16x20xf32>
    %90 = arith.mulf %89, %88 : vector<4x16x20xf32>
    %91 = vector.extract_strided_slice %11 {offsets = [0, 1, 0], sizes = [4, 16, 20], strides = [1, 1, 1]} : vector<4x20x20xf32> to vector<4x16x20xf32>
    %cst_24 = arith.constant 0.233880758 : f32
    %92 = vector.broadcast %cst_24 : f32 to vector<4x16x20xf32>
    %93 = arith.mulf %92, %91 : vector<4x16x20xf32>
    %94 = arith.addf %90, %93 : vector<4x16x20xf32>
    %95 = vector.extract_strided_slice %11 {offsets = [0, 2, 0], sizes = [4, 16, 20], strides = [1, 1, 1]} : vector<4x20x20xf32> to vector<4x16x20xf32>
    %cst_25 = arith.constant 0.292081714 : f32
    %96 = vector.broadcast %cst_25 : f32 to vector<4x16x20xf32>
    %97 = arith.mulf %96, %95 : vector<4x16x20xf32>
    %98 = arith.addf %94, %97 : vector<4x16x20xf32>
    %99 = vector.extract_strided_slice %11 {offsets = [0, 3, 0], sizes = [4, 16, 20], strides = [1, 1, 1]} : vector<4x20x20xf32> to vector<4x16x20xf32>
    %cst_26 = arith.constant 0.233880758 : f32
    %100 = vector.broadcast %cst_26 : f32 to vector<4x16x20xf32>
    %101 = arith.mulf %100, %99 : vector<4x16x20xf32>
    %102 = arith.addf %98, %101 : vector<4x16x20xf32>
    %103 = vector.extract_strided_slice %11 {offsets = [0, 4, 0], sizes = [4, 16, 20], strides = [1, 1, 1]} : vector<4x20x20xf32> to vector<4x16x20xf32>
    %cst_27 = arith.constant 0.120078385 : f32
    %104 = vector.broadcast %cst_27 : f32 to vector<4x16x20xf32>
    %105 = arith.mulf %104, %103 : vector<4x16x20xf32>
    %106 = arith.addf %102, %105 : vector<4x16x20xf32>
    %107 = vector.extract_strided_slice %30 {offsets = [0, 0, 0], sizes = [4, 16, 16], strides = [1, 1, 1]} : vector<4x16x20xf32> to vector<4x16x16xf32>
    %cst_28 = arith.constant 0.120078385 : f32
    %108 = vector.broadcast %cst_28 : f32 to vector<4x16x16xf32>
    %109 = arith.mulf %108, %107 : vector<4x16x16xf32>
    %110 = vector.extract_strided_slice %30 {offsets = [0, 0, 1], sizes = [4, 16, 16], strides = [1, 1, 1]} : vector<4x16x20xf32> to vector<4x16x16xf32>
    %cst_29 = arith.constant 0.233880758 : f32
    %111 = vector.broadcast %cst_29 : f32 to vector<4x16x16xf32>
    %112 = arith.mulf %111, %110 : vector<4x16x16xf32>
    %113 = arith.addf %109, %112 : vector<4x16x16xf32>
    %114 = vector.extract_strided_slice %30 {offsets = [0, 0, 2], sizes = [4, 16, 16], strides = [1, 1, 1]} : vector<4x16x20xf32> to vector<4x16x16xf32>
    %cst_30 = arith.constant 0.292081714 : f32
    %115 = vector.broadcast %cst_30 : f32 to vector<4x16x16xf32>
    %116 = arith.mulf %115, %114 : vector<4x16x16xf32>
    %117 = arith.addf %113, %116 : vector<4x16x16xf32>
    %118 = vector.extract_strided_slice %30 {offsets = [0, 0, 3], sizes = [4, 16, 16], strides = [1, 1, 1]} : vector<4x16x20xf32> to vector<4x16x16xf32>
    %cst_31 = arith.constant 0.233880758 : f32
    %119 = vector.broadcast %cst_31 : f32 to vector<4x16x16xf32>
    %120 = arith.mulf %119, %118 : vector<4x16x16xf32>
    %121 = arith.addf %117, %120 : vector<4x16x16xf32>
    %122 = vector.extract_strided_slice %30 {offsets = [0, 0, 4], sizes = [4, 16, 16], strides = [1, 1, 1]} : vector<4x16x20xf32> to vector<4x16x16xf32>
    %cst_32 = arith.constant 0.120078385 : f32
    %123 = vector.broadcast %cst_32 : f32 to vector<4x16x16xf32>
    %124 = arith.mulf %123, %122 : vector<4x16x16xf32>
    %125 = arith.addf %121, %124 : vector<4x16x16xf32>
    %126 = vector.extract_strided_slice %49 {offsets = [0, 0, 0], sizes = [4, 16, 16], strides = [1, 1, 1]} : vector<4x16x20xf32> to vector<4x16x16xf32>
    %cst_33 = arith.constant 0.120078385 : f32
    %127 = vector.broadcast %cst_33 : f32 to vector<4x16x16xf32>
    %128 = arith.mulf %127, %126 : vector<4x16x16xf32>
    %129 = vector.extract_strided_slice %49 {offsets = [0, 0, 1], sizes = [4, 16, 16], strides = [1, 1, 1]} : vector<4x16x20xf32> to vector<4x16x16xf32>
    %cst_34 = arith.constant 0.233880758 : f32
    %130 = vector.broadcast %cst_34 : f32 to vector<4x16x16xf32>
    %131 = arith.mulf %130, %129 : vector<4x16x16xf32>
    %132 = arith.addf %128, %131 : vector<4x16x16xf32>
    %133 = vector.extract_strided_slice %49 {offsets = [0, 0, 2], sizes = [4, 16, 16], strides = [1, 1, 1]} : vector<4x16x20xf32> to vector<4x16x16xf32>
    %cst_35 = arith.constant 0.292081714 : f32
    %134 = vector.broadcast %cst_35 : f32 to vector<4x16x16xf32>
    %135 = arith.mulf %134, %133 : vector<4x16x16xf32>
    %136 = arith.addf %132, %135 : vector<4x16x16xf32>
    %137 = vector.extract_strided_slice %49 {offsets = [0, 0, 3], sizes = [4, 16, 16], strides = [1, 1, 1]} : vector<4x16x20xf32> to vector<4x16x16xf32>
    %cst_36 = arith.constant 0.233880758 : f32
    %138 = vector.broadcast %cst_36 : f32 to vector<4x16x16xf32>
    %139 = arith.mulf %138, %137 : vector<4x16x16xf32>
    %140 = arith.addf %136, %139 : vector<4x16x16xf32>
    %141 = vector.extract_strided_slice %49 {offsets = [0, 0, 4], sizes = [4, 16, 16], strides = [1, 1, 1]} : vector<4x16x20xf32> to vector<4x16x16xf32>
    %cst_37 = arith.constant 0.120078385 : f32
    %142 = vector.broadcast %cst_37 : f32 to vector<4x16x16xf32>
    %143 = arith.mulf %142, %141 : vector<4x16x16xf32>
    %144 = arith.addf %140, %143 : vector<4x16x16xf32>
    %145 = vector.extract_strided_slice %68 {offsets = [0, 0, 0], sizes = [4, 16, 16], strides = [1, 1, 1]} : vector<4x16x20xf32> to vector<4x16x16xf32>
    %cst_38 = arith.constant 0.120078385 : f32
    %146 = vector.broadcast %cst_38 : f32 to vector<4x16x16xf32>
    %147 = arith.mulf %146, %145 : vector<4x16x16xf32>
    %148 = vector.extract_strided_slice %68 {offsets = [0, 0, 1], sizes = [4, 16, 16], strides = [1, 1, 1]} : vector<4x16x20xf32> to vector<4x16x16xf32>
    %cst_39 = arith.constant 0.233880758 : f32
    %149 = vector.broadcast %cst_39 : f32 to vector<4x16x16xf32>
    %150 = arith.mulf %149, %148 : vector<4x16x16xf32>
    %151 = arith.addf %147, %150 : vector<4x16x16xf32>
    %152 = vector.extract_strided_slice %68 {offsets = [0, 0, 2], sizes = [4, 16, 16], strides = [1, 1, 1]} : vector<4x16x20xf32> to vector<4x16x16xf32>
    %cst_40 = arith.constant 0.292081714 : f32
    %153 = vector.broadcast %cst_40 : f32 to vector<4x16x16xf32>
    %154 = arith.mulf %153, %152 : vector<4x16x16xf32>
    %155 = arith.addf %151, %154 : vector<4x16x16xf32>
    %156 = vector.extract_strided_slice %68 {offsets = [0, 0, 3], sizes = [4, 16, 16], strides = [1, 1, 1]} : vector<4x16x20xf32> to vector<4x16x16xf32>
    %cst_41 = arith.constant 0.233880758 : f32
    %157 = vector.broadcast %cst_41 : f32 to vector<4x16x16xf32>
    %158 = arith.mulf %157, %156 : vector<4x16x16xf32>
    %159 = arith.addf %155, %158 : vector<4x16x16xf32>
    %160 = vector.extract_strided_slice %68 {offsets = [0, 0, 4], sizes = [4, 16, 16], strides = [1, 1, 1]} : vector<4x16x20xf32> to vector<4x16x16xf32>
    %cst_42 = arith.constant 0.120078385 : f32
    %161 = vector.broadcast %cst_42 : f32 to vector<4x16x16xf32>
    %162 = arith.mulf %161, %160 : vector<4x16x16xf32>
    %163 = arith.addf %159, %162 : vector<4x16x16xf32>
    %164 = vector.extract_strided_slice %87 {offsets = [0, 0, 0], sizes = [4, 16, 16], strides = [1, 1, 1]} : vector<4x16x20xf32> to vector<4x16x16xf32>
    %cst_43 = arith.constant 0.120078385 : f32
    %165 = vector.broadcast %cst_43 : f32 to vector<4x16x16xf32>
    %166 = arith.mulf %165, %164 : vector<4x16x16xf32>
    %167 = vector.extract_strided_slice %87 {offsets = [0, 0, 1], sizes = [4, 16, 16], strides = [1, 1, 1]} : vector<4x16x20xf32> to vector<4x16x16xf32>
    %cst_44 = arith.constant 0.233880758 : f32
    %168 = vector.broadcast %cst_44 : f32 to vector<4x16x16xf32>
    %169 = arith.mulf %168, %167 : vector<4x16x16xf32>
    %170 = arith.addf %166, %169 : vector<4x16x16xf32>
    %171 = vector.extract_strided_slice %87 {offsets = [0, 0, 2], sizes = [4, 16, 16], strides = [1, 1, 1]} : vector<4x16x20xf32> to vector<4x16x16xf32>
    %cst_45 = arith.constant 0.292081714 : f32
    %172 = vector.broadcast %cst_45 : f32 to vector<4x16x16xf32>
    %173 = arith.mulf %172, %171 : vector<4x16x16xf32>
    %174 = arith.addf %170, %173 : vector<4x16x16xf32>
    %175 = vector.extract_strided_slice %87 {offsets = [0, 0, 3], sizes = [4, 16, 16], strides = [1, 1, 1]} : vector<4x16x20xf32> to vector<4x16x16xf32>
    %cst_46 = arith.constant 0.233880758 : f32
    %176 = vector.broadcast %cst_46 : f32 to vector<4x16x16xf32>
    %177 = arith.mulf %176, %175 : vector<4x16x16xf32>
    %178 = arith.addf %174, %177 : vector<4x16x16xf32>
    %179 = vector.extract_strided_slice %87 {offsets = [0, 0, 4], sizes = [4, 16, 16], strides = [1, 1, 1]} : vector<4x16x20xf32> to vector<4x16x16xf32>
    %cst_47 = arith.constant 0.120078385 : f32
    %180 = vector.broadcast %cst_47 : f32 to vector<4x16x16xf32>
    %181 = arith.mulf %180, %179 : vector<4x16x16xf32>
    %182 = arith.addf %178, %181 : vector<4x16x16xf32>
    %183 = vector.extract_strided_slice %106 {offsets = [0, 0, 0], sizes = [4, 16, 16], strides = [1, 1, 1]} : vector<4x16x20xf32> to vector<4x16x16xf32>
    %cst_48 = arith.constant 0.120078385 : f32
    %184 = vector.broadcast %cst_48 : f32 to vector<4x16x16xf32>
    %185 = arith.mulf %184, %183 : vector<4x16x16xf32>
    %186 = vector.extract_strided_slice %106 {offsets = [0, 0, 1], sizes = [4, 16, 16], strides = [1, 1, 1]} : vector<4x16x20xf32> to vector<4x16x16xf32>
    %cst_49 = arith.constant 0.233880758 : f32
    %187 = vector.broadcast %cst_49 : f32 to vector<4x16x16xf32>
    %188 = arith.mulf %187, %186 : vector<4x16x16xf32>
    %189 = arith.addf %185, %188 : vector<4x16x16xf32>
    %190 = vector.extract_strided_slice %106 {offsets = [0, 0, 2], sizes = [4, 16, 16], strides = [1, 1, 1]} : vector<4x16x20xf32> to vector<4x16x16xf32>
    %cst_50 = arith.constant 0.292081714 : f32
    %191 = vector.broadcast %cst_50 : f32 to vector<4x16x16xf32>
    %192 = arith.mulf %191, %190 : vector<4x16x16xf32>
    %193 = arith.addf %189, %192 : vector<4x16x16xf32>
    %194 = vector.extract_strided_slice %106 {offsets = [0, 0, 3], sizes = [4, 16, 16], strides = [1, 1, 1]} : vector<4x16x20xf32> to vector<4x16x16xf32>
    %cst_51 = arith.constant 0.233880758 : f32
    %195 = vector.broadcast %cst_51 : f32 to vector<4x16x16xf32>
    %196 = arith.mulf %195, %194 : vector<4x16x16xf32>
    %197 = arith.addf %193, %196 : vector<4x16x16xf32>
    %198 = vector.extract_strided_slice %106 {offsets = [0, 0, 4], sizes = [4, 16, 16], strides = [1, 1, 1]} : vector<4x16x20xf32> to vector<4x16x16xf32>
    %cst_52 = arith.constant 0.120078385 : f32
    %199 = vector.broadcast %cst_52 : f32 to vector<4x16x16xf32>
    %200 = arith.mulf %199, %198 : vector<4x16x16xf32>
    %201 = arith.addf %197, %200 : vector<4x16x16xf32>
    %202 = arith.mulf %125, %125 : vector<4x16x16xf32>
    %203 = arith.mulf %144, %144 : vector<4x16x16xf32>
    %204 = arith.mulf %125, %144 : vector<4x16x16xf32>
    %205 = arith.subf %163, %202 : vector<4x16x16xf32>
    %206 = arith.subf %182, %203 : vector<4x16x16xf32>
    %207 = arith.subf %201, %204 : vector<4x16x16xf32>
    %cst_53 = arith.constant 2.000000e+00 : f32
    %208 = vector.broadcast %cst_53 : f32 to vector<4x16x16xf32>
    %209 = arith.mulf %208, %204 : vector<4x16x16xf32>
    %cst_54 = arith.constant 9.99999974E-5 : f32
    %210 = vector.broadcast %cst_54 : f32 to vector<4x16x16xf32>
    %211 = arith.addf %209, %210 : vector<4x16x16xf32>
    %cst_55 = arith.constant 2.000000e+00 : f32
    %212 = vector.broadcast %cst_55 : f32 to vector<4x16x16xf32>
    %213 = arith.mulf %212, %207 : vector<4x16x16xf32>
    %cst_56 = arith.constant 8.99999984E-4 : f32
    %214 = vector.broadcast %cst_56 : f32 to vector<4x16x16xf32>
    %215 = arith.addf %213, %214 : vector<4x16x16xf32>
    %216 = arith.mulf %211, %215 : vector<4x16x16xf32>
    %217 = arith.addf %202, %203 : vector<4x16x16xf32>
    %cst_57 = arith.constant 9.99999974E-5 : f32
    %218 = vector.broadcast %cst_57 : f32 to vector<4x16x16xf32>
    %219 = arith.addf %217, %218 : vector<4x16x16xf32>
    %220 = arith.addf %205, %206 : vector<4x16x16xf32>
    %cst_58 = arith.constant 8.99999984E-4 : f32
    %221 = vector.broadcast %cst_58 : f32 to vector<4x16x16xf32>
    %222 = arith.addf %220, %221 : vector<4x16x16xf32>
    %223 = arith.mulf %219, %222 : vector<4x16x16xf32>
    %224 = tpu.reciprocal %223 {approx = true} : vector<4x16x16xf32> -> vector<4x16x16xf32>
    %225 = arith.mulf %216, %224 : vector<4x16x16xf32>
    %cst_59 = arith.constant 1.000000e+00 : f32
    %226 = vector.broadcast %cst_59 : f32 to vector<4x16x16xf32>
    %227 = arith.subf %226, %225 : vector<4x16x16xf32>
    %cst_60 = arith.constant 0.000000e+00 : f32
    %cst_61 = arith.constant 1.000000e+00 : f32
    %228 = vector.broadcast %cst_60 : f32 to vector<4x16x16xf32>
    %229 = arith.maximumf %228, %227 : vector<4x16x16xf32>
    %230 = vector.broadcast %cst_61 : f32 to vector<4x16x16xf32>
    %231 = arith.minimumf %230, %229 : vector<4x16x16xf32>
    %cst_62 = arith.constant 5.000000e-01 : f32
    %232 = vector.broadcast %cst_62 : f32 to vector<4x16x16xf32>
    %233 = arith.mulf %231, %232 : vector<4x16x16xf32>
    %c0_63 = arith.constant 0 : index
    %c0_64 = arith.constant 0 : index
    %c0_65 = arith.constant 0 : index
    %234 = vector.load %arg4[%c0_63, %c0_64, %c0_65] : memref<4x16x16xf32, #tpu.memory_space<vmem>>, vector<4x16x16xf32>
    tpu.vector_store %arg4[%c0_63, %c0_64, %c0_65], %233 {strides = array<i32>} : memref<4x16x16xf32, #tpu.memory_space<vmem>>, vector<4x16x16xf32>,
    return
  }
  func.func @transform_0(%arg0: i32, %arg1: i32) -> (i32, i32, i32) {
    %c0_i32 = arith.constant 0 : i32
    %c0_i32_0 = arith.constant 0 : i32
    %c0_i32_1 = arith.constant 0 : i32
    return %arg0, %c0_i32, %c0_i32_0 : i32, i32, i32
  }
  func.func @transform_1(%arg0: i32, %arg1: i32) -> (i32, i32, i32) {
    %c0_i32 = arith.constant 0 : i32
    %c0_i32_0 = arith.constant 0 : i32
    %c0_i32_1 = arith.constant 0 : i32
    return %arg0, %c0_i32, %c0_i32_0 : i32, i32, i32
  }
  func.func @transform_2(%arg0: i32, %arg1: i32) -> (i32, i32, i32) {
    %c0_i32 = arith.constant 0 : i32
    %c0_i32_0 = arith.constant 0 : i32
    return %arg0, %arg1, %c0_i32 : i32, i32, i32
  }
}

</mosaic_0001>

<bundles_post_ra>
// kernel: tpu_custom_call.1
= control target key start
LH: loop header
LB: loop body
LE: loop exit
PB: predicated region body
PF: predicated region fallthrough
CT: control target
= control target key end

     0   :  { %7 = vsyncpa [#allocation5], 0  ;;  %s5328_s0 = inlined_call_operand.hbm [shape: f32[8,16,16], index: 0, kind: input, shape index: {}]   ;;  %s5329_s1 = inlined_call_operand.hbm [shape: f32[8,16,16], index: 1, kind: input, shape index: {}]   ;;  %s5330_s2 = inlined_call_operand.hbm [shape: f32[8,16,16], index: 2, kind: output, shape index: {}]  }
   0x1   :  { %9 = vsyncpa [#allocation5 + $0x1], 0 }
   0x2   :  { %10 = vsyncpa [#allocation8], 0 }
   0x3   :  { %12 = vsyncpa [#allocation8 + $0x1], 0 }
   0x4   :  { %13 = vsyncpa [#allocation6], 0 }
   0x5   :  { %15 = vsyncpa [#allocation6 + $0x1], 0  ;;  %s3047_s9 = smov 0   ;;  %s3049_s10 = smov 0  }
   0x6   :  { %s3051_s11 = smov 0   ;;  %s3053_s12 = smov 0  }
   0x7   :  { %s3055_s13 = smov 0   ;;  %s3057_s14 = smov 0  }
   0x8 LB: > { %s2732_s15 = sadd.s32 4294967295, %s3017_s14   ;;  %s2733_s16 = sadd.s32 4294967294, %s3017_s14   ;;  %s3017_s14 = sphi %s3057_s14, %s21_s14   ;;  %s3013_s13 = sphi %s3055_s13, %s5580_s13   ;;  %s3009_s12 = sphi %s3053_s12, %s5579_s12   ;;  %s3005_s11 = sphi %s3051_s11, %s5578_s11   ;;  %s3001_s10 = sphi %s3049_s10, %s5577_s10   ;;  %s2997_s9 = sphi %s3047_s9, %s5576_s9  }
   0x9   : > { %s33_s17 = sadd.s32 1, %s3013_s13  ;;  %s40_s18 = sadd.s32 1, %s3005_s11 }
   0xa   : > { %p35_p0 = scmp.ge.s32.totalorder %s33_s17, 2  ;;  %p47_p1 = scmp.ne.s32.totalorder %s3005_s11, %s3001_s10 }
   0xb   : > { %p48_p2 = scmp.eq.s32.totalorder %s3017_s14, 0  ;;  %p53_p3 = scmp.ne.s32.totalorder %s3001_s10, %s2997_s9 }
   0xc   : > { %s5582_s17 = smov (%p35_p0, %s33_s17), 0  ;;  %p54_p5 = scmp.eq.s32.totalorder %s2732_s15, 0 }
   0xd   : > { %p3088_p4 = por %p48_p2, %p47_p1  ;;  %s37_s20 = ssub.s32 %s3013_s13, %s5582_s17 }
   0xe   : > { %p105_p6 = scmp.eq.s32.totalorder %s2732_s15, 1  ;;  %p38_p7 = scmp.eq.s32.totalorder %s37_s20, 0 }
   0xf   : > { %p3094_p8 = por %p54_p5, %p53_p3  ;;  %p111_p10 = scmp.eq.s32.totalorder %s2733_s16, 1 }
  0x10   : > { %p3098_p9 = por %p105_p6, %p47_p1  ;;  %p2735_p12 = scmp.ge.s32.totalorder %s3017_s14, 2 }
  0x11   : > { %s3103_s23 = scalar_select %p38_p7, %s3005_s11, %s40_s18  }
  0x12   : > { %p3105_p11 = por %p111_p10, %p53_p3  ;;  %p2777_p13 = scmp.lt.s32.totalorder %s3017_s14, 2 }
  0x13   : > { %s3112_s25 = sand.u32 1, %s3005_s11   ;;  %s2755_s27 = sshll.u32 %s3013_s13, 10 }
  0x14   : > { %s2736_s26 = sshll.u32 %s3112_s25, 6  ;;  %s142_s30 = scalar_lea.hbm %s5328_s0, %s2755_s27 }
  0x15   : > { %s135_s3 = scalar_lea.vmem [#allocation4], %s2736_s26  ;;  %p3125_p0 = pnand %p2777_p13, %p3088_p4 }
  0x16   : > { %s143_s4 = sshll.u32 %s135_s3, 4  ;;  %p2744_p1 = scmp.ge.s32.totalorder %s3017_s14, 1  ;;  %s144_s4 = int_to_ptr.vmem [resolvable:$true] %s143_s4 }
  0x17   : > { %s132_s6 = scalar_lea.sflag [#allocation5], %s3112_s25  ;;  %p2879_p2 = pneg %p3125_p0 }
  0x18   : > { %s2890_s7 = scalar_lea.vmem %s144_s4, 1024  ;;  %s3019_s8 = smov [#allocation4]  }
  0x19   : > { %p2891_p3 = scmp.ne.s32.totalorder %s144_s4, %s2890_s7  ;;  %s2895_s15 = sshll.u32 %s3019_s8, 4  ;;  %s2896_s15 = int_to_ptr.vmem [resolvable:$false] %s2895_s15 }
  0x1a   : > { %s2897_s16 = scalar_lea.vmem %s2896_s15, 2048  ;;  %p2898_p4 = scmp.lt.s32.totalorder %s144_s4, %s2896_s15 }
  0x1b   : > { %p2893_p5 = pnand %p2891_p3, %p2879_p2  ;;  %p2899_p7 = scmp.lt.s32.totalorder %s2897_s16, %s2890_s7 }
  0x1d   : > { %p2894_p6 = pneg %p2893_p5  ;;  %p2900_p10 = por %p2899_p7, %p2898_p4 }
  0x1f   : > { %p2901_p13 = pnand %p2900_p10, %p2894_p6 }
  0x21   : > { %2904 = shalt.err (!%p2901_p13)
}
  0x22   : > { %s3020_s18 = smov 128   ;;  %s3021_s19 = smov 8  }
  0x23   : > { %2769 = dma.hbm_to_vmem [thread:$0]  (!%p3125_p0), %s142_s30, 1024, %s144_s4, %s132_s6, %s3020_s18, %s3020_s18, %s3021_s19  }
  0x24   : > { %p173_p3 = scmp.lt.s32.totalorder %s3017_s14, 3  ;;  %s164_s29 = scalar_lea.hbm %s5329_s1, %s2755_s27 }
  0x25   : > { %s157_s7 = scalar_lea.vmem [#allocation7], %s2736_s26  ;;  %s154_s15 = scalar_lea.sflag [#allocation8], %s3112_s25 }
  0x26   : > { %p3146_p5 = pnand %p2744_p1, %p173_p3  ;;  %s165_s8 = sshll.u32 %s157_s7, 4  ;;  %s166_s8 = int_to_ptr.vmem [resolvable:$true] %s165_s8 }
  0x27   : > { %s2918_s16 = scalar_lea.vmem %s166_s8, 1024  ;;  %s3022_s30 = smov [#allocation7]  }
  0x28   : > { %p2919_p6 = scmp.ne.s32.totalorder %s166_s8, %s2918_s16  ;;  %s2923_s4 = sshll.u32 %s3022_s30, 4  ;;  %s2924_s4 = int_to_ptr.vmem [resolvable:$false] %s2923_s4 }
  0x29   : > { %s2925_s27 = scalar_lea.vmem %s2924_s4, 2048  ;;  %p2926_p10 = scmp.lt.s32.totalorder %s166_s8, %s2924_s4 }
  0x2a   : > { %p2921_p4 = pnand %p2919_p6, %p2879_p2  ;;  %p2927_p1 = scmp.lt.s32.totalorder %s2925_s27, %s2918_s16 }
  0x2c   : > { %p2922_p7 = pneg %p2921_p4  ;;  %p2928_p13 = por %p2927_p1, %p2926_p10 }
  0x2e   : > { %p2929_p3 = pnand %p2928_p13, %p2922_p7 }
  0x30   : > { %2932 = shalt.err (!%p2929_p3)
}
  0x31   : > { %2772 = dma.hbm_to_vmem [thread:$0]  (!%p3125_p0), %s164_s29, 1024, %s166_s8, %s154_s15, %s3020_s18, %s3020_s18, %s3021_s19  }
  0x32   : > { %177 = sbr.rel (%p3146_p5) target bundleno = 689 (0x2b1), region = 28 }
  0x37   : > { %s3161_s25 = sand.u32 1, %s3001_s10  }
  0x38   : > { %s3164_s26 = sshll.u32 %s3161_s25, 6  ;;  %s180_s6 = scalar_lea.sflag [#allocation5], %s3161_s25 }
  0x39   : > { %s3168_s20 = scalar_lea.vmem [#allocation4], %s3164_s26 }
  0x3a   : > { %2984 = dma.done.wait (%p3094_p8), %s180_s6, 1024  }
  0x3b   : > { %2986 = vsyncadd (%p3094_p8), %s180_s6, 4294966272  ;;  %s189_s5 = scalar_lea.sflag [#allocation8], %s3161_s25  ;;  %s3176_s18 = scalar_lea.vmem [#allocation7], %s3164_s26 }
  0x3c   : > { %2988 = dma.done.wait (%p3094_p8), %s189_s5, 1024  }
  0x3d   : > { %2990 = vsyncadd (%p3094_p8), %s189_s5, 4294966272  ;;  %vm226_vm0 = vcmask 156672   ;;  %vm235_vm1 = vcmask 15360   ;;  %vm249_vm2 = vcmask 162960   ;;  %v3023_v0 = vmov 0.0   ;;  %v297_v1 = vld [vmem:[%s3168_s20 + $0x10] sm:$0xff] }
  0x3e   : > { %228 = vst.msk [vmem:[#allocation2 + $0x18] sm:$0x3] %vm226_vm0, %v3023_v0  ;;  %227 = vst.msk [vmem:[#allocation2] sm:$0x3] %vm226_vm0, %v3023_v0  ;;  %vm238_vm3 = vcmask 11264   ;;  %vm252_vm4 = vcmask 158864  }
  0x3f   : > { %241 = vst.msk [vmem:[#allocation2 + $0x20] sm:$0xff] %vm235_vm1, %v3023_v0  ;;  %237 = vst.msk [vmem:[#allocation2 + $0x8] sm:$0xff] %vm235_vm1, %v3023_v0  ;;  %v295_v2 = vld [vmem:[%s3168_s20] sm:$0xff]  ;;  %s3024_s21 = smov 2   ;;  %v298_v3 = vld [vmem:[%s3168_s20 + $0x18] sm:$0xff]  ;;  %vm335_vm5 = vcmask 146448  }
  0x40   : > { %229 = vst.msk [vmem:[#allocation2 + $0x30] sm:$0x3] %vm226_vm0, %v3023_v0  ;;  %230 = vst.msk [vmem:[#allocation2 + $0x48] sm:$0x3] %vm226_vm0, %v3023_v0  ;;  %315 = vrot.lane.b32.xlu1 %v297_v1, %s3024_s21  ;;  %311 = vrot.lane.b32.xlu0 %v295_v2, %s3024_s21  ;;  %v296_v4 = vld [vmem:[%s3168_s20 + $0x8] sm:$0xff]  ;;  %v299_v6 = vld [vmem:[%s3168_s20 + $0x20] sm:$0xff] }
  0x41   : > { %231 = vst.msk [vmem:[#allocation2 + $0x12] sm:$0x3] %vm226_vm0, %v3023_v0  ;;  %232 = vst.msk [vmem:[#allocation2 + $0x2a] sm:$0x3] %vm226_vm0, %v3023_v0  ;;  %v300_v5 = vld [vmem:[%s3168_s20 + $0x28] sm:$0xff]  ;;  %v302_v7 = vld [vmem:[%s3168_s20 + $0x38] sm:$0xff] }
  0x42   : > { %233 = vst.msk [vmem:[#allocation2 + $0x42] sm:$0x3] %vm226_vm0, %v3023_v0  ;;  %234 = vst.msk [vmem:[#allocation2 + $0x5a] sm:$0x3] %vm226_vm0, %v3023_v0  ;;  %v301_v8 = vld [vmem:[%s3168_s20 + $0x30] sm:$0xff]  ;;  %v345_v9 = vld [vmem:[%s3176_s18 + $0x8] sm:$0xff] }
  0x43   : > { %244 = vst.msk [vmem:[#allocation2 + $0x38] sm:$0xff] %vm235_vm1, %v3023_v0  ;;  %247 = vst.msk [vmem:[#allocation2 + $0x50] sm:$0xff] %vm235_vm1, %v3023_v0  ;;  %v344_v10 = vld [vmem:[%s3176_s18] sm:$0xff]  ;;  %v347_v11 = vld [vmem:[%s3176_s18 + $0x18] sm:$0xff]  ;;  %vm487_vm6 = vcmask 1046528   ;;  %vm548_vm7 = vcmask 1045504  }
  0x44   : > { %263 = vst.msk [vmem:[#allocation3] sm:$0x3] %vm226_vm0, %v3023_v0  ;;  %264 = vst.msk [vmem:[#allocation3 + $0x18] sm:$0x3] %vm226_vm0, %v3023_v0  ;;  %317 = vrot.lane.b32.xlu1 %v298_v3, %s3024_s21  ;;  %313 = vrot.lane.b32.xlu0 %v296_v4, %s3024_s21  ;;  %v346_v12 = vld [vmem:[%s3176_s18 + $0x10] sm:$0xff]  ;;  %v349_v13 = vld [vmem:[%s3176_s18 + $0x28] sm:$0xff] }
  0x45   : > { %265 = vst.msk [vmem:[#allocation3 + $0x30] sm:$0x3] %vm226_vm0, %v3023_v0  ;;  %266 = vst.msk [vmem:[#allocation3 + $0x48] sm:$0x3] %vm226_vm0, %v3023_v0  ;;  %v348_v14 = vld [vmem:[%s3176_s18 + $0x20] sm:$0xff]  ;;  %v351_v15 = vld [vmem:[%s3176_s18 + $0x38] sm:$0xff] }
  0x46   : > { %267 = vst.msk [vmem:[#allocation3 + $0x12] sm:$0x3] %vm226_vm0, %v3023_v0  ;;  %268 = vst.msk [vmem:[#allocation3 + $0x2a] sm:$0x3] %vm226_vm0, %v3023_v0  ;;  %v350_v16 = vld [vmem:[%s3176_s18 + $0x30] sm:$0xff]  ;;  %vm585_vm8 = vcmask 1044480  }
  0x47   : > { %269 = vst.msk [vmem:[#allocation3 + $0x42] sm:$0x3] %vm226_vm0, %v3023_v0  ;;  %270 = vst.msk [vmem:[#allocation3 + $0x5a] sm:$0x3] %vm226_vm0, %v3023_v0  ;;  %vm638_vm9 = vcmask 1043456   ;;  %s3025_s19 = smov 127  }
  0x48   : > { %272 = vst.msk [vmem:[#allocation3 + $0x8] sm:$0xff] %vm235_vm1, %v3023_v0  ;;  %275 = vst.msk [vmem:[#allocation3 + $0x20] sm:$0xff] %vm235_vm1, %v3023_v0  ;;  %321 = vrot.lane.b32.xlu1 %v300_v5, %s3024_s21  ;;  %319 = vrot.lane.b32.xlu0 %v299_v6, %s3024_s21  ;;  %s3026_s28 = smov 126   ;;  %s3027_s29 = smov 125   ;;  %vm2595_vm10 = vcmask 130048  }
  0x49   : > { %278 = vst.msk [vmem:[#allocation3 + $0x38] sm:$0xff] %vm235_vm1, %v3023_v0  ;;  %281 = vst.msk [vmem:[#allocation3 + $0x50] sm:$0xff] %vm235_vm1, %v3023_v0  ;;  %s3028_s3 = smov 124   ;;  %s5252_s7 = scalar_lea.vmem [#allocation9], %s3164_s26 }
  0x4a   : > { %240 = vst.msk [vmem:[#allocation2 + $0x18] sm:$0xff] %vm235_vm1, %v3023_v0  ;;  %236 = vst.msk [vmem:[#allocation2] sm:$0xff] %vm235_vm1, %v3023_v0  ;;  %s2759_s8 = sshll.u32 %s3009_s12, 10  ;;  %s2621_s15 = sshll.u32 %s5252_s7, 4  ;;  %s5278_s15 = int_to_ptr.vmem [resolvable:$true] %s2621_s15 }
  0x4b   : > { %255 = vst.msk [vmem:[#allocation2 + $0x20] sm:$0xff] %vm249_vm2, %v3023_v0  ;;  %251 = vst.msk [vmem:[#allocation2 + $0x8] sm:$0xff] %vm249_vm2, %v3023_v0  ;;  %s5276_s4 = scalar_lea.hbm %s5330_s2, %s2759_s8  ;;  %s2605_s12 = scalar_lea.sflag [#allocation6], %s3161_s25 }
  0x4c   : > { %243 = vst.msk [vmem:[#allocation2 + $0x30] sm:$0xff] %vm235_vm1, %v3023_v0  ;;  %246 = vst.msk [vmem:[#allocation2 + $0x48] sm:$0xff] %vm235_vm1, %v3023_v0  ;;  %325 = vrot.lane.b32.xlu1 %v302_v7, %s3024_s21  ;;  %323 = vrot.lane.b32.xlu0 %v301_v8, %s3024_s21  ;;  %s2933_s27 = scalar_lea.vmem %s5278_s15, 1024  ;;  %s3029_s26 = smov [#allocation9]  }
  0x4d   : > { %258 = vst.msk [vmem:[#allocation2 + $0x38] sm:$0xff] %vm249_vm2, %v3023_v0  ;;  %261 = vst.msk [vmem:[#allocation2 + $0x50] sm:$0xff] %vm249_vm2, %v3023_v0  ;;  %p2934_p8 = scmp.ne.s32.totalorder %s5278_s15, %s2933_s27  ;;  %s2937_s6 = sshll.u32 %s3029_s26, 4  ;;  %s2938_s6 = int_to_ptr.vmem [resolvable:$false] %s2937_s6 }
  0x4e   : > { %271 = vst.msk [vmem:[#allocation3] sm:$0xff] %vm235_vm1, %v3023_v0  ;;  %274 = vst.msk [vmem:[#allocation3 + $0x18] sm:$0xff] %vm235_vm1, %v3023_v0  ;;  %s2939_s20 = scalar_lea.vmem %s2938_s6, 2048  ;;  %p2940_p5 = scmp.lt.s32.totalorder %s5278_s15, %s2938_s6 }
  0x4f   : > { %277 = vst.msk [vmem:[#allocation3 + $0x30] sm:$0xff] %vm235_vm1, %v3023_v0  ;;  %280 = vst.msk [vmem:[#allocation3 + $0x48] sm:$0xff] %vm235_vm1, %v3023_v0  ;;  %p2935_p0 = pnand %p2934_p8, %p3098_p9  ;;  %p2941_p6 = scmp.lt.s32.totalorder %s2939_s20, %s2933_s27 }
  0x50   : > { %284 = vst.msk [vmem:[#allocation3 + $0x8] sm:$0xff] %vm249_vm2, %v3023_v0  ;;  %287 = vst.msk [vmem:[#allocation3 + $0x20] sm:$0xff] %vm249_vm2, %v3023_v0  ;;  %362 = vrot.lane.b32.xlu1 %v345_v9, %s3024_s21  ;;  %360 = vrot.lane.b32.xlu0 %v344_v10, %s3024_s21 }
  0x51   : > { %290 = vst.msk [vmem:[#allocation3 + $0x38] sm:$0xff] %vm249_vm2, %v3023_v0  ;;  %293 = vst.msk [vmem:[#allocation3 + $0x50] sm:$0xff] %vm249_vm2, %v3023_v0  ;;  %p2936_p2 = pneg %p2935_p0  ;;  %p2942_p4 = por %p2941_p6, %p2940_p5 }
  0x52   : > { %242 = vst.msk [vmem:[#allocation2 + $0x28] sm:$0xf] %vm238_vm3, %v3023_v0  ;;  %239 = vst.msk [vmem:[#allocation2 + $0x10] sm:$0xf] %vm238_vm3, %v3023_v0 }
  0x53   : > { %245 = vst.msk [vmem:[#allocation2 + $0x40] sm:$0xf] %vm238_vm3, %v3023_v0  ;;  %248 = vst.msk [vmem:[#allocation2 + $0x58] sm:$0xf] %vm238_vm3, %v3023_v0  ;;  %p2943_p7 = pnand %p2942_p4, %p2936_p2 }
  0x54   : > { %273 = vst.msk [vmem:[#allocation3 + $0x10] sm:$0xf] %vm238_vm3, %v3023_v0  ;;  %276 = vst.msk [vmem:[#allocation3 + $0x28] sm:$0xf] %vm238_vm3, %v3023_v0  ;;  %366 = vrot.lane.b32.xlu1 %v347_v11, %s3024_s21  ;;  %364 = vrot.lane.b32.xlu0 %v346_v12, %s3024_s21 }
  0x55   : > { %279 = vst.msk [vmem:[#allocation3 + $0x40] sm:$0xf] %vm238_vm3, %v3023_v0  ;;  %282 = vst.msk [vmem:[#allocation3 + $0x58] sm:$0xf] %vm238_vm3, %v3023_v0 }
  0x56   : > { %254 = vst.msk [vmem:[#allocation2 + $0x18] sm:$0xff] %vm249_vm2, %v3023_v0  ;;  %250 = vst.msk [vmem:[#allocation2] sm:$0xff] %vm249_vm2, %v3023_v0 }
  0x57   : > { %256 = vst.msk [vmem:[#allocation2 + $0x28] sm:$0xf] %vm252_vm4, %v3023_v0  ;;  %253 = vst.msk [vmem:[#allocation2 + $0x10] sm:$0xf] %vm252_vm4, %v3023_v0 }
  0x58   : > { %257 = vst.msk [vmem:[#allocation2 + $0x30] sm:$0xff] %vm249_vm2, %v3023_v0  ;;  %260 = vst.msk [vmem:[#allocation2 + $0x48] sm:$0xff] %vm249_vm2, %v3023_v0  ;;  %370 = vrot.lane.b32.xlu1 %v349_v13, %s3024_s21  ;;  %368 = vrot.lane.b32.xlu0 %v348_v14, %s3024_s21 }
  0x59   : > { %283 = vst.msk [vmem:[#allocation3] sm:$0xff] %vm249_vm2, %v3023_v0  ;;  %286 = vst.msk [vmem:[#allocation3 + $0x18] sm:$0xff] %vm249_vm2, %v3023_v0 }
  0x5a   : > { %289 = vst.msk [vmem:[#allocation3 + $0x30] sm:$0xff] %vm249_vm2, %v3023_v0  ;;  %292 = vst.msk [vmem:[#allocation3 + $0x48] sm:$0xff] %vm249_vm2, %v3023_v0 }
  0x5b   : > { %259 = vst.msk [vmem:[#allocation2 + $0x40] sm:$0xf] %vm252_vm4, %v3023_v0  ;;  %262 = vst.msk [vmem:[#allocation2 + $0x58] sm:$0xf] %vm252_vm4, %v3023_v0 }
  0x5c   : > { %285 = vst.msk [vmem:[#allocation3 + $0x10] sm:$0xf] %vm252_vm4, %v3023_v0  ;;  %288 = vst.msk [vmem:[#allocation3 + $0x28] sm:$0xf] %vm252_vm4, %v3023_v0  ;;  %374 = vrot.lane.b32.xlu1 %v351_v15, %s3024_s21  ;;  %372 = vrot.lane.b32.xlu0 %v350_v16, %s3024_s21 }
  0x5d   : > { %291 = vst.msk [vmem:[#allocation3 + $0x40] sm:$0xf] %vm252_vm4, %v3023_v0  ;;  %294 = vst.msk [vmem:[#allocation3 + $0x58] sm:$0xf] %vm252_vm4, %v3023_v0 }
  0xb2   : > { %v316_v17 = vpop.permute.xlu1 %315  ;;  %v312_v18 = vpop.permute.xlu0 %311 }
  0xb3   : > { %338 = vst.msk [vmem:[#allocation2 + $0x1a] sm:$0xff] %vm335_vm5, %v316_v17  ;;  %336 = vst.msk [vmem:[#allocation2 + $0x2] sm:$0xff] %vm335_vm5, %v312_v18 }
  0xb6   : > { %v318_v19 = vpop.permute.xlu1 %317  ;;  %v314_v20 = vpop.permute.xlu0 %313 }
  0xb7   : > { %339 = vst.msk [vmem:[#allocation2 + $0x22] sm:$0xff] %vm335_vm5, %v318_v19  ;;  %337 = vst.msk [vmem:[#allocation2 + $0xa] sm:$0xff] %vm335_vm5, %v314_v20 }
  0xba   : > { %v322_v21 = vpop.permute.xlu1 %321  ;;  %v320_v22 = vpop.permute.xlu0 %319  ;;  %v3330_v23 = vld [vmem:[#allocation2] sm:$0xff]  ;;  %v3332_v24 = vld [vmem:[#allocation2 + $0x18] sm:$0xff] }
  0xbb   : > { %341 = vst.msk [vmem:[#allocation2 + $0x3a] sm:$0xff] %vm335_vm5, %v322_v21  ;;  %340 = vst.msk [vmem:[#allocation2 + $0x32] sm:$0xff] %vm335_vm5, %v320_v22  ;;  %v455_v25 = vmul.f32 0.120078385, %v3330_v23  ;;  %v463_v26 = vmul.f32 0.23388076, %v3330_v23 }
  0xbc   : > { %v524_v27 = vmul.f32 0.2920817, %v3330_v23  ;;  %v3340_v28 = vmul.f32 0.23388076, %v3332_v24  ;;  %v3343_v29 = vmul.f32 0.2920817, %v3332_v24 }
  0xbd   : > { %v488_v30 = vrot.slane %v463_v26, 1  ;;  %v586_v32 = vrot.slane %v463_v26, 3  ;;  %v3346_v33 = vmul.f32 0.120078385, %v3332_v24  ;;  %v639_v38 = vrot.slane %v455_v25, 4 }
  0xbe   : > { %v549_v31 = vrot.slane %v524_v27, 2  ;;  %v326_v34 = vpop.permute.xlu1 %325  ;;  %v324_v35 = vpop.permute.xlu0 %323  ;;  %v3348_v36 = vld [vmem:[#allocation2 + $0x8] sm:$0xff]  ;;  %v3350_v37 = vld [vmem:[#allocation2 + $0x10] sm:$0xf]  ;;  %v493_v39 = vrot.slane %v3340_v28, 1  ;;  %v554_v40 = vrot.slane %v3343_v29, 2 }
  0xbf   : > { %343 = vst.msk [vmem:[#allocation2 + $0x52] sm:$0xff] %vm335_vm5, %v326_v34  ;;  %342 = vst.msk [vmem:[#allocation2 + $0x4a] sm:$0xff] %vm335_vm5, %v324_v35  ;;  %v456_v41 = vmul.f32 0.120078385, %v3348_v36  ;;  %v464_v42 = vmul.f32 0.23388076, %v3348_v36 }
  0xc0   : > { %v465_v43 = vmul.f32 0.23388076, %v3350_v37  ;;  %v525_v44 = vmul.f32 0.2920817, %v3348_v36  ;;  %v526_v45 = vmul.f32 0.2920817, %v3350_v37 }
  0xc1   : > { %v622_v46 = vmul.f32 0.120078385, %v3350_v37  ;;  %v489_v47 = vrot.slane %v464_v42, 1  ;;  %v587_v49 = vrot.slane %v464_v42, 3  ;;  %v640_v55 = vrot.slane %v456_v41, 4  ;;  %v3362_v57 = vld [vmem:[#allocation2 + $0x20] sm:$0xff] }
  0xc2   : > { %v491_v48 = vrot.slane %v465_v43, 1  ;;  %v589_v50 = vrot.slane %v465_v43, 3  ;;  %v363_v51 = vpop.permute.xlu1 %362  ;;  %v361_v52 = vpop.permute.xlu0 %360  ;;  %v550_v53 = vrot.slane %v525_v44, 2  ;;  %v552_v54 = vrot.slane %v526_v45, 2  ;;  %v3370_v62 = vld [vmem:[#allocation2 + $0x28] sm:$0xf] }
  0xc3   : > { %v642_v56 = vrot.slane %v622_v46, 4  ;;  %385 = vst.msk [vmem:[#allocation3 + $0xa] sm:$0xff] %vm335_vm5, %v363_v51  ;;  %384 = vst.msk [vmem:[#allocation3 + $0x2] sm:$0xff] %vm335_vm5, %v361_v52  ;;  %v490_v60 = vsel %vm487_vm6, %v488_v30, %v489_v47  ;;  %v588_v61 = vsel %vm585_vm8, %v586_v32, %v587_v49  ;;  %v641_v4 = vsel %vm638_vm9, %v639_v38, %v640_v55  ;;  %v3395_v44 = vld [vmem:[#allocation2 + $0x38] sm:$0xff]  ;;  %v3397_v45 = vld [vmem:[#allocation2 + $0x40] sm:$0xf] }
  0xc4   : > { %v492_v58 = vsel %vm487_vm6, %v489_v47, %v491_v48  ;;  %v590_v59 = vsel %vm585_vm8, %v587_v49, %v589_v50  ;;  %v553_v0 = vsel %vm548_vm7, %v550_v53, %v552_v54  ;;  %v516_v2 = vadd.f32 %v490_v60, %v455_v25 }
  0xc5   : > { %v517_v63 = vadd.f32 %v492_v58, %v456_v41  ;;  %v643_v1 = vsel %vm638_vm9, %v640_v55, %v642_v56  ;;  %v551_v3 = vsel %vm548_vm7, %v549_v31, %v550_v53  ;;  %v458_v5 = vmul.f32 0.120078385, %v3362_v57 }
  0xc6   : > { %v467_v6 = vmul.f32 0.23388076, %v3362_v57  ;;  %v367_v7 = vpop.permute.xlu1 %366  ;;  %v365_v8 = vpop.permute.xlu0 %364  ;;  %v577_v10 = vadd.f32 %v551_v3, %v516_v2  ;;  %v468_v11 = vmul.f32 0.23388076, %v3370_v62  ;;  %v528_v12 = vmul.f32 0.2920817, %v3362_v57 }
  0xc7   : > { %v578_v9 = vadd.f32 %v553_v0, %v517_v63  ;;  %387 = vst.msk [vmem:[#allocation3 + $0x22] sm:$0xff] %vm335_vm5, %v367_v7  ;;  %386 = vst.msk [vmem:[#allocation3 + $0x1a] sm:$0xff] %vm335_vm5, %v365_v8  ;;  %v529_v14 = vmul.f32 0.2920817, %v3370_v62  ;;  %v623_v16 = vmul.f32 0.120078385, %v3370_v62 }
  0xc8   : > { %v494_v13 = vrot.slane %v467_v6, 1  ;;  %v592_v15 = vrot.slane %v467_v6, 3  ;;  %v614_v18 = vadd.f32 %v588_v61, %v577_v10  ;;  %v496_v19 = vrot.slane %v468_v11, 1 }
  0xc9   : > { %v615_v17 = vadd.f32 %v590_v59, %v578_v9  ;;  %v555_v20 = vrot.slane %v528_v12, 2  ;;  %v557_v21 = vrot.slane %v529_v14, 2  ;;  %v594_v22 = vrot.slane %v468_v11, 3  ;;  %v3433_v9 = vld [vmem:[#allocation2 + $0x30] sm:$0xff]  ;;  %v3442_v14 = vld [vmem:[#allocation2 + $0x58] sm:$0xf] }
  0xca   : > { %v645_v25 = vrot.slane %v458_v5, 4  ;;  %v647_v26 = vrot.slane %v623_v16, 4  ;;  %v371_v27 = vpop.permute.xlu1 %370  ;;  %v369_v30 = vpop.permute.xlu0 %368  ;;  %v3386_v32 = vadd.f32 %v641_v4, %v614_v18  ;;  %v497_v34 = vsel %vm487_vm6, %v494_v13, %v496_v19 }
  0xcb   : > { %v3384_v31 = vadd.f32 %v643_v1, %v615_v17  ;;  %v495_v35 = vsel %vm487_vm6, %v493_v39, %v494_v13  ;;  %389 = vst.msk [vmem:[#allocation3 + $0x3a] sm:$0xff] %vm335_vm5, %v371_v27  ;;  %388 = vst.msk [vmem:[#allocation3 + $0x32] sm:$0xff] %vm335_vm5, %v369_v30  ;;  %v519_v38 = vadd.f32 %v497_v34, %v458_v5  ;;  %v591_v50 = vrot.slane %v3340_v28, 3  ;;  %v3440_v13 = vld [vmem:[#allocation2 + $0x50] sm:$0xff] }
  0xcc   : > { %v558_v41 = vsel %vm548_vm7, %v555_v20, %v557_v21  ;;  %v595_v42 = vsel %vm585_vm8, %v592_v15, %v594_v22  ;;  %v648_v43 = vsel %vm638_vm9, %v645_v25, %v647_v26  ;;  %v3403_v39 = vmul.f32 0.23388076, %v3386_v32 }
  0xcd   : > { %v3400_v46 = vmul.f32 0.23388076, %v3384_v31  ;;  %v518_v47 = vadd.f32 %v495_v35, %v3346_v33  ;;  %v556_v48 = vsel %vm548_vm7, %v554_v40, %v555_v20  ;;  %v580_v49 = vadd.f32 %v558_v41, %v519_v38 }
  0xce   : > { %v644_v51 = vrot.slane %v3346_v33, 4  ;;  %v3412_v52 = vmul.f32 0.120078385, %v3395_v44  ;;  %v375_v53 = vpop.permute.xlu1 %374  ;;  %v373_v54 = vpop.permute.xlu0 %372  ;;  %1563 = vrot.lane.b32.xlu0 %v3403_v39, %s3025_s19  ;;  %v470_v40 = vmul.f32 0.23388076, %v3395_v44  ;;  %v593_v56 = vsel %vm585_vm8, %v591_v50, %v592_v15 }
  0xcf   : > { %1565 = vrot.lane.b32.xlu1 %v3400_v46, %s3025_s19  ;;  %v579_v29 = vadd.f32 %v556_v48, %v518_v47  ;;  %v471_v55 = vmul.f32 0.23388076, %v3397_v45  ;;  %v531_v28 = vmul.f32 0.2920817, %v3395_v44  ;;  %391 = vst.msk [vmem:[#allocation3 + $0x52] sm:$0xff] %vm335_vm5, %v375_v53  ;;  %390 = vst.msk [vmem:[#allocation3 + $0x4a] sm:$0xff] %vm335_vm5, %v373_v54  ;;  %v617_v33 = vadd.f32 %v595_v42, %v580_v49 }
  0xd0   : > { %v646_v58 = vsel %vm638_vm9, %v644_v51, %v645_v25  ;;  %v532_v59 = vmul.f32 0.2920817, %v3397_v45  ;;  %v499_v61 = vrot.slane %v470_v40, 1  ;;  %v597_v3 = vrot.slane %v470_v40, 3  ;;  %v3467_v40 = vld [vmem:[#allocation2 + $0x48] sm:$0xff] }
  0xd1   : > { %v616_v60 = vadd.f32 %v593_v56, %v579_v29  ;;  %v501_v63 = vrot.slane %v471_v55, 1  ;;  %v560_v0 = vrot.slane %v531_v28, 2  ;;  %v3426_v1 = vadd.f32 %v648_v43, %v617_v33 }
  0xd2   : > { %v562_v2 = vrot.slane %v532_v59, 2  ;;  %v599_v4 = vrot.slane %v471_v55, 3  ;;  %v624_v7 = vmul.f32 0.120078385, %v3397_v45  ;;  %v650_v8 = vrot.slane %v3412_v52, 4 }
  0xd3   : > { %v3428_v5 = vadd.f32 %v646_v58, %v616_v60  ;;  %v502_v6 = vsel %vm487_vm6, %v499_v61, %v501_v63  ;;  %v3436_v10 = vmul.f32 0.23388076, %v3426_v1  ;;  %v459_v18 = vmul.f32 0.120078385, %v3433_v9 }
  0xd4   : > { %v521_v11 = vadd.f32 %v502_v6, %v3412_v52  ;;  %v563_v12 = vsel %vm548_vm7, %v560_v0, %v562_v2  ;;  %v600_v16 = vsel %vm585_vm8, %v597_v3, %v599_v4  ;;  %v652_v17 = vrot.slane %v624_v7, 4 }
  0xd5   : > { %v3445_v15 = vmul.f32 0.23388076, %v3428_v5  ;;  %1569 = vrot.lane.b32.xlu1 %v3436_v10, %s3025_s19  ;;  %v469_v20 = vmul.f32 0.23388076, %v3433_v9  ;;  %v530_v21 = vmul.f32 0.2920817, %v3433_v9 }
  0xd6   : > { %v582_v19 = vadd.f32 %v563_v12, %v521_v11  ;;  %v653_v22 = vsel %vm638_vm9, %v650_v8, %v652_v17  ;;  %v462_v25 = vmul.f32 0.120078385, %v3440_v13  ;;  %v473_v26 = vmul.f32 0.23388076, %v3440_v13 }
  0xd7   : > { %1567 = vrot.lane.b32.xlu0 %v3445_v15, %s3025_s19  ;;  %v474_v27 = vmul.f32 0.23388076, %v3442_v14  ;;  %v498_v34 = vrot.slane %v469_v20, 1  ;;  %v559_v35 = vrot.slane %v530_v21, 2  ;;  %v596_v38 = vrot.slane %v469_v20, 3 }
  0xd8   : > { %v619_v30 = vadd.f32 %v600_v16, %v582_v19  ;;  %v649_v41 = vrot.slane %v459_v18, 4  ;;  %v504_v42 = vrot.slane %v473_v26, 1  ;;  %v534_v47 = vmul.f32 0.2920817, %v3440_v13 }
  0xd9   : > { %v506_v43 = vrot.slane %v474_v27, 1  ;;  %v500_v49 = vsel %vm487_vm6, %v498_v34, %v499_v61  ;;  %v561_v50 = vsel %vm548_vm7, %v559_v35, %v560_v0  ;;  %v598_v51 = vsel %vm585_vm8, %v596_v38, %v597_v3 }
  0xda   : > { %v3460_v48 = vadd.f32 %v653_v22, %v619_v30  ;;  %v520_v52 = vadd.f32 %v500_v49, %v459_v18  ;;  %v535_v54 = vmul.f32 0.2920817, %v3442_v14  ;;  %v565_v29 = vrot.slane %v534_v47, 2 }
  0xdb   : > { %v507_v53 = vsel %vm487_vm6, %v504_v42, %v506_v43  ;;  %v602_v33 = vrot.slane %v473_v26, 3  ;;  %v604_v56 = vrot.slane %v474_v27, 3  ;;  %v651_v59 = vsel %vm638_vm9, %v649_v41, %v650_v8 }
  0xdc   : > { %v3470_v55 = vmul.f32 0.23388076, %v3460_v48  ;;  %v523_v28 = vadd.f32 %v507_v53, %v462_v25  ;;  %v581_v58 = vadd.f32 %v561_v50, %v520_v52  ;;  %v567_v60 = vrot.slane %v535_v54, 2  ;;  %v3507_v52 = vld [vmem:[#allocation3 + $0x8] sm:$0xff]  ;;  %v3509_v53 = vld [vmem:[#allocation3 + $0x10] sm:$0xf] }
  0xdd   : > { %v625_v61 = vmul.f32 0.120078385, %v3442_v14  ;;  %v605_v63 = vsel %vm585_vm8, %v602_v33, %v604_v56  ;;  %v655_v0 = vrot.slane %v462_v25, 4  ;;  %v472_v2 = vmul.f32 0.23388076, %v3467_v40 }
  0xde   : > { %1573 = vrot.lane.b32.xlu1 %v3470_v55, %s3025_s19  ;;  %v533_v3 = vmul.f32 0.2920817, %v3467_v40  ;;  %v618_v4 = vadd.f32 %v598_v51, %v581_v58  ;;  %v568_v6 = vsel %vm548_vm7, %v565_v29, %v567_v60  ;;  %v461_v11 = vmul.f32 0.120078385, %v3467_v40  ;;  %v3521_v60 = vld [vmem:[#allocation3] sm:$0xff] }
  0xdf   : > { %v657_v7 = vrot.slane %v625_v61, 4  ;;  %v584_v8 = vadd.f32 %v568_v6, %v523_v28  ;;  %v503_v12 = vrot.slane %v472_v2, 1  ;;  %v601_v17 = vrot.slane %v472_v2, 3  ;;  %5372 = vst [vmem:[#allocation13_spill] sm:$0xff] %v3521_v60  ;;  %v3535_v6 = vld [vmem:[#allocation3 + $0x28] sm:$0xf] }
  0xe0   : > { %v564_v16 = vrot.slane %v533_v3, 2  ;;  %v671_v18 = vadd.f32 %v651_v59, %v618_v4  ;;  %v654_v34 = vrot.slane %v461_v11, 4  ;;  %v1596_v47 = vmul.f32 0.2920817, %v3384_v31  ;;  %v3533_v4 = vld [vmem:[#allocation3 + $0x20] sm:$0xff]  ;;  %5375 = vst [vmem:[#allocation16_spill] sm:$0xff] %v3535_v6 }
  0xe1   : > { %v621_v19 = vadd.f32 %v605_v63, %v584_v8  ;;  %v505_v20 = vsel %vm487_vm6, %v503_v12, %v504_v42  ;;  %v658_v25 = vsel %vm638_vm9, %v655_v0, %v657_v7  ;;  %v603_v30 = vsel %vm585_vm8, %v601_v17, %v602_v33  ;;  %5374 = vst [vmem:[#allocation15_spill] sm:$0xff] %v3533_v4 }
  0xe2   : > { %v566_v21 = vsel %vm548_vm7, %v564_v16, %v565_v29  ;;  %v3483_v22 = vmul.f32 0.23388076, %v671_v18  ;;  %v522_v26 = vadd.f32 %v505_v20, %v461_v11  ;;  %v656_v42 = vsel %vm638_vm9, %v654_v34, %v655_v0 }
  0xe3   : > { %v3486_v27 = vadd.f32 %v658_v25, %v621_v19  ;;  %v1598_v50 = vmul.f32 0.2920817, %v3426_v1  ;;  %v1595_v51 = vmul.f32 0.2920817, %v3386_v32  ;;  %v1600_v54 = vmul.f32 0.2920817, %v3460_v48 }
  0xe4   : > { %1571 = vrot.lane.b32.xlu0 %v3483_v22, %s3025_s19  ;;  %v583_v35 = vadd.f32 %v566_v21, %v522_v26  ;;  %v3513_v29 = vmul.f32 0.23388076, %v3507_v52  ;;  %v685_v28 = vmul.f32 0.23388076, %v3509_v53  ;;  %v1597_v33 = vmul.f32 0.2920817, %v3428_v5 }
  0xe5   : > { %v3492_v38 = vmul.f32 0.23388076, %v3486_v27  ;;  %v1602_v56 = vmul.f32 0.2920817, %v3486_v27  ;;  %v1599_v61 = vmul.f32 0.2920817, %v671_v18 }
  0xe6   : > { %v620_v41 = vadd.f32 %v603_v30, %v583_v35  ;;  %v708_v58 = vrot.slane %v3513_v29, 1  ;;  %v710_v59 = vrot.slane %v685_v28, 1  ;;  %v744_v63 = vmul.f32 0.2920817, %v3507_v52 }
  0xe7   : > { %1577 = vrot.lane.b32.xlu1 %v3492_v38, %s3025_s19  ;;  %v745_v0 = vmul.f32 0.2920817, %v3509_v53  ;;  %v3527_v2 = vmul.f32 0.23388076, %v3521_v60  ;;  %v3531_v3 = vmul.f32 0.120078385, %v3384_v31 }
  0xe8   : > { %v673_v43 = vadd.f32 %v656_v42, %v620_v41  ;;  %v3538_v11 = vmul.f32 0.120078385, %v3386_v32  ;;  %v676_v8 = vmul.f32 0.120078385, %v3507_v52  ;;  %v711_v12 = vsel %vm487_vm6, %v708_v58, %v710_v59 }
  0xe9   : > { %5373 = vst [vmem:[#allocation14_spill] sm:$0xff] %v3531_v3  ;;  %v768_v16 = vrot.slane %v744_v63, 2  ;;  %v770_v17 = vrot.slane %v745_v0, 2  ;;  %v743_v19 = vmul.f32 0.2920817, %v3521_v60  ;;  %v707_v32 = vrot.slane %v3527_v2, 1 }
  0xea   : > { %v3498_v49 = vmul.f32 0.23388076, %v673_v43  ;;  %v1601_v7 = vmul.f32 0.2920817, %v673_v43  ;;  %5376 = vst [vmem:[#allocation17_spill] sm:$0xff] %v3538_v11  ;;  %v736_v34 = vadd.f32 %v711_v12, %v676_v8 }
  0xeb   : > { %1613 = vrot.lane.b32.xlu1 %v1596_v47, %s3026_s28  ;;  %v3544_v20 = vmul.f32 0.23388076, %v3533_v4  ;;  %v3549_v31 = vmul.f32 0.120078385, %v3426_v1  ;;  %v3553_v21 = vmul.f32 0.23388076, %v3535_v6  ;;  %v771_v41 = vsel %vm548_vm7, %v768_v16, %v770_v17 }
  0xec   : > { %1575 = vrot.lane.b32.xlu0 %v3498_v49, %s3025_s19  ;;  %v3557_v25 = vmul.f32 0.120078385, %v3428_v5  ;;  %v3560_v26 = vmul.f32 0.120078385, %v3460_v48  ;;  %v3562_v30 = vmul.f32 0.120078385, %v671_v18  ;;  %v709_v5 = vsel %vm487_vm6, %v707_v32, %v708_v58 }
  0xed   : > { %5377 = vst [vmem:[#allocation18_spill] sm:$0xff] %v3549_v31  ;;  %v806_v1 = vrot.slane %v685_v28, 3  ;;  %v839_v35 = vmul.f32 0.120078385, %v3509_v53  ;;  %v675_v42 = vmul.f32 0.120078385, %v3521_v60 }
  0xee   : > { %5378 = vst [vmem:[#allocation19_spill] sm:$0xff] %v3557_v25  ;;  %5379 = vst [vmem:[#allocation20_spill] sm:$0xff] %v3560_v26  ;;  %v767_v47 = vrot.slane %v743_v19, 2  ;;  %v715_v48 = vrot.slane %v3553_v21, 1  ;;  %v3574_v18 = vmul.f32 0.2920817, %v3533_v4 }
  0xef   : > { %1617 = vrot.lane.b32.xlu1 %v1598_v50, %s3026_s28  ;;  %5380 = vst [vmem:[#allocation21_spill] sm:$0xff] %v3562_v30  ;;  %v713_v50 = vrot.slane %v3544_v20, 1  ;;  %v856_v28 = vrot.slane %v676_v8, 4  ;;  %v855_v58 = vrot.slane %v675_v42, 4  ;;  %v3588_v0 = vmul.f32 0.120078385, %v3533_v4 }
  0xf0   : > { %1611 = vrot.lane.b32.xlu0 %v1595_v51, %s3026_s28  ;;  %v748_v51 = vmul.f32 0.2920817, %v3535_v6  ;;  %v769_v63 = vsel %vm548_vm7, %v767_v47, %v768_v16  ;;  %v840_v8 = vmul.f32 0.120078385, %v3535_v6  ;;  %v3601_v12 = vld [vmem:[#allocation3 + $0x40] sm:$0xf] }
  0xf1   : > { %v3622_v47 = vld [vmem:[#allocation3 + $0x30] sm:$0xff]  ;;  %v841_v60 = vmul.f32 0.120078385, %v3601_v12 }
  0xf3   : > { %1621 = vrot.lane.b32.xlu1 %v1600_v54, %s3026_s28  ;;  %v3580_v54 = vmul.f32 0.120078385, %v3486_v27  ;;  %v3592_v27 = vld [vmem:[#allocation3 + $0x38] sm:$0xff] }
  0xf4   : > { %1615 = vrot.lane.b32.xlu0 %v1597_v33, %s3026_s28  ;;  %v796_v33 = vadd.f32 %v771_v41, %v736_v34  ;;  %5384 = vst [vmem:[#allocation25_spill] sm:$0xff] %v3592_v27  ;;  %v3609_v17 = vmul.f32 0.23388076, %v3592_v27  ;;  %v5331_v41 = vrot.slane %v3544_v20, 3 }
  0xf5   : > { %5381 = vst [vmem:[#allocation22_spill] sm:$0xff] %v3580_v54 }
  0xf6   : > { %v814_v6 = vrot.slane %v3609_v17, 3 }
  0xf7   : > { %1625 = vrot.lane.b32.xlu1 %v1602_v56, %s3026_s28  ;;  %v803_v56 = vrot.slane %v3527_v2, 3  ;;  %v773_v2 = vrot.slane %v3574_v18, 2 }
  0xf8   : > { %1619 = vrot.lane.b32.xlu0 %v1599_v61, %s3026_s28  ;;  %v735_v61 = vadd.f32 %v709_v5, %v675_v42  ;;  %v811_v42 = vrot.slane %v3553_v21, 3  ;;  %v5333_v5 = vrot.slane %v3588_v0, 4 }
  0xfb   : > { %1645 = vrot.lane.b32.xlu1 %v3400_v46, %s3027_s29  ;;  %v804_v46 = vrot.slane %v3513_v29, 3  ;;  %v3582_v29 = vmul.f32 0.120078385, %v673_v43  ;;  %v716_v43 = vsel %vm487_vm6, %v713_v50, %v715_v48  ;;  %v863_v48 = vrot.slane %v840_v8, 4 }
  0xfc   : > { %1623 = vrot.lane.b32.xlu0 %v1601_v7, %s3026_s28  ;;  %v775_v7 = vrot.slane %v748_v51, 2 }
  0xfd   : > { %5382 = vst [vmem:[#allocation23_spill] sm:$0xff] %v3582_v29  ;;  %v807_v59 = vsel %vm585_vm8, %v804_v46, %v806_v1  ;;  %v805_v34 = vsel %vm585_vm8, %v803_v56, %v804_v46  ;;  %v3617_v1 = vsel %vm638_vm9, %v855_v58, %v856_v28  ;;  %v750_v58 = vmul.f32 0.2920817, %v3592_v27 }
  0xfe   : > { %v832_v19 = vadd.f32 %v807_v59, %v796_v33  ;;  %v776_v51 = vsel %vm548_vm7, %v773_v2, %v775_v7  ;;  %v751_v59 = vmul.f32 0.2920817, %v3601_v12 }
  0xff   : > { %1649 = vrot.lane.b32.xlu1 %v3436_v10, %s3027_s29  ;;  %v858_v10 = vrot.slane %v839_v35, 4  ;;  %v795_v35 = vadd.f32 %v769_v63, %v735_v61  ;;  %v812_v63 = vsel %vm585_vm8, %v5331_v41, %v811_v42  ;;  %v3672_v41 = vmul.f32 0.120078385, %v3592_v27 }
 0x100   : > { %1643 = vrot.lane.b32.xlu0 %v3403_v39, %s3027_s29  ;;  %v3590_v39 = vld [vmem:[#allocation3 + $0x18] sm:$0xff] }
 0x101   : > { %5383 = vst [vmem:[#allocation24_spill] sm:$0xff] %v3590_v39  ;;  %v3606_v16 = vmul.f32 0.23388076, %v3590_v39  ;;  %v859_v32 = vsel %vm638_vm9, %v856_v28, %v858_v10  ;;  %v3628_v46 = vmul.f32 0.120078385, %v3590_v39  ;;  %v718_v28 = vrot.slane %v3609_v17, 1 }
 0x102   : > { %v746_v18 = vmul.f32 0.2920817, %v3590_v39  ;;  %v3639_v10 = vld [vmem:[#allocation3 + $0x58] sm:$0xf]  ;;  %v3641_v56 = vadd.f32 %v859_v32, %v832_v19  ;;  %v3648_v61 = vadd.f32 %v805_v34, %v795_v35  ;;  %v864_v19 = vsel %vm638_vm9, %v5333_v5, %v863_v48  ;;  %v3677_v5 = vld [vmem:[#allocation3 + $0x48] sm:$0xff] }
 0x103   : > { %1653 = vrot.lane.b32.xlu1 %v3470_v55, %s3027_s29  ;;  %v3612_v55 = vmul.f32 0.23388076, %v3601_v12  ;;  %v712_v21 = vrot.slane %v3606_v16, 1  ;;  %v3657_v7 = vmul.f32 0.23388076, %v3639_v10  ;;  %v860_v34 = vrot.slane %v3628_v46, 4 }
 0x104   : > { %1647 = vrot.lane.b32.xlu0 %v3445_v15, %s3027_s29  ;;  %v738_v15 = vadd.f32 %v716_v43, %v3588_v0  ;;  %v772_v32 = vrot.slane %v746_v18, 2  ;;  %v808_v42 = vrot.slane %v3606_v16, 3  ;;  %v749_v18 = vmul.f32 0.2920817, %v3622_v47 }
 0x105   : > { %v720_v33 = vrot.slane %v3612_v55, 1  ;;  %v714_v35 = vsel %vm487_vm6, %v712_v21, %v713_v50  ;;  %v725_v39 = vrot.slane %v3657_v7, 1  ;;  %v754_v16 = vmul.f32 0.2920817, %v3639_v10 }
 0x106   : > { %v798_v8 = vadd.f32 %v776_v51, %v738_v15  ;;  %v778_v51 = vrot.slane %v750_v58, 2  ;;  %v774_v58 = vsel %vm548_vm7, %v772_v32, %v773_v2  ;;  %v816_v4 = vrot.slane %v3612_v55, 3 }
 0x107   : > { %1657 = vrot.lane.b32.xlu1 %v3492_v38, %s3027_s29  ;;  %v3637_v38 = vld [vmem:[#allocation3 + $0x50] sm:$0xff]  ;;  %v721_v15 = vsel %vm487_vm6, %v718_v28, %v720_v33  ;;  %v737_v33 = vadd.f32 %v714_v35, %v3628_v46  ;;  %v679_v46 = vmul.f32 0.120078385, %v3622_v47  ;;  %v5385_v55 = vrot.slane %v3544_v20, 3 }
 0x108   : > { %1651 = vrot.lane.b32.xlu0 %v3483_v22, %s3027_s29  ;;  %v3646_v22 = vmul.f32 0.23388076, %v3622_v47  ;;  %v3654_v43 = vmul.f32 0.23388076, %v3637_v38  ;;  %v753_v50 = vmul.f32 0.2920817, %v3637_v38  ;;  %v834_v21 = vadd.f32 %v812_v63, %v798_v8 }
 0x109   : > { %v740_v27 = vadd.f32 %v721_v15, %v3672_v41  ;;  %v777_v8 = vrot.slane %v749_v18, 2  ;;  %v3699_v2 = vmul.f32 0.120078385, %v3637_v38  ;;  %v785_v15 = vrot.slane %v754_v16, 2 }
 0x10a   : > { %v717_v48 = vrot.slane %v3646_v22, 1  ;;  %v797_v17 = vadd.f32 %v774_v58, %v737_v33  ;;  %v752_v18 = vmul.f32 0.2920817, %v3677_v5 }
 0x10b   : > { %1685 = vrot.lane.b32.xlu1 %v3531_v3, %s3028_s3  ;;  %v780_v3 = vrot.slane %v751_v59, 2  ;;  %v3688_v59 = vmul.f32 0.23388076, %v3677_v5  ;;  %v779_v33 = vsel %vm548_vm7, %v777_v8, %v778_v51  ;;  %v5386_v8 = vrot.slane %v3588_v0, 4 }
 0x10c   : > { %1655 = vrot.lane.b32.xlu0 %v3498_v49, %s3027_s29  ;;  %v723_v49 = vrot.slane %v3654_v43, 1  ;;  %v719_v32 = vsel %vm487_vm6, %v717_v48, %v718_v28  ;;  %v866_v48 = vrot.slane %v3672_v41, 4 }
 0x10d   : > { %v781_v63 = vsel %vm548_vm7, %v778_v51, %v780_v3  ;;  %v810_v3 = vsel %vm585_vm8, %v808_v42, %v5385_v55  ;;  %v739_v16 = vadd.f32 %v719_v32, %v679_v46  ;;  %v819_v42 = vrot.slane %v3654_v43, 3 }
 0x10e   : > { %v726_v35 = vsel %vm487_vm6, %v723_v49, %v725_v39  ;;  %v800_v28 = vadd.f32 %v781_v63, %v740_v27  ;;  %v817_v39 = vsel %vm585_vm8, %v814_v6, %v816_v4  ;;  %v821_v55 = vrot.slane %v3657_v7, 3 }
 0x10f   : > { %1689 = vrot.lane.b32.xlu1 %v3549_v31, %s3028_s3  ;;  %v722_v31 = vrot.slane %v3688_v59, 1  ;;  %v742_v20 = vadd.f32 %v726_v35, %v3699_v2  ;;  %v681_v27 = vmul.f32 0.120078385, %v3677_v5  ;;  %v813_v4 = vrot.slane %v3646_v22, 3 }
 0x110   : > { %1683 = vrot.lane.b32.xlu0 %v3538_v11, %s3028_s3  ;;  %v783_v11 = vrot.slane %v753_v50, 2  ;;  %v868_v50 = vrot.slane %v841_v60, 4  ;;  %v3724_v60 = vmul.f32 0.23388076, %v3641_v56  ;;  %v782_v51 = vrot.slane %v752_v18, 2 }
 0x111   : > { %v724_v41 = vsel %vm487_vm6, %v722_v31, %v723_v49  ;;  %v3732_v43 = vadd.f32 %v3617_v1, %v3648_v61  ;;  %v3734_v7 = vadd.f32 %v864_v19, %v834_v21  ;;  %v833_v63 = vadd.f32 %v810_v3, %v797_v17 }
 0x112   : > { %v786_v58 = vsel %vm548_vm7, %v783_v11, %v785_v15  ;;  %v862_v32 = vsel %vm638_vm9, %v860_v34, %v5386_v8  ;;  %v836_v35 = vadd.f32 %v817_v39, %v800_v28  ;;  %v869_v22 = vsel %vm638_vm9, %v866_v48, %v868_v50 }
 0x113   : > { %1693 = vrot.lane.b32.xlu1 %v3560_v26, %s3028_s3  ;;  %v842_v26 = vmul.f32 0.120078385, %v3639_v10  ;;  %v799_v15 = vadd.f32 %v779_v33, %v739_v16  ;;  %v802_v31 = vadd.f32 %v786_v58, %v742_v20  ;;  %v822_v49 = vsel %vm585_vm8, %v819_v42, %v821_v55 }
 0x114   : > { %1687 = vrot.lane.b32.xlu0 %v3557_v25, %s3028_s3  ;;  %v871_v18 = vrot.slane %v3699_v2, 4  ;;  %v815_v1 = vsel %vm585_vm8, %v813_v4, %v814_v6  ;;  %v865_v61 = vrot.slane %v679_v46, 4  ;;  %v784_v0 = vsel %vm548_vm7, %v782_v51, %v783_v11 }
 0x115   : > { %v818_v19 = vrot.slane %v3688_v59, 3  ;;  %v3750_v34 = vmul.f32 0.23388076, %v3732_v43  ;;  %v3753_v21 = vmul.f32 0.23388076, %v3734_v7  ;;  %v838_v2 = vadd.f32 %v822_v49, %v802_v31 }
 0x116   : > { %v3757_v17 = vadd.f32 %v862_v32, %v833_v63  ;;  %v835_v6 = vadd.f32 %v815_v1, %v799_v15  ;;  %v867_v59 = vsel %vm638_vm9, %v865_v61, %v866_v48  ;;  %v870_v28 = vrot.slane %v681_v27, 4 }
 0x117   : > { %1697 = vrot.lane.b32.xlu1 %v3580_v54, %s3028_s3  ;;  %v873_v54 = vrot.slane %v842_v26, 4  ;;  %v3755_v26 = vadd.f32 %v869_v22, %v836_v35  ;;  %v820_v3 = vsel %vm585_vm8, %v818_v19, %v819_v42  ;;  %v420_v58 = vmul.f32 %v3348_v36, %v3348_v36 }
 0x118   : > { %1691 = vrot.lane.b32.xlu0 %v3562_v30, %s3028_s3  ;;  %v741_v30 = vadd.f32 %v724_v41, %v681_v27  ;;  %v3772_v16 = vmul.f32 0.23388076, %v3757_v17  ;;  %v872_v48 = vsel %vm638_vm9, %v870_v28, %v871_v18  ;;  %v421_v55 = vmul.f32 %v3350_v37, %v3350_v37 }
 0x119   : > { %v874_v46 = vsel %vm638_vm9, %v871_v18, %v873_v54  ;;  %v3767_v39 = vmul.f32 0.23388076, %v3755_v26  ;;  %v1772_v27 = vmul.f32 0.2920817, %v3641_v56  ;;  %v3804_v41 = vmul.f32 0.23388076, %v420_v58 }
 0x11a   : > { %v801_v11 = vadd.f32 %v784_v0, %v741_v30  ;;  %v3769_v50 = vadd.f32 %v874_v46, %v838_v2  ;;  %v3774_v30 = vadd.f32 %v867_v59, %v835_v6  ;;  %v901_v51 = vmul.f32 0.23388076, %v421_v55 }
 0x11b   : > { %1741 = vrot.lane.b32.xlu1 %v3724_v60, %s3025_s19  ;;  %v1774_v63 = vmul.f32 0.2920817, %v3734_v7  ;;  %v1771_v36 = vmul.f32 0.2920817, %v3732_v43  ;;  %v924_v37 = vrot.slane %v3804_v41, 1  ;;  %v419_v31 = vmul.f32 %v3330_v23, %v3330_v23 }
 0x11c   : > { %1695 = vrot.lane.b32.xlu0 %v3582_v29, %s3028_s3  ;;  %v837_v54 = vadd.f32 %v820_v3, %v801_v11  ;;  %v3782_v33 = vmul.f32 0.23388076, %v3769_v50  ;;  %v3785_v20 = vmul.f32 0.23388076, %v3774_v30  ;;  %v926_v8 = vrot.slane %v901_v51, 1 }
 0x11d   : > { %v1776_v32 = vmul.f32 0.2920817, %v3755_v26  ;;  %v1773_v35 = vmul.f32 0.2920817, %v3757_v17  ;;  %v960_v22 = vmul.f32 0.2920817, %v420_v58  ;;  %v423_v46 = vmul.f32 %v3362_v57, %v3362_v57 }
 0x11e   : > { %v3787_v42 = vadd.f32 %v872_v48, %v837_v54  ;;  %v961_v15 = vmul.f32 0.2920817, %v421_v55  ;;  %v927_v49 = vsel %vm487_vm6, %v924_v37, %v926_v8  ;;  %v1778_v18 = vmul.f32 0.2920817, %v3769_v50 }
 0x11f   : > { %1745 = vrot.lane.b32.xlu1 %v3753_v21, %s3025_s19  ;;  %v3819_v1 = vmul.f32 0.120078385, %v420_v58  ;;  %v1775_v61 = vmul.f32 0.2920817, %v3774_v30  ;;  %v984_v0 = vrot.slane %v960_v22, 2  ;;  %v424_v11 = vmul.f32 %v3370_v62, %v3370_v62 }
 0x120   : > { %1739 = vrot.lane.b32.xlu0 %v3750_v34, %s3025_s19  ;;  %v3799_v4 = vmul.f32 0.23388076, %v3787_v42  ;;  %v986_v19 = vrot.slane %v961_v15, 2  ;;  %v899_v6 = vmul.f32 0.23388076, %v419_v31  ;;  %v1020_v28 = vrot.slane %v3804_v41, 3 }
 0x121   : > { %v952_v2 = vadd.f32 %v927_v49, %v3819_v1  ;;  %v1055_v23 = vmul.f32 0.120078385, %v421_v55  ;;  %v1777_v59 = vmul.f32 0.2920817, %v3787_v42  ;;  %v1022_v54 = vrot.slane %v901_v51, 3 }
 0x122   : > { %v987_v3 = vsel %vm548_vm7, %v984_v0, %v986_v19  ;;  %v923_v58 = vrot.slane %v899_v6, 1  ;;  %v3836_v55 = vmul.f32 0.120078385, %v3641_v56  ;;  %v3840_v57 = vmul.f32 %v3332_v24, %v3332_v24 }
 0x123   : > { %1749 = vrot.lane.b32.xlu1 %v3767_v39, %s3025_s19  ;;  %v1012_v48 = vadd.f32 %v987_v3, %v952_v2  ;;  %v3844_v62 = vmul.f32 %v3395_v44, %v3395_v44  ;;  %v1074_v41 = vrot.slane %v1055_v23, 4  ;;  %v1023_v56 = vsel %vm585_vm8, %v1020_v28, %v1022_v54 }
 0x124   : > { %1743 = vrot.lane.b32.xlu0 %v3772_v16, %s3025_s19  ;;  %5387 = vst [vmem:[#allocation26_spill] sm:$0xff] %v3836_v55  ;;  %v925_v51 = vsel %vm487_vm6, %v923_v58, %v924_v37  ;;  %v3853_v8 = vmul.f32 0.23388076, %v423_v46  ;;  %v904_v24 = vmul.f32 0.23388076, %v424_v11  ;;  %v3913_v23 = vmul.f32 %v3442_v14, %v3442_v14 }
 0x125   : > { %v3858_v44 = vmul.f32 0.120078385, %v3732_v43  ;;  %v1048_v37 = vadd.f32 %v1023_v56, %v1012_v48  ;;  %v3872_v22 = vmul.f32 0.120078385, %v3774_v30  ;;  %v3876_v43 = vmul.f32 %v3433_v9, %v3433_v9 }
 0x126   : > { %v3881_v15 = vmul.f32 0.120078385, %v423_v46  ;;  %v929_v30 = vrot.slane %v3853_v8, 1  ;;  %v931_v49 = vrot.slane %v904_v24, 1  ;;  %v3902_v19 = vmul.f32 0.23388076, %v3844_v62 }
 0x127   : > { %1753 = vrot.lane.b32.xlu1 %v3782_v33, %s3025_s19  ;;  %5388 = vst [vmem:[#allocation27_spill] sm:$0xff] %v3858_v44  ;;  %5392 = vst [vmem:[#allocation31_spill] sm:$0xff] %v3872_v22  ;;  %v1027_v3 = vrot.slane %v904_v24, 3  ;;  %v1056_v14 = vmul.f32 0.120078385, %v424_v11 }
 0x128   : > { %1747 = vrot.lane.b32.xlu0 %v3785_v20, %s3025_s19  ;;  %v3933_v56 = vmul.f32 0.2920817, %v3844_v62  ;;  %v3937_v24 = vmul.f32 0.23388076, %v3876_v43 }
 0x12b   : > { %1789 = vrot.lane.b32.xlu1 %v1772_v27, %s3026_s28  ;;  %v3848_v27 = vmul.f32 %v3397_v45, %v3397_v45  ;;  %v3861_v45 = vmul.f32 0.120078385, %v3734_v7  ;;  %v3879_v7 = vmul.f32 0.120078385, %v3769_v50 }
 0x12c   : > { %1751 = vrot.lane.b32.xlu0 %v3799_v4, %s3025_s19 }
 0x12d   : > { %5389 = vst [vmem:[#allocation28_spill] sm:$0xff] %v3861_v45  ;;  %5393 = vst [vmem:[#allocation32_spill] sm:$0xff] %v3879_v7  ;;  %v3905_v2 = vmul.f32 0.23388076, %v3848_v27 }
 0x12f   : > { %1793 = vrot.lane.b32.xlu1 %v1774_v63, %s3026_s28  ;;  %v959_v63 = vmul.f32 0.2920817, %v419_v31 }
 0x130   : > { %1787 = vrot.lane.b32.xlu0 %v1771_v36, %s3026_s28  ;;  %v891_v36 = vmul.f32 0.120078385, %v419_v31  ;;  %v1019_v31 = vrot.slane %v899_v6, 3  ;;  %v5346_v6 = vrot.slane %v3881_v15, 4 }
 0x133   : > { %1797 = vrot.lane.b32.xlu1 %v1776_v32, %s3026_s28  ;;  %v3864_v32 = vmul.f32 0.120078385, %v3757_v17  ;;  %v983_v17 = vrot.slane %v959_v63, 2  ;;  %v936_v63 = vrot.slane %v3905_v2, 1 }
 0x134   : > { %1791 = vrot.lane.b32.xlu0 %v1773_v35, %s3026_s28  ;;  %v3869_v35 = vmul.f32 0.120078385, %v3755_v26 }
 0x135   : > { %5390 = vst [vmem:[#allocation29_spill] sm:$0xff] %v3864_v32  ;;  %v985_v50 = vsel %vm548_vm7, %v983_v17, %v984_v0  ;;  %v1071_v0 = vrot.slane %v891_v36, 4  ;;  %v3952_v17 = vmul.f32 0.120078385, %v3840_v57 }
 0x136   : > { %5391 = vst [vmem:[#allocation30_spill] sm:$0xff] %v3869_v35 }
 0x137   : > { %1801 = vrot.lane.b32.xlu1 %v1778_v18, %s3026_s28  ;;  %v3894_v18 = vmul.f32 0.2920817, %v423_v46  ;;  %v932_v46 = vsel %vm487_vm6, %v929_v30, %v931_v49 }
 0x138   : > { %1795 = vrot.lane.b32.xlu0 %v1775_v61, %s3026_s28  ;;  %v3899_v61 = vmul.f32 0.23388076, %v3840_v57 }
 0x139   : > { %v989_v48 = vrot.slane %v3894_v18, 2 }
 0x13b   : > { %1821 = vrot.lane.b32.xlu1 %v3724_v60, %s3027_s29  ;;  %v1072_v60 = vrot.slane %v3819_v1, 4  ;;  %v964_v1 = vmul.f32 0.2920817, %v424_v11  ;;  %v954_v11 = vadd.f32 %v932_v46, %v3881_v15 }
 0x13c   : > { %1799 = vrot.lane.b32.xlu0 %v1777_v59, %s3026_s28  ;;  %v5344_v59 = vrot.slane %v3853_v8, 3 }
 0x13d   : > { %v1075_v26 = vsel %vm638_vm9, %v1072_v60, %v1074_v41  ;;  %v991_v58 = vrot.slane %v964_v1, 2  ;;  %v928_v41 = vrot.slane %v3899_v61, 1 }
 0x13e   : > { %v3891_v9 = vadd.f32 %v1075_v26, %v1048_v37  ;;  %v962_v26 = vmul.f32 0.2920817, %v3840_v57 }
 0x13f   : > { %1825 = vrot.lane.b32.xlu1 %v3753_v21, %s3027_s29  ;;  %v951_v21 = vadd.f32 %v925_v51, %v891_v36  ;;  %v934_v51 = vrot.slane %v3902_v19, 1  ;;  %v967_v36 = vmul.f32 0.2920817, %v3848_v27  ;;  %v992_v18 = vsel %vm548_vm7, %v989_v48, %v991_v58 }
 0x140   : > { %1819 = vrot.lane.b32.xlu0 %v3750_v34, %s3027_s29  ;;  %v3885_v34 = vmul.f32 %v3440_v13, %v3440_v13  ;;  %v3959_v49 = vpop.permute.xlu0 %1563  ;;  %v930_v1 = vsel %vm487_vm6, %v928_v41, %v929_v30  ;;  %v970_v30 = vmul.f32 0.2920817, %v3913_v23 }
 0x141   : > { %v1011_v13 = vadd.f32 %v985_v50, %v951_v21  ;;  %v3920_v54 = vpop.permute.xlu1 %1565  ;;  %v3947_v21 = vmul.f32 0.23388076, %v3913_v23  ;;  %v937_v57 = vsel %vm487_vm6, %v934_v51, %v936_v63 }
 0x142   : > { %v3944_v37 = vmul.f32 0.23388076, %v3885_v34  ;;  %v3976_v58 = vmul.f32 0.2920817, %v3885_v34 }
 0x143   : > { %1829 = vrot.lane.b32.xlu1 %v3767_v39, %s3027_s29  ;;  %v3908_v39 = vmul.f32 0.120078385, %v3787_v42  ;;  %v3923_v42 = vmul.f32 0.23388076, %v3891_v9 }
 0x144   : > { %1823 = vrot.lane.b32.xlu0 %v3772_v16, %s3027_s29  ;;  %v1021_v16 = vsel %vm585_vm8, %v1019_v31, %v1020_v28  ;;  %v428_v31 = vmul.f32 %v3467_v40, %v3467_v40  ;;  %v994_v40 = vrot.slane %v3933_v56, 2  ;;  %v939_v46 = vrot.slane %v3944_v37, 1 }
 0x145   : > { %5394 = vst [vmem:[#allocation33_spill] sm:$0xff] %v3908_v39  ;;  %v1047_v28 = vadd.f32 %v1021_v16, %v1011_v13  ;;  %v3966_v13 = vmul.f32 0.120078385, %v3844_v62  ;;  %v996_v16 = vrot.slane %v967_v36, 2  ;;  %v1014_v62 = vadd.f32 %v992_v18, %v954_v11 }
 0x146   : > { %v3982_v41 = vmul.f32 0.23388076, %v428_v31  ;;  %v1030_v56 = vrot.slane %v3902_v19, 3  ;;  %v1032_v36 = vrot.slane %v3905_v2, 3  ;;  %v3995_v18 = vmul.f32 0.120078385, %v3876_v43 }
 0x147   : > { %1833 = vrot.lane.b32.xlu1 %v3782_v33, %s3027_s29  ;;  %v1073_v33 = vsel %vm638_vm9, %v1071_v0, %v1072_v60  ;;  %v1079_v60 = vrot.slane %v1056_v14, 4  ;;  %v3968_v0 = vpop.permute.xlu1 %1569  ;;  %v988_v14 = vrot.slane %v962_v26, 2  ;;  %v956_v11 = vadd.f32 %v937_v57, %v3966_v13 }
 0x148   : > { %1827 = vrot.lane.b32.xlu0 %v3785_v20, %s3027_s29  ;;  %v1028_v20 = vsel %vm585_vm8, %v5344_v59, %v1027_v3  ;;  %v3961_v50 = vadd.f32 %v1073_v33, %v1047_v28  ;;  %v941_v3 = vrot.slane %v3947_v21, 1  ;;  %v965_v28 = vmul.f32 0.2920817, %v3876_v43 }
 0x149   : > { %v1080_v63 = vsel %vm638_vm9, %v5346_v6, %v1079_v60  ;;  %v953_v33 = vadd.f32 %v930_v1, %v3952_v17  ;;  %v997_v26 = vsel %vm548_vm7, %v994_v40, %v996_v16  ;;  %v3998_v59 = vmul.f32 0.120078385, %v3885_v34  ;;  %v4000_v29 = vpop.permute.xlu0 %1567 }
 0x14a   : > { %5395 = vst [vmem:[#allocation34_spill] sm:$0xff] %v4000_v29  ;;  %v942_v1 = vsel %vm487_vm6, %v939_v46, %v941_v3  ;;  %v999_v19 = vrot.slane %v3976_v58, 2  ;;  %v1001_v6 = vrot.slane %v970_v30, 2  ;;  %v990_v43 = vsel %vm548_vm7, %v988_v14, %v989_v48 }
 0x14b   : > { %1861 = vrot.lane.b32.xlu1 %v3836_v55, %s3028_s3  ;;  %v993_v57 = vrot.slane %v965_v28, 2  ;;  %v938_v34 = vrot.slane %v3982_v41, 1  ;;  %v968_v16 = vmul.f32 0.2920817, %v428_v31  ;;  %v1024_v3 = vrot.slane %v3899_v61, 3 }
 0x14c   : > { %1831 = vrot.lane.b32.xlu0 %v3799_v4, %s3027_s29  ;;  %v933_v4 = vrot.slane %v3937_v24, 1  ;;  %v1057_v58 = vmul.f32 0.120078385, %v3848_v27  ;;  %v1016_v30 = vadd.f32 %v997_v26, %v956_v11  ;;  %v958_v48 = vadd.f32 %v942_v1, %v3998_v59 }
 0x14d   : > { %v1002_v14 = vsel %vm548_vm7, %v999_v19, %v1001_v6  ;;  %v1035_v28 = vrot.slane %v3944_v37, 3  ;;  %v995_v61 = vsel %vm548_vm7, %v993_v57, %v994_v40  ;;  %v1029_v27 = vrot.slane %v3937_v24, 3 }
 0x14e   : > { %v935_v60 = vsel %vm487_vm6, %v933_v4, %v934_v51  ;;  %v1050_v51 = vadd.f32 %v1028_v20, %v1014_v62  ;;  %v1013_v4 = vadd.f32 %v990_v43, %v953_v33  ;;  %v940_v20 = vsel %vm487_vm6, %v938_v34, %v939_v46 }
 0x14f   : > { %1865 = vrot.lane.b32.xlu1 %v3861_v45, %s3028_s3  ;;  %v1037_v45 = vrot.slane %v3947_v21, 3  ;;  %v998_v62 = vrot.slane %v968_v16, 2  ;;  %v1076_v6 = vrot.slane %v3952_v17, 4  ;;  %v1082_v37 = vrot.slane %v3966_v13, 4 }
 0x150   : > { %1859 = vrot.lane.b32.xlu0 %v3858_v44, %s3028_s3  ;;  %v4007_v2 = vpop.permute.xlu1 %1573  ;;  %v955_v44 = vadd.f32 %v935_v60, %v3995_v18  ;;  %v1084_v21 = vrot.slane %v1057_v58, 4  ;;  %v4035_v40 = vadd.f32 %v1080_v63, %v1050_v51  ;;  %v5399_v24 = vrot.slane %v3853_v8, 3 }
 0x151   : > { %5396 = vst [vmem:[#allocation35_spill] sm:$0xff] %v4007_v2  ;;  %v1018_v26 = vadd.f32 %v1002_v14, %v958_v48  ;;  %v1038_v43 = vsel %vm585_vm8, %v1035_v28, %v1037_v45  ;;  %v1000_v13 = vsel %vm548_vm7, %v998_v62, %v999_v19  ;;  %v1034_v63 = vrot.slane %v3982_v41, 3 }
 0x152   : > { %v1026_v46 = vsel %vm585_vm8, %v1024_v3, %v5399_v24  ;;  %v1015_v1 = vadd.f32 %v995_v61, %v955_v44  ;;  %v5400_v8 = vrot.slane %v3881_v15, 4  ;;  %v1085_v44 = vsel %vm638_vm9, %v1082_v37, %v1084_v21 }
 0x153   : > { %1869 = vrot.lane.b32.xlu1 %v3869_v35, %s3028_s3  ;;  %v1033_v35 = vsel %vm585_vm8, %v1030_v56, %v1032_v36  ;;  %v1049_v60 = vadd.f32 %v1026_v46, %v1013_v4  ;;  %v1087_v45 = vrot.slane %v3998_v59, 4  ;;  %v1081_v41 = vrot.slane %v3995_v18, 4 }
 0x154   : > { %1863 = vrot.lane.b32.xlu0 %v3864_v32, %s3028_s3  ;;  %v897_v32 = vmul.f32 0.120078385, %v428_v31  ;;  %v1058_v31 = vmul.f32 0.120078385, %v3913_v23  ;;  %v1052_v11 = vadd.f32 %v1033_v35, %v1016_v30  ;;  %v1031_v23 = vsel %vm585_vm8, %v1029_v27, %v1030_v56 }
 0x155   : > { %v1078_v35 = vsel %vm638_vm9, %v1076_v6, %v5400_v8  ;;  %v4056_v56 = vmul.f32 0.23388076, %v4035_v40  ;;  %v1054_v16 = vadd.f32 %v1038_v43, %v1018_v26  ;;  %v4064_v15 = vmul.f32 0.23388076, %v3961_v50 }
 0x156   : > { %v4028_v33 = vpop.permute.xlu0 %1571  ;;  %v957_v17 = vadd.f32 %v940_v20, %v897_v32  ;;  %v1089_v57 = vrot.slane %v1058_v31, 4  ;;  %v4058_v19 = vadd.f32 %v1085_v44, %v1052_v11  ;;  %v4066_v4 = vadd.f32 %v1078_v35, %v1049_v60 }
 0x157   : > { %1873 = vrot.lane.b32.xlu1 %v3879_v7, %s3028_s3  ;;  %5397 = vst [vmem:[#allocation36_spill] sm:$0xff] %v4028_v33  ;;  %v1051_v3 = vadd.f32 %v1031_v23, %v1015_v1  ;;  %v1036_v58 = vsel %vm585_vm8, %v1034_v63, %v1035_v28  ;;  %v1083_v14 = vsel %vm638_vm9, %v1081_v41, %v1082_v37  ;;  %v1086_v27 = vrot.slane %v897_v32, 4 }
 0x158   : > { %1867 = vrot.lane.b32.xlu0 %v3872_v22, %s3028_s3  ;;  %v1017_v59 = vadd.f32 %v1000_v13, %v957_v17  ;;  %v1090_v18 = vsel %vm638_vm9, %v1087_v45, %v1089_v57  ;;  %v4077_v48 = vmul.f32 0.23388076, %v4058_v19  ;;  %v4085_v62 = vmul.f32 0.23388076, %v4066_v4 }
 0x159   : > { %v4033_v36 = vpop.permute.xlu1 %1577  ;;  %v4080_v61 = vadd.f32 %v1090_v18, %v1054_v16  ;;  %v4087_v28 = vadd.f32 %v1083_v14, %v1051_v3  ;;  %v1088_v32 = vsel %vm638_vm9, %v1086_v27, %v1087_v45  ;;  %v1948_v26 = vmul.f32 0.2920817, %v3891_v9 }
 0x15a   : > { %5398 = vst [vmem:[#allocation37_spill] sm:$0xff] %v4033_v36  ;;  %v1053_v6 = vadd.f32 %v1036_v58, %v1017_v59  ;;  %v1950_v17 = vmul.f32 0.2920817, %v4035_v40  ;;  %v1947_v13 = vmul.f32 0.2920817, %v3961_v50  ;;  %v432_v63 = vmul.f32 %v3507_v52, %v3507_v52  ;;  %v5411_v52 = vld [vmem:[#allocation13_spill] sm:$0xff] }
 0x15b   : > { %1917 = vrot.lane.b32.xlu1 %v3923_v42, %s3025_s19  ;;  %v4096_v37 = vmul.f32 0.23388076, %v4080_v61  ;;  %v4102_v24 = vmul.f32 0.23388076, %v4087_v28  ;;  %v433_v8 = vmul.f32 %v3509_v53, %v3509_v53  ;;  %v1952_v44 = vmul.f32 0.2920817, %v4058_v19 }
 0x15c   : > { %1871 = vrot.lane.b32.xlu0 %v3908_v39, %s3028_s3  ;;  %v4104_v46 = vadd.f32 %v1088_v32, %v1053_v6  ;;  %v1949_v57 = vmul.f32 0.2920817, %v4066_v4  ;;  %v4139_v41 = vmul.f32 0.23388076, %v432_v63  ;;  %v431_v3 = vmul.f32 %v5411_v52, %v5411_v52  ;;  %v5412_v53 = vld [vmem:[#allocation15_spill] sm:$0xff]  ;;  %v5413_v58 = vld [vmem:[#allocation16_spill] sm:$0xff] }
 0x15d   : > { %v4053_v34 = vpop.permute.xlu1 %1613  ;;  %v4141_v16 = vmul.f32 0.23388076, %v433_v8  ;;  %v435_v59 = vmul.f32 %v5412_v53, %v5412_v53  ;;  %v4150_v18 = vmul.f32 %v5413_v58, %v5413_v58  ;;  %v1954_v27 = vmul.f32 0.2920817, %v4080_v61 }
 0x15e   : > { %v4061_v51 = vpop.permute.xlu0 %1575  ;;  %v4116_v1 = vmul.f32 0.23388076, %v4104_v46  ;;  %v1176_v6 = vmul.f32 0.2920817, %v432_v63  ;;  %v1177_v32 = vmul.f32 0.2920817, %v433_v8 }
 0x15f   : > { %5401 = vst [vmem:[#allocation38_spill] sm:$0xff] %v4061_v51  ;;  %1921 = vrot.lane.b32.xlu1 %v4056_v56, %s3025_s19  ;;  %v4161_v52 = vmul.f32 0.23388076, %v431_v3  ;;  %v4164_v53 = vmul.f32 0.23388076, %v435_v59 }
 0x160   : > { %1915 = vrot.lane.b32.xlu0 %v4064_v15, %s3025_s19  ;;  %v4171_v58 = vmul.f32 0.120078385, %v3891_v9  ;;  %v4174_v39 = vmul.f32 0.120078385, %v3961_v50  ;;  %v4177_v22 = vmul.f32 0.120078385, %v4035_v40 }
 0x161   : > { %v4074_v30 = vpop.permute.xlu1 %1617  ;;  %v4184_v7 = vmul.f32 0.120078385, %v432_v63  ;;  %v1200_v51 = vrot.slane %v1176_v6, 2  ;;  %v1953_v9 = vmul.f32 0.2920817, %v4104_v46  ;;  %v1139_v50 = vrot.slane %v4161_v52, 1 }
 0x162   : > { %5402 = vst [vmem:[#allocation39_spill] sm:$0xff] %v4074_v30  ;;  %v4082_v20 = vpop.permute.xlu0 %1611  ;;  %v1175_v55 = vmul.f32 0.2920817, %v431_v3  ;;  %v4194_v40 = vmul.f32 0.120078385, %v4058_v19 }
 0x163   : > { %5403 = vst [vmem:[#allocation40_spill] sm:$0xff] %v4082_v20  ;;  %1925 = vrot.lane.b32.xlu1 %v4077_v48, %s3025_s19  ;;  %v4198_v6 = vmul.f32 0.2920817, %v435_v59 }
 0x164   : > { %1919 = vrot.lane.b32.xlu0 %v4085_v62, %s3025_s19 }
 0x165   : > { %v4093_v21 = vpop.permute.xlu1 %1621 }
 0x166   : > { %5404 = vst [vmem:[#allocation41_spill] sm:$0xff] %v4093_v21  ;;  %v4099_v31 = vpop.permute.xlu0 %1615 }
 0x167   : > { %5405 = vst [vmem:[#allocation42_spill] sm:$0xff] %v4099_v31  ;;  %1929 = vrot.lane.b32.xlu1 %v4096_v37, %s3025_s19  ;;  %v4220_v31 = vmul.f32 0.120078385, %v435_v59 }
 0x168   : > { %1923 = vrot.lane.b32.xlu0 %v4102_v24, %s3025_s19 }
 0x169   : > { %v4110_v11 = vpop.permute.xlu1 %1625 }
 0x16a   : > { %5406 = vst [vmem:[#allocation43_spill] sm:$0xff] %v4110_v11  ;;  %v4113_v60 = vpop.permute.xlu0 %1619  ;;  %v1202_v11 = vrot.slane %v1177_v32, 2  ;;  %v4202_v32 = vmul.f32 0.120078385, %v4087_v28 }
 0x16b   : > { %5407 = vst [vmem:[#allocation44_spill] sm:$0xff] %v4113_v60  ;;  %1965 = vrot.lane.b32.xlu1 %v1948_v26, %s3026_s28  ;;  %v1107_v60 = vmul.f32 0.120078385, %v431_v3 }
 0x16c   : > { %1927 = vrot.lane.b32.xlu0 %v4116_v1, %s3025_s19 }
 0x16d   : > { %v4121_v43 = vpop.permute.xlu1 %1645  ;;  %v1287_v3 = vrot.slane %v1107_v60, 4 }
 0x16e   : > { %v4124_v23 = vpop.permute.xlu0 %1623 }
 0x16f   : > { %5408 = vst [vmem:[#allocation45_spill] sm:$0xff] %v4124_v23  ;;  %1969 = vrot.lane.b32.xlu1 %v1950_v17, %s3026_s28  ;;  %v1951_v17 = vmul.f32 0.2920817, %v4087_v28  ;;  %v1238_v28 = vrot.slane %v4141_v16, 3 }
 0x170   : > { %1963 = vrot.lane.b32.xlu0 %v1947_v13, %s3026_s28  ;;  %v1140_v13 = vrot.slane %v4139_v41, 1 }
 0x171   : > { %v4133_v35 = vpop.permute.xlu1 %1649 }
 0x172   : > { %5409 = vst [vmem:[#allocation46_spill] sm:$0xff] %v4133_v35  ;;  %v4136_v45 = vpop.permute.xlu0 %1643  ;;  %v1141_v33 = vsel %vm487_vm6, %v1139_v50, %v1140_v13 }
 0x173   : > { %5410 = vst [vmem:[#allocation47_spill] sm:$0xff] %v4136_v45  ;;  %1973 = vrot.lane.b32.xlu1 %v1952_v44, %s3026_s28  ;;  %v1142_v44 = vrot.slane %v4141_v16, 1  ;;  %v5421_v16 = vld [vmem:[#allocation24_spill] sm:$0xff] }
 0x174   : > { %1967 = vrot.lane.b32.xlu0 %v1949_v57, %s3026_s28  ;;  %v4167_v57 = vmul.f32 0.23388076, %v4150_v18 }
 0x175   : > { %v4153_v14 = vpop.permute.xlu1 %1653 }
 0x176   : > { %5414 = vst [vmem:[#allocation13_spill] sm:$0xff] %v4153_v14  ;;  %v4156_v26 = vpop.permute.xlu0 %1647  ;;  %v1147_v63 = vrot.slane %v4167_v57, 1  ;;  %v1288_v14 = vrot.slane %v4184_v7, 4 }
 0x177   : > { %5415 = vst [vmem:[#allocation15_spill] sm:$0xff] %v4156_v26  ;;  %1977 = vrot.lane.b32.xlu1 %v1954_v27, %s3026_s28  ;;  %v4182_v27 = vmul.f32 0.120078385, %v4066_v4  ;;  %v1236_v4 = vrot.slane %v4139_v41, 3  ;;  %v5420_v41 = vrot.slane %v4164_v53, 1 }
 0x178   : > { %1971 = vrot.lane.b32.xlu0 %v1951_v17, %s3026_s28  ;;  %v1143_v17 = vsel %vm487_vm6, %v1140_v13, %v1142_v44  ;;  %v4205_v44 = vmul.f32 0.120078385, %v4080_v61  ;;  %v1199_v61 = vrot.slane %v1175_v55, 2  ;;  %v434_v55 = vmul.f32 %v5421_v16, %v5421_v16  ;;  %v5422_v13 = vld [vmem:[#allocation25_spill] sm:$0xff] }
 0x179   : > { %v4179_v23 = vpop.permute.xlu1 %1657  ;;  %v1168_v19 = vadd.f32 %v1143_v17, %v4184_v7  ;;  %v4234_v7 = vmul.f32 %v3601_v12, %v3601_v12  ;;  %v4239_v17 = vmul.f32 0.120078385, %v4104_v46  ;;  %v1235_v12 = vrot.slane %v4161_v52, 3 }
 0x17a   : > { %5416 = vst [vmem:[#allocation16_spill] sm:$0xff] %v4179_v23  ;;  %v4186_v36 = vpop.permute.xlu0 %1651  ;;  %v1180_v23 = vmul.f32 0.2920817, %v4150_v18  ;;  %v1201_v16 = vsel %vm548_vm7, %v1199_v61, %v1200_v51 }
 0x17b   : > { %5417 = vst [vmem:[#allocation48_spill] sm:$0xff] %v4186_v36  ;;  %1997 = vrot.lane.b32.xlu1 %v3923_v42, %s3027_s29  ;;  %v1271_v36 = vmul.f32 0.120078385, %v433_v8  ;;  %v1148_v8 = vsel %vm487_vm6, %v5420_v41, %v1147_v63  ;;  %v1167_v41 = vadd.f32 %v1141_v33, %v1107_v60  ;;  %v1243_v33 = vrot.slane %v4167_v57, 3 }
 0x17c   : > { %1975 = vrot.lane.b32.xlu0 %v1953_v9, %s3026_s28  ;;  %v1203_v9 = vsel %vm548_vm7, %v1200_v51, %v1202_v11  ;;  %v1207_v11 = vrot.slane %v1180_v23, 2  ;;  %v1239_v23 = vsel %vm585_vm8, %v1236_v4, %v1238_v28  ;;  %v1170_v46 = vadd.f32 %v1148_v8, %v4220_v31 }
 0x17d   : > { %v4208_v42 = vpop.permute.xlu1 %1685  ;;  %v1228_v50 = vadd.f32 %v1203_v9, %v1168_v19  ;;  %v1290_v63 = vrot.slane %v1271_v36, 4  ;;  %v5425_v36 = vrot.slane %v4198_v6, 2  ;;  %v4257_v60 = vmul.f32 0.23388076, %v434_v55 }
 0x17e   : > { %5418 = vst [vmem:[#allocation49_spill] sm:$0xff] %v4208_v42  ;;  %v4212_v26 = vpop.permute.xlu0 %1655  ;;  %v1227_v57 = vadd.f32 %v1201_v16, %v1167_v41  ;;  %v5355_v8 = vrot.slane %v4220_v31, 4  ;;  %v4276_v19 = vmul.f32 %v3639_v10, %v3639_v10  ;;  %v1178_v41 = vmul.f32 0.2920817, %v434_v55 }
 0x17f   : > { %5419 = vst [vmem:[#allocation50_spill] sm:$0xff] %v4212_v26  ;;  %2001 = vrot.lane.b32.xlu1 %v4056_v56, %s3027_s29  ;;  %v438_v56 = vmul.f32 %v5422_v13, %v5422_v13  ;;  %v1272_v13 = vmul.f32 0.120078385, %v4150_v18  ;;  %v1208_v51 = vsel %vm548_vm7, %v5425_v36, %v1207_v11  ;;  %v1264_v9 = vadd.f32 %v1239_v23, %v1228_v50 }
 0x180   : > { %1995 = vrot.lane.b32.xlu0 %v4064_v15, %s3027_s29  ;;  %v1291_v28 = vsel %vm638_vm9, %v1288_v14, %v1290_v63  ;;  %v441_v36 = vmul.f32 %v3637_v38, %v3637_v38  ;;  %v1237_v50 = vsel %vm585_vm8, %v1235_v12, %v1236_v4  ;;  %v4282_v63 = vsel %vm638_vm9, %v1287_v3, %v1288_v14 }
 0x181   : > { %v4236_v59 = vpop.permute.xlu1 %1689  ;;  %v4259_v18 = vmul.f32 0.23388076, %v438_v56  ;;  %v1295_v11 = vrot.slane %v1272_v13, 4  ;;  %v5428_v23 = vrot.slane %v4164_v53, 3  ;;  %v1144_v10 = vrot.slane %v4257_v60, 1 }
 0x182   : > { %5423 = vst [vmem:[#allocation24_spill] sm:$0xff] %v4236_v59  ;;  %v4241_v15 = vpop.permute.xlu0 %1683  ;;  %v4294_v4 = vadd.f32 %v1291_v28, %v1264_v9  ;;  %v1182_v14 = vmul.f32 0.2920817, %v438_v56  ;;  %v1183_v3 = vmul.f32 0.2920817, %v4234_v7  ;;  %v1204_v26 = vrot.slane %v1178_v41, 2 }
 0x183   : > { %5424 = vst [vmem:[#allocation25_spill] sm:$0xff] %v4241_v15  ;;  %2005 = vrot.lane.b32.xlu1 %v4077_v48, %s3027_s29  ;;  %v4262_v48 = vmul.f32 0.23388076, %v4234_v7  ;;  %v1244_v38 = vsel %vm585_vm8, %v5428_v23, %v1243_v33  ;;  %v1150_v16 = vrot.slane %v4259_v18, 1  ;;  %v4306_v33 = vsel %vm638_vm9, %v5355_v8, %v1295_v11 }
 0x184   : > { %1999 = vrot.lane.b32.xlu0 %v4085_v62, %s3027_s29  ;;  %v437_v62 = vmul.f32 %v3622_v47, %v3622_v47  ;;  %v1230_v47 = vadd.f32 %v1208_v51, %v1170_v46  ;;  %v4301_v46 = vadd.f32 %v1237_v50, %v1227_v57  ;;  %v4308_v51 = vmul.f32 0.23388076, %v441_v36 }
 0x185   : > { %v4264_v52 = vpop.permute.xlu1 %1693  ;;  %v4311_v23 = vmul.f32 0.23388076, %v4276_v19  ;;  %v4317_v28 = vmul.f32 0.120078385, %v434_v55  ;;  %v440_v57 = vmul.f32 %v3677_v5, %v3677_v5  ;;  %v5431_v11 = vrot.slane %v4164_v53, 1 }
 0x186   : > { %5426 = vst [vmem:[#allocation51_spill] sm:$0xff] %v4264_v52  ;;  %v4269_v61 = vpop.permute.xlu0 %1687  ;;  %v4297_v12 = vmul.f32 0.23388076, %v437_v62  ;;  %v4315_v9 = vadd.f32 %v1244_v38, %v1230_v47  ;;  %v1240_v8 = vrot.slane %v4257_v60, 3  ;;  %v1210_v55 = vrot.slane %v1182_v14, 2 }
 0x187   : > { %5427 = vst [vmem:[#allocation52_spill] sm:$0xff] %v4269_v61  ;;  %2009 = vrot.lane.b32.xlu1 %v4096_v37, %s3027_s29  ;;  %v1152_v37 = vrot.slane %v4262_v48, 1  ;;  %v1146_v50 = vsel %vm487_vm6, %v1144_v10, %v5431_v11  ;;  %v1212_v41 = vrot.slane %v1183_v3, 2  ;;  %v1181_v5 = vmul.f32 0.2920817, %v437_v62 }
 0x188   : > { %2003 = vrot.lane.b32.xlu0 %v4102_v24, %s3027_s29  ;;  %v1157_v52 = vrot.slane %v4311_v23, 1  ;;  %v4337_v10 = vmul.f32 0.2920817, %v441_v36  ;;  %v1169_v60 = vadd.f32 %v1146_v50, %v4317_v28  ;;  %v1292_v3 = vrot.slane %v4317_v28, 4 }
 0x189   : > { %v4292_v13 = vpop.permute.xlu1 %1697  ;;  %v1153_v47 = vsel %vm487_vm6, %v1150_v16, %v1152_v37  ;;  %v5434_v37 = vrot.slane %v4198_v6, 2  ;;  %v4347_v11 = vmul.f32 0.23388076, %v440_v57  ;;  %v1248_v15 = vrot.slane %v4262_v48, 3 }
 0x18a   : > { %5429 = vst [vmem:[#allocation53_spill] sm:$0xff] %v4292_v13  ;;  %v4299_v24 = vpop.permute.xlu0 %1691  ;;  %v4327_v13 = vmul.f32 0.120078385, %v438_v56  ;;  %v1186_v56 = vmul.f32 0.2920817, %v4276_v19  ;;  %v1213_v6 = vsel %vm548_vm7, %v1210_v55, %v1212_v41  ;;  %v1209_v28 = vrot.slane %v1181_v5, 2 }
 0x18b   : > { %5430 = vst [vmem:[#allocation54_spill] sm:$0xff] %v4299_v24  ;;  %2037 = vrot.lane.b32.xlu1 %v4171_v58, %s3028_s3  ;;  %v1149_v24 = vrot.slane %v4297_v12, 1  ;;  %v1206_v14 = vsel %vm548_vm7, %v1204_v26, %v5434_v37  ;;  %v1273_v59 = vmul.f32 0.120078385, %v4234_v7  ;;  %v4358_v26 = vmul.f32 0.120078385, %v437_v62 }
 0x18c   : > { %2007 = vrot.lane.b32.xlu0 %v4116_v1, %s3027_s29  ;;  %v1155_v1 = vrot.slane %v4308_v51, 1  ;;  %v4360_v37 = vmul.f32 0.120078385, %v441_v36  ;;  %v1217_v48 = vrot.slane %v1186_v56, 2  ;;  %v1229_v7 = vadd.f32 %v1206_v14, %v1169_v60 }
 0x18d   : > { %v4330_v38 = vpop.permute.xlu1 %1741  ;;  %v1151_v45 = vsel %vm487_vm6, %v1149_v24, %v1150_v16  ;;  %v5437_v41 = vrot.slane %v4164_v53, 3  ;;  %v1154_v36 = vrot.slane %v4347_v11, 1  ;;  %v1184_v5 = vmul.f32 0.2920817, %v440_v57 }
 0x18e   : > { %5432 = vst [vmem:[#allocation55_spill] sm:$0xff] %v4330_v38  ;;  %v4333_v61 = vpop.permute.xlu0 %1695  ;;  %v1246_v38 = vrot.slane %v4259_v18, 3  ;;  %v1215_v18 = vrot.slane %v4337_v10, 2  ;;  %v1298_v24 = vrot.slane %v4327_v13, 4  ;;  %v1300_v10 = vrot.slane %v1273_v59, 4 }
 0x18f   : > { %5433 = vst [vmem:[#allocation56_spill] sm:$0xff] %v4333_v61  ;;  %2041 = vrot.lane.b32.xlu1 %v4177_v22, %s3028_s3  ;;  %v1172_v61 = vadd.f32 %v1153_v47, %v4327_v13  ;;  %v1158_v47 = vsel %vm487_vm6, %v1155_v1, %v1157_v52  ;;  %v1242_v62 = vsel %vm585_vm8, %v1240_v8, %v5437_v41  ;;  %v1251_v14 = vrot.slane %v4308_v51, 3 }
 0x190   : > { %2035 = vrot.lane.b32.xlu0 %v4174_v39, %s3028_s3  ;;  %v1249_v52 = vsel %vm585_vm8, %v1246_v38, %v1248_v15  ;;  %v1171_v60 = vadd.f32 %v1151_v45, %v4358_v26  ;;  %v1211_v53 = vsel %vm548_vm7, %v1209_v28, %v1210_v55  ;;  %v1174_v8 = vadd.f32 %v1158_v47, %v4360_v37 }
 0x191   : > { %v4355_v50 = vpop.permute.xlu1 %1745  ;;  %v1232_v16 = vadd.f32 %v1213_v6, %v1172_v61  ;;  %v1253_v61 = vrot.slane %v4311_v23, 3  ;;  %v1274_v15 = vmul.f32 0.120078385, %v4276_v19  ;;  %v1113_v13 = vmul.f32 0.120078385, %v440_v57 }
 0x192   : > { %5435 = vst [vmem:[#allocation57_spill] sm:$0xff] %v4355_v50  ;;  %v4362_v21 = vpop.permute.xlu0 %1739  ;;  %v4391_v45 = vmul.f32 0.23388076, %v4294_v4  ;;  %v1245_v59 = vrot.slane %v4297_v12, 3  ;;  %v1156_v55 = vsel %vm487_vm6, %v1154_v36, %v1155_v1  ;;  %v1214_v51 = vrot.slane %v1184_v5, 2 }
 0x193   : > { %5436 = vst [vmem:[#allocation58_spill] sm:$0xff] %v4362_v21  ;;  %2045 = vrot.lane.b32.xlu1 %v4194_v40, %s3028_s3  ;;  %v1218_v21 = vsel %vm548_vm7, %v1215_v18, %v1217_v48  ;;  %v4399_v23 = vadd.f32 %v4282_v63, %v4301_v46  ;;  %v4403_v19 = vadd.f32 %v4306_v33, %v4315_v9  ;;  %v5440_v6 = vrot.slane %v4220_v31, 4 }
 0x194   : > { %2039 = vrot.lane.b32.xlu0 %v4182_v27, %s3028_s3  ;;  %v1265_v57 = vadd.f32 %v1242_v62, %v1229_v7  ;;  %v1268_v1 = vadd.f32 %v1249_v52, %v1232_v16  ;;  %v1301_v47 = vsel %vm638_vm9, %v1298_v24, %v1300_v10  ;;  %v1231_v48 = vadd.f32 %v1211_v53, %v1171_v60 }
 0x195   : > { %v4377_v56 = vpop.permute.xlu1 %1749  ;;  %v1294_v28 = vsel %vm638_vm9, %v1292_v3, %v5440_v6  ;;  %v1234_v36 = vadd.f32 %v1218_v21, %v1174_v8  ;;  %v1254_v63 = vsel %vm585_vm8, %v1251_v14, %v1253_v61  ;;  %v1303_v46 = vrot.slane %v4360_v37, 4 }
 0x196   : > { %5438 = vst [vmem:[#allocation59_spill] sm:$0xff] %v4377_v56  ;;  %v4383_v41 = vpop.permute.xlu0 %1743  ;;  %v1305_v33 = vrot.slane %v1274_v15, 4  ;;  %v1173_v9 = vadd.f32 %v1156_v55, %v1113_v13  ;;  %v1247_v31 = vsel %vm585_vm8, %v1245_v59, %v1246_v38  ;;  %v1297_v3 = vrot.slane %v4358_v26, 4 }
 0x197   : > { %5439 = vst [vmem:[#allocation60_spill] sm:$0xff] %v4383_v41  ;;  %2049 = vrot.lane.b32.xlu1 %v4205_v44, %s3028_s3  ;;  %v1216_v7 = vsel %vm548_vm7, %v1214_v51, %v1215_v18  ;;  %v1250_v62 = vrot.slane %v4347_v11, 3  ;;  %v4424_v21 = vmul.f32 0.23388076, %v4399_v23  ;;  %v4429_v16 = vmul.f32 0.23388076, %v4403_v19 }
 0x198   : > { %2043 = vrot.lane.b32.xlu0 %v4202_v32, %s3028_s3  ;;  %v4431_v52 = vadd.f32 %v1301_v47, %v1268_v1  ;;  %v1270_v38 = vadd.f32 %v1254_v63, %v1234_v36  ;;  %v4435_v26 = vadd.f32 %v1294_v28, %v1265_v57  ;;  %v1267_v18 = vadd.f32 %v1247_v31, %v1231_v48  ;;  %v2853_v36 = vld [vmem:[#allocation2 + $0x8] sm:$0xff] }
 0x199   : > { %v4408_v12 = vpop.permute.xlu1 %1753  ;;  %v1306_v11 = vsel %vm638_vm9, %v1303_v46, %v1305_v33  ;;  %v1233_v60 = vadd.f32 %v1216_v7, %v1173_v9  ;;  %v1299_v53 = vsel %vm638_vm9, %v1297_v3, %v1298_v24  ;;  %v1252_v8 = vsel %vm585_vm8, %v1250_v62, %v1251_v14  ;;  %v2854_v63 = vld [vmem:[#allocation3 + $0x8] sm:$0xff]  ;;  %v2855_v33 = vld [vmem:[#allocation2 + $0x10] sm:$0xf] }
 0x19a   : > { %5441 = vst [vmem:[#allocation61_spill] sm:$0xff] %v4408_v12  ;;  %v4411_v5 = vpop.permute.xlu0 %1747  ;;  %v1302_v61 = vrot.slane %v1113_v13, 4  ;;  %v4447_v59 = vmul.f32 0.23388076, %v4431_v52  ;;  %v4449_v55 = vadd.f32 %v1306_v11, %v1270_v38  ;;  %v4454_v57 = vmul.f32 0.23388076, %v4435_v26 }
 0x19b   : > { %5442 = vst [vmem:[#allocation62_spill] sm:$0xff] %v4411_v5  ;;  %2093 = vrot.lane.b32.xlu1 %v4391_v45, %s3025_s19  ;;  %v4456_v6 = vadd.f32 %v1299_v53, %v1267_v18  ;;  %v1269_v24 = vadd.f32 %v1252_v8, %v1233_v60  ;;  %v2856_v9 = vld [vmem:[#allocation3 + $0x10] sm:$0xf]  ;;  %v2124_v7 = vmul.f32 0.2920817, %v4294_v4  ;;  %v2857_v8 = vld [vmem:[#allocation2] sm:$0xff] }
 0x19c   : > { %2047 = vrot.lane.b32.xlu0 %v4239_v17, %s3028_s3  ;;  %v1304_v14 = vsel %vm638_vm9, %v1302_v61, %v1303_v46  ;;  %v4466_v28 = vmul.f32 0.23388076, %v4449_v55  ;;  %v444_v46 = vmul.f32 %v2854_v63, %v2853_v36  ;;  %v445_v31 = vmul.f32 %v2856_v9, %v2855_v33  ;;  %v2858_v61 = vld [vmem:[#allocation3] sm:$0xff] }
 0x19d   : > { %v4426_v37 = vpop.permute.xlu1 %1789  ;;  %v4471_v47 = vmul.f32 0.23388076, %v4456_v6  ;;  %v4473_v48 = vadd.f32 %v1304_v14, %v1269_v24  ;;  %v2126_v53 = vmul.f32 0.2920817, %v4403_v19  ;;  %v443_v24 = vmul.f32 %v2858_v61, %v2857_v8 }
 0x19e   : > { %5443 = vst [vmem:[#allocation63_spill] sm:$0xff] %v4426_v37  ;;  %v4433_v10 = vpop.permute.xlu0 %1751  ;;  %v4488_v18 = vmul.f32 0.23388076, %v444_v46  ;;  %v1333_v11 = vmul.f32 0.23388076, %v445_v31 }
 0x19f   : > { %5444 = vst [vmem:[#allocation64_spill] sm:$0xff] %v4433_v10  ;;  %2097 = vrot.lane.b32.xlu1 %v4429_v16, %s3025_s19  ;;  %v4485_v38 = vmul.f32 0.23388076, %v4473_v48  ;;  %v2123_v36 = vmul.f32 0.2920817, %v4399_v23 }
 0x1a0   : > { %2091 = vrot.lane.b32.xlu0 %v4424_v21, %s3025_s19  ;;  %v1356_v63 = vrot.slane %v4488_v18, 1  ;;  %v1358_v33 = vrot.slane %v1333_v11, 1  ;;  %v2128_v9 = vmul.f32 0.2920817, %v4431_v52  ;;  %v4504_v10 = vmul.f32 0.23388076, %v443_v24 }
 0x1a1   : > { %v4444_v15 = vpop.permute.xlu1 %1793  ;;  %v2125_v61 = vmul.f32 0.2920817, %v4435_v26 }
 0x1a2   : > { %5445 = vst [vmem:[#allocation65_spill] sm:$0xff] %v4444_v15  ;;  %v4451_v51 = vpop.permute.xlu0 %1787  ;;  %v1355_v41 = vrot.slane %v4504_v10, 1  ;;  %v1454_v15 = vrot.slane %v1333_v11, 3 }
 0x1a3   : > { %5446 = vst [vmem:[#allocation66_spill] sm:$0xff] %v4451_v51  ;;  %2101 = vrot.lane.b32.xlu1 %v4447_v59, %s3025_s19 }
 0x1a4   : > { %2095 = vrot.lane.b32.xlu0 %v4454_v57, %s3025_s19 }
 0x1a5   : > { %v4463_v13 = vpop.permute.xlu1 %1797 }
 0x1a6   : > { %5447 = vst [vmem:[#allocation67_spill] sm:$0xff] %v4463_v13  ;;  %v4468_v1 = vpop.permute.xlu0 %1791 }
 0x1a7   : > { %5448 = vst [vmem:[#allocation68_spill] sm:$0xff] %v4468_v1  ;;  %2105 = vrot.lane.b32.xlu1 %v4466_v28, %s3025_s19  ;;  %v2130_v1 = vmul.f32 0.2920817, %v4449_v55 }
 0x1a8   : > { %2099 = vrot.lane.b32.xlu0 %v4471_v47, %s3025_s19 }
 0x1a9   : > { %v4479_v3 = vpop.permute.xlu1 %1801 }
 0x1aa   : > { %5449 = vst [vmem:[#allocation69_spill] sm:$0xff] %v4479_v3  ;;  %v4482_v62 = vpop.permute.xlu0 %1795  ;;  %v1393_v3 = vmul.f32 0.2920817, %v445_v31 }
 0x1ab   : > { %5450 = vst [vmem:[#allocation70_spill] sm:$0xff] %v4482_v62  ;;  %2141 = vrot.lane.b32.xlu1 %v2124_v7, %s3026_s28  ;;  %v1392_v62 = vmul.f32 0.2920817, %v444_v46 }
 0x1ac   : > { %2103 = vrot.lane.b32.xlu0 %v4485_v38, %s3025_s19  ;;  %v1418_v12 = vrot.slane %v1393_v3, 2  ;;  %v2129_v3 = vmul.f32 0.2920817, %v4473_v48 }
 0x1ad   : > { %v4492_v60 = vpop.permute.xlu1 %1821  ;;  %v1416_v5 = vrot.slane %v1392_v62, 2  ;;  %v1452_v62 = vrot.slane %v4488_v18, 3 }
 0x1ae   : > { %5451 = vst [vmem:[#allocation71_spill] sm:$0xff] %v4492_v60  ;;  %v4495_v14 = vpop.permute.xlu0 %1799  ;;  %v1487_v60 = vmul.f32 0.120078385, %v445_v31 }
 0x1af   : > { %5452 = vst [vmem:[#allocation72_spill] sm:$0xff] %v4495_v14  ;;  %2145 = vrot.lane.b32.xlu1 %v2126_v53, %s3026_s28  ;;  %v1359_v53 = vsel %vm487_vm6, %v1356_v63, %v1358_v33  ;;  %v4512_v14 = vmul.f32 0.120078385, %v444_v46  ;;  %v2860_v33 = vld [vmem:[#allocation3 + $0x20] sm:$0xff]  ;;  %v2862_v46 = vld [vmem:[#allocation3 + $0x28] sm:$0xf] }
 0x1b0   : > { %2139 = vrot.lane.b32.xlu0 %v2123_v36, %s3026_s28 }
 0x1b1   : > { %v4502_v7 = vpop.permute.xlu1 %1825  ;;  %v1504_v31 = vrot.slane %v4512_v14, 4 }
 0x1b2   : > { %5453 = vst [vmem:[#allocation73_spill] sm:$0xff] %v4502_v7  ;;  %v4506_v8 = vpop.permute.xlu0 %1819  ;;  %v2859_v7 = vld [vmem:[#allocation2 + $0x20] sm:$0xff] }
 0x1b3   : > { %5454 = vst [vmem:[#allocation74_spill] sm:$0xff] %v4506_v8  ;;  %2149 = vrot.lane.b32.xlu1 %v2128_v9, %s3026_s28  ;;  %v2127_v8 = vmul.f32 0.2920817, %v4456_v6  ;;  %v1384_v9 = vadd.f32 %v1359_v53, %v4512_v14  ;;  %v447_v51 = vmul.f32 %v2860_v33, %v2859_v7  ;;  %v1419_v53 = vsel %vm548_vm7, %v1416_v5, %v1418_v12 }
 0x1b4   : > { %2143 = vrot.lane.b32.xlu0 %v2125_v61, %s3026_s28  ;;  %v2861_v61 = vld [vmem:[#allocation2 + $0x28] sm:$0xf]  ;;  %v1357_v7 = vsel %vm487_vm6, %v1355_v41, %v1356_v63  ;;  %v1455_v41 = vsel %vm585_vm8, %v1452_v62, %v1454_v15  ;;  %v1506_v63 = vrot.slane %v1487_v60, 4  ;;  %v1451_v60 = vrot.slane %v4504_v10, 3 }
 0x1b5   : > { %v4514_v36 = vpop.permute.xlu1 %1829  ;;  %v4522_v56 = vmul.f32 %v2862_v46, %v2861_v61  ;;  %v1444_v61 = vadd.f32 %v1419_v53, %v1384_v9  ;;  %v1323_v46 = vmul.f32 0.120078385, %v443_v24  ;;  %v4549_v9 = vmul.f32 0.120078385, %v4294_v4 }
 0x1b6   : > { %5455 = vst [vmem:[#allocation75_spill] sm:$0xff] %v4514_v36  ;;  %v4518_v13 = vpop.permute.xlu0 %1823  ;;  %v1391_v36 = vmul.f32 0.2920817, %v443_v24  ;;  %v4560_v14 = vmul.f32 0.2920817, %v447_v51 }
 0x1b7   : > { %5456 = vst [vmem:[#allocation76_spill] sm:$0xff] %v4518_v13  ;;  %2153 = vrot.lane.b32.xlu1 %v2130_v1, %s3026_s28  ;;  %v4534_v1 = vmul.f32 0.23388076, %v447_v51  ;;  %v1383_v12 = vadd.f32 %v1357_v7, %v1323_v46  ;;  %5461 = vst [vmem:[#allocation81_spill] sm:$0xff] %v4549_v9  ;;  %v1480_v53 = vadd.f32 %v1455_v41, %v1444_v61  ;;  %v2863_v7 = vld [vmem:[#allocation2 + $0x38] sm:$0xff] }
 0x1b8   : > { %2147 = vrot.lane.b32.xlu0 %v2127_v8, %s3026_s28  ;;  %v4537_v8 = vmul.f32 0.23388076, %v4522_v56  ;;  %v1415_v18 = vrot.slane %v1391_v36, 2  ;;  %v4556_v36 = vmul.f32 0.120078385, %v4399_v23  ;;  %v2864_v61 = vld [vmem:[#allocation3 + $0x38] sm:$0xff] }
 0x1b9   : > { %v4528_v13 = vpop.permute.xlu1 %1833  ;;  %v4565_v41 = vmul.f32 %v2864_v61, %v2863_v7  ;;  %v4575_v10 = vmul.f32 0.120078385, %v4435_v26  ;;  %v4581_v7 = vmul.f32 0.120078385, %v4431_v52  ;;  %v1503_v61 = vrot.slane %v1323_v46, 4 }
 0x1ba   : > { %5457 = vst [vmem:[#allocation77_spill] sm:$0xff] %v4528_v13  ;;  %v4532_v33 = vpop.permute.xlu0 %1827  ;;  %5462 = vst [vmem:[#allocation82_spill] sm:$0xff] %v4556_v36  ;;  %v1417_v15 = vsel %vm548_vm7, %v1415_v18, %v1416_v5  ;;  %v4572_v5 = vmul.f32 0.120078385, %v4403_v19  ;;  %v2867_v18 = vld [vmem:[#allocation2 + $0x18] sm:$0xff]  ;;  %v5474_v50 = vrot.slane %v4534_v1, 3 }
 0x1bb   : > { %5458 = vst [vmem:[#allocation78_spill] sm:$0xff] %v4532_v33  ;;  %2173 = vrot.lane.b32.xlu1 %v4391_v45, %s3027_s29  ;;  %v1363_v45 = vrot.slane %v4537_v8, 1  ;;  %v1443_v4 = vadd.f32 %v1417_v15, %v1383_v12  ;;  %v2866_v33 = vld [vmem:[#allocation3 + $0x40] sm:$0xf]  ;;  %5465 = vst [vmem:[#allocation85_spill] sm:$0xff] %v4575_v10  ;;  %v2868_v12 = vld [vmem:[#allocation3 + $0x18] sm:$0xff] }
 0x1bc   : > { %2151 = vrot.lane.b32.xlu0 %v2129_v3, %s3026_s28  ;;  %v1396_v3 = vmul.f32 0.2920817, %v4522_v56  ;;  %5464 = vst [vmem:[#allocation84_spill] sm:$0xff] %v4572_v5  ;;  %v446_v15 = vmul.f32 %v2868_v12, %v2867_v18  ;;  %5467 = vst [vmem:[#allocation87_spill] sm:$0xff] %v4581_v7  ;;  %v4591_v26 = vmul.f32 0.120078385, %v4456_v6 }
 0x1bd   : > { %v4542_v11 = vpop.permute.xlu1 %1861  ;;  %v4594_v18 = vmul.f32 0.120078385, %v447_v51  ;;  %v4608_v6 = vmul.f32 0.120078385, %v4449_v55  ;;  %v4611_v51 = vmul.f32 0.120078385, %v4473_v48 }
 0x1be   : > { %5459 = vst [vmem:[#allocation79_spill] sm:$0xff] %v4542_v11  ;;  %v4546_v24 = vpop.permute.xlu0 %1831  ;;  %v2869_v12 = vld [vmem:[#allocation2 + $0x50] sm:$0xff]  ;;  %v2871_v55 = vld [vmem:[#allocation2 + $0x58] sm:$0xf]  ;;  %v2875_v48 = vld [vmem:[#allocation2 + $0x48] sm:$0xff]  ;;  %v5475_v25 = vrot.slane %v4534_v1, 1 }
 0x1bf   : > { %5460 = vst [vmem:[#allocation80_spill] sm:$0xff] %v4546_v24  ;;  %2177 = vrot.lane.b32.xlu1 %v4429_v16, %s3027_s29  ;;  %v2865_v16 = vld [vmem:[#allocation2 + $0x40] sm:$0xf]  ;;  %v2872_v52 = vld [vmem:[#allocation3 + $0x58] sm:$0xf] }
 0x1c0   : > { %2171 = vrot.lane.b32.xlu0 %v4424_v21, %s3027_s29  ;;  %v4567_v23 = vmul.f32 %v2866_v33, %v2865_v16  ;;  %v1507_v21 = vsel %vm638_vm9, %v1504_v31, %v1506_v63  ;;  %v5468_v16 = vrot.slane %v4534_v1, 1  ;;  %v1453_v63 = vsel %vm585_vm8, %v1451_v60, %v1452_v62 }
 0x1c1   : > { %v4569_v24 = vpop.permute.xlu1 %1865  ;;  %v4583_v33 = vadd.f32 %v1507_v21, %v1480_v53  ;;  %v1479_v46 = vadd.f32 %v1453_v63, %v1443_v4  ;;  %v1423_v53 = vrot.slane %v1396_v3, 2  ;;  %v4600_v21 = vmul.f32 0.23388076, %v4565_v41 }
 0x1c2   : > { %5463 = vst [vmem:[#allocation83_spill] sm:$0xff] %v4569_v24  ;;  %v4578_v13 = vpop.permute.xlu0 %1859  ;;  %v1364_v19 = vsel %vm487_vm6, %v5468_v16, %v1363_v45  ;;  %v4603_v45 = vmul.f32 0.23388076, %v4567_v23  ;;  %v4614_v60 = vmul.f32 0.23388076, %v446_v15  ;;  %v1505_v3 = vsel %vm638_vm9, %v1503_v61, %v1504_v31  ;;  %v2870_v16 = vld [vmem:[#allocation3 + $0x50] sm:$0xff] }
 0x1c3   : > { %5466 = vst [vmem:[#allocation86_spill] sm:$0xff] %v4578_v13  ;;  %2181 = vrot.lane.b32.xlu1 %v4447_v59, %s3027_s29  ;;  %v1386_v62 = vadd.f32 %v1364_v19, %v4594_v18  ;;  %v4619_v4 = vmul.f32 0.23388076, %v4583_v33  ;;  %v4622_v63 = vmul.f32 %v2870_v16, %v2869_v12  ;;  %v1459_v19 = vrot.slane %v4537_v8, 3  ;;  %v2873_v13 = vld [vmem:[#allocation2 + $0x30] sm:$0xff] }
 0x1c4   : > { %2175 = vrot.lane.b32.xlu0 %v4454_v57, %s3027_s29  ;;  %v2874_v24 = vld [vmem:[#allocation3 + $0x30] sm:$0xff]  ;;  %v4635_v61 = vadd.f32 %v1505_v3, %v1479_v46  ;;  %v1368_v16 = vrot.slane %v4603_v45, 1  ;;  %v1399_v46 = vmul.f32 0.2920817, %v4567_v23 }
 0x1c5   : > { %v4605_v59 = vpop.permute.xlu1 %1869  ;;  %v4631_v31 = vmul.f32 %v2874_v24, %v2873_v13  ;;  %v1360_v13 = vrot.slane %v4614_v60, 1  ;;  %v4648_v24 = vmul.f32 0.2920817, %v4565_v41  ;;  %v1460_v37 = vsel %vm585_vm8, %v5474_v50, %v1459_v19 }
 0x1c6   : > { %5469 = vst [vmem:[#allocation88_spill] sm:$0xff] %v4605_v59  ;;  %v4616_v57 = vpop.permute.xlu0 %1863  ;;  %v4624_v59 = vmul.f32 %v2872_v52, %v2871_v55  ;;  %v5471_v52 = vrot.slane %v4560_v14, 2  ;;  %v4644_v55 = vmul.f32 0.120078385, %v446_v15  ;;  %v4670_v11 = vmul.f32 0.23388076, %v4635_v61 }
 0x1c7   : > { %5470 = vst [vmem:[#allocation89_spill] sm:$0xff] %v4616_v57  ;;  %2185 = vrot.lane.b32.xlu1 %v4466_v28, %s3027_s29  ;;  %v1488_v57 = vmul.f32 0.120078385, %v4522_v56  ;;  %v1366_v28 = vrot.slane %v4600_v21, 1  ;;  %v1426_v2 = vrot.slane %v4648_v24, 2  ;;  %v1428_v50 = vrot.slane %v1399_v46, 2 }
 0x1c8   : > { %2179 = vrot.lane.b32.xlu0 %v4471_v47, %s3027_s29  ;;  %v1424_v12 = vsel %vm548_vm7, %v5471_v52, %v1423_v53  ;;  %v4654_v53 = vmul.f32 0.23388076, %v4622_v63  ;;  %v4657_v3 = vmul.f32 0.23388076, %v4624_v59  ;;  %v1456_v24 = vrot.slane %v4614_v60, 3 }
 0x1c9   : > { %v4642_v8 = vpop.permute.xlu1 %1873  ;;  %v1446_v56 = vadd.f32 %v1424_v12, %v1386_v62  ;;  %v1511_v52 = vrot.slane %v1488_v57, 4  ;;  %v4663_v12 = vmul.f32 0.23388076, %v4631_v31  ;;  %v1369_v57 = vsel %vm487_vm6, %v1366_v28, %v1368_v16 }
 0x1ca   : > { %5472 = vst [vmem:[#allocation90_spill] sm:$0xff] %v4642_v8  ;;  %v4650_v47 = vpop.permute.xlu0 %1867  ;;  %v2876_v8 = vld [vmem:[#allocation3 + $0x48] sm:$0xff]  ;;  %v1373_v19 = vrot.slane %v4657_v3, 1  ;;  %v4704_v46 = vmul.f32 0.2920817, %v4622_v63  ;;  %v1462_v60 = vrot.slane %v4600_v21, 3 }
 0x1cb   : > { %5473 = vst [vmem:[#allocation91_spill] sm:$0xff] %v4650_v47  ;;  %2213 = vrot.lane.b32.xlu1 %v4549_v9, %s3028_s3  ;;  %v4665_v47 = vmul.f32 %v2876_v8, %v2875_v48  ;;  %v1394_v9 = vmul.f32 0.2920817, %v446_v15  ;;  %v1482_v29 = vadd.f32 %v1460_v37, %v1446_v56  ;;  %v1362_v48 = vsel %vm487_vm6, %v1360_v13, %v5475_v25 }
 0x1cc   : > { %2183 = vrot.lane.b32.xlu0 %v4485_v38, %s3027_s29  ;;  %v4683_v38 = vmul.f32 0.120078385, %v4565_v41  ;;  %v1371_v15 = vrot.slane %v4654_v53, 1  ;;  %v5477_v37 = vrot.slane %v4594_v18, 4  ;;  %v1365_v41 = vrot.slane %v4663_v12, 1 }
 0x1cd   : > { %v4676_v62 = vpop.permute.xlu1 %1917  ;;  %v4698_v56 = vmul.f32 0.23388076, %v4665_v47  ;;  %v1420_v13 = vrot.slane %v1394_v9, 2  ;;  %v1402_v8 = vmul.f32 0.2920817, %v4624_v59  ;;  %v1429_v9 = vsel %vm548_vm7, %v1426_v2, %v1428_v50 }
 0x1ce   : > { %v4685_v35 = vpop.permute.xlu0 %1871  ;;  %v1512_v25 = vsel %vm638_vm9, %v5477_v37, %v1511_v52  ;;  %v1388_v16 = vadd.f32 %v1369_v57, %v4683_v38  ;;  %v1385_v57 = vadd.f32 %v1362_v48, %v4644_v55  ;;  %v1489_v37 = vmul.f32 0.120078385, %v4567_v23 }
 0x1cf   : > { %5476 = vst [vmem:[#allocation92_spill] sm:$0xff] %v4685_v35  ;;  %2217 = vrot.lane.b32.xlu1 %v4572_v5, %s3028_s3  ;;  %v4709_v52 = vadd.f32 %v1512_v25, %v1482_v29  ;;  %v1397_v5 = vmul.f32 0.2920817, %v4631_v31  ;;  %v1374_v42 = vsel %vm487_vm6, %v1371_v15, %v1373_v19  ;;  %v1367_v48 = vsel %vm487_vm6, %v1365_v41, %v1366_v28 }
 0x1d0   : > { %2211 = vrot.lane.b32.xlu0 %v4556_v36, %s3028_s3  ;;  %v1464_v36 = vrot.slane %v4603_v45, 3  ;;  %v1448_v29 = vadd.f32 %v1429_v9, %v1388_v16  ;;  %v4724_v23 = vmul.f32 0.120078385, %v4622_v63  ;;  %v1370_v25 = vrot.slane %v4698_v56, 1 }
 0x1d1   : > { %v4707_v35 = vpop.permute.xlu1 %1921  ;;  %v5478_v21 = vrot.slane %v4560_v14, 2  ;;  %v1327_v50 = vmul.f32 0.120078385, %v4631_v31  ;;  %v1431_v19 = vrot.slane %v4704_v46, 2  ;;  %v1425_v41 = vrot.slane %v1397_v5, 2 }
 0x1d2   : > { %v4714_v20 = vpop.permute.xlu0 %1915  ;;  %v1390_v63 = vadd.f32 %v1374_v42, %v4724_v23  ;;  %v1400_v9 = vmul.f32 0.2920817, %v4665_v47  ;;  %v1514_v14 = vrot.slane %v4683_v38, 4  ;;  %v5479_v31 = vrot.slane %v4534_v1, 3 }
 0x1d3   : > { %2221 = vrot.lane.b32.xlu1 %v4581_v7, %s3028_s3  ;;  %v1422_v45 = vsel %vm548_vm7, %v1420_v13, %v5478_v21  ;;  %v1433_v7 = vrot.slane %v1402_v8, 2  ;;  %v1516_v13 = vrot.slane %v1489_v37, 4  ;;  %v1387_v21 = vadd.f32 %v1367_v48, %v1327_v50 }
 0x1d4   : > { %2215 = vrot.lane.b32.xlu0 %v4575_v10, %s3028_s3  ;;  %v1445_v28 = vadd.f32 %v1422_v45, %v1385_v57  ;;  %v1465_v10 = vsel %vm585_vm8, %v1462_v60, %v1464_v36  ;;  %v1458_v8 = vsel %vm585_vm8, %v1456_v24, %v5479_v31  ;;  %v1467_v42 = vrot.slane %v4654_v53, 3 }
 0x1d5   : > { %v4734_v16 = vpop.permute.xlu1 %1925  ;;  %v1484_v5 = vadd.f32 %v1465_v10, %v1448_v29  ;;  %v1372_v46 = vsel %vm487_vm6, %v1370_v25, %v1371_v15  ;;  %v1434_v36 = vsel %vm548_vm7, %v1431_v19, %v1433_v7  ;;  %v1469_v38 = vrot.slane %v4657_v3, 3 }
 0x1d6   : > { %v4738_v30 = vpop.permute.xlu0 %1919  ;;  %v1490_v57 = vmul.f32 0.120078385, %v4624_v59  ;;  %v1329_v37 = vmul.f32 0.120078385, %v4665_v47  ;;  %v1427_v1 = vsel %vm548_vm7, %v1425_v41, %v1426_v2  ;;  %v1461_v10 = vrot.slane %v4663_v12, 3 }
 0x1d7   : > { %2225 = vrot.lane.b32.xlu1 %v4608_v6, %s3028_s3  ;;  %v1450_v24 = vadd.f32 %v1434_v36, %v1390_v63  ;;  %v1430_v53 = vrot.slane %v1400_v9, 2  ;;  %v1481_v15 = vadd.f32 %v1458_v8, %v1445_v28  ;;  %v1517_v25 = vsel %vm638_vm9, %v1514_v14, %v1516_v13 }
 0x1d8   : > { %2219 = vrot.lane.b32.xlu0 %v4591_v26, %s3028_s3  ;;  %v1447_v45 = vadd.f32 %v1427_v1, %v1387_v21  ;;  %v1389_v31 = vadd.f32 %v1372_v46, %v1329_v37  ;;  %v4761_v7 = vmul.f32 0.23388076, %v4709_v52  ;;  %v5480_v59 = vrot.slane %v4594_v18, 4 }
 0x1d9   : > { %v1930_v48 = vpop.permute.xlu1 %1929  ;;  %v5481_v2 = vrot.slane %v4644_v55, 4  ;;  %v4768_v3 = vadd.f32 %v1517_v25, %v1484_v5  ;;  %v1513_v12 = vrot.slane %v1327_v50, 4  ;;  %v1940_v28 = vadd.f32 %v4676_v62, %v4171_v58 }
 0x1da   : > { %v1924_v29 = vpop.permute.xlu0 %1923  ;;  %v1470_v41 = vsel %vm585_vm8, %v1467_v42, %v1469_v38  ;;  %v1519_v63 = vrot.slane %v4724_v23, 4  ;;  %v1521_v9 = vrot.slane %v1490_v57, 4  ;;  %v1463_v18 = vsel %vm585_vm8, %v1461_v10, %v1462_v60 }
 0x1db   : > { %2269 = vrot.lane.b32.xlu1 %v4619_v4, %s3025_s19  ;;  %v1510_v47 = vsel %vm638_vm9, %v5481_v2, %v5480_v59  ;;  %v1486_v55 = vadd.f32 %v1470_v41, %v1450_v24  ;;  %v1432_v21 = vsel %vm548_vm7, %v1430_v53, %v1431_v19  ;;  %v1466_v8 = vrot.slane %v4698_v56, 3 }
 0x1dc   : > { %2223 = vrot.lane.b32.xlu0 %v4611_v51, %s3028_s3  ;;  %v4779_v46 = vadd.f32 %v1510_v47, %v1481_v15  ;;  %v1483_v58 = vadd.f32 %v1463_v18, %v1447_v45  ;;  %v1449_v62 = vadd.f32 %v1432_v21, %v1389_v31  ;;  %v1942_v23 = vadd.f32 %v4707_v35, %v4177_v22 }
 0x1dd   : > { %v1966_v13 = vpop.permute.xlu1 %1965  ;;  %v4788_v60 = vmul.f32 0.23388076, %v4768_v3  ;;  %v1515_v56 = vsel %vm638_vm9, %v1513_v12, %v1514_v14  ;;  %v1522_v19 = vsel %vm638_vm9, %v1519_v63, %v1521_v9  ;;  %v1939_v36 = vadd.f32 %v4714_v20, %v4174_v39 }
 0x1de   : > { %v1928_v50 = vpop.permute.xlu0 %1927  ;;  %v1988_v5 = vadd.f32 %v1966_v13, %v1940_v28  ;;  %v4794_v57 = vadd.f32 %v1522_v19, %v1486_v55  ;;  %v1468_v1 = vsel %vm585_vm8, %v1466_v8, %v1467_v42  ;;  %v1518_v10 = vrot.slane %v1329_v37, 4 }
 0x1df   : > { %2273 = vrot.lane.b32.xlu1 %v4761_v7, %s3025_s19  ;;  %v4798_v35 = vmul.f32 0.23388076, %v4779_v46  ;;  %v4800_v53 = vadd.f32 %v1515_v56, %v1483_v58  ;;  %v1485_v15 = vadd.f32 %v1468_v1, %v1449_v62  ;;  %v1944_v39 = vadd.f32 %v4734_v16, %v4194_v40 }
 0x1e0   : > { %2267 = vrot.lane.b32.xlu0 %v4670_v11, %s3025_s19  ;;  %v1941_v20 = vadd.f32 %v4738_v30, %v4182_v27  ;;  %v4811_v37 = vmul.f32 0.23388076, %v4794_v57  ;;  %v1520_v25 = vsel %vm638_vm9, %v1518_v10, %v1519_v63  ;;  %v1946_v16 = vadd.f32 %v1930_v48, %v4205_v44 }
 0x1e1   : > { %v1970_v38 = vpop.permute.xlu1 %1969  ;;  %v4815_v31 = vmul.f32 0.23388076, %v4800_v53  ;;  %v4817_v2 = vadd.f32 %v1520_v25, %v1485_v15  ;;  %v1943_v30 = vadd.f32 %v1924_v29, %v4202_v32  ;;  %v2300_v47 = vmul.f32 0.2920817, %v4583_v33 }
 0x1e2   : > { %v1964_v22 = vpop.permute.xlu0 %1963  ;;  %v1990_v24 = vadd.f32 %v1970_v38, %v1942_v23  ;;  %v1945_v44 = vadd.f32 %v1928_v50, %v4239_v17  ;;  %v2302_v9 = vmul.f32 0.2920817, %v4709_v52  ;;  %v2299_v29 = vmul.f32 0.2920817, %v4635_v61  ;;  %v5482_v50 = vld [vmem:[#allocation14_spill] sm:$0xff] }
 0x1e3   : > { %v1987_v14 = vadd.f32 %v1964_v22, %v1939_v36  ;;  %2277 = vrot.lane.b32.xlu1 %v4788_v60, %s3025_s19  ;;  %v4827_v28 = vmul.f32 0.23388076, %v4817_v2  ;;  %v2304_v21 = vmul.f32 0.2920817, %v4768_v3  ;;  %v2301_v58 = vmul.f32 0.2920817, %v4779_v46 }
 0x1e4   : > { %2271 = vrot.lane.b32.xlu0 %v4798_v35, %s3025_s19  ;;  %v1588_v23 = vadd.f32 %v3920_v54, %v5482_v50  ;;  %v2306_v56 = vmul.f32 0.2920817, %v4794_v57  ;;  %v2303_v38 = vmul.f32 0.2920817, %v4800_v53  ;;  %v5483_v22 = vld [vmem:[#allocation18_spill] sm:$0xff]  ;;  %v5484_v54 = vld [vmem:[#allocation17_spill] sm:$0xff] }
 0x1e5   : > { %v1974_v42 = vpop.permute.xlu1 %1973 }
 0x1e6   : > { %v1968_v45 = vpop.permute.xlu0 %1967  ;;  %v1992_v59 = vadd.f32 %v1974_v42, %v1944_v39  ;;  %v1636_v19 = vadd.f32 %v4053_v34, %v1588_v23  ;;  %v5486_v42 = vld [vmem:[#allocation49_spill] sm:$0xff]  ;;  %v5496_v23 = vld [vmem:[#allocation42_spill] sm:$0xff] }
 0x1e7   : > { %v1989_v40 = vadd.f32 %v1968_v45, %v1941_v20  ;;  %2281 = vrot.lane.b32.xlu1 %v4811_v37, %s3025_s19  ;;  %v5485_v20 = vld [vmem:[#allocation39_spill] sm:$0xff] }
 0x1e8   : > { %2275 = vrot.lane.b32.xlu0 %v4815_v31, %s3025_s19  ;;  %v1668_v15 = vadd.f32 %v4121_v43, %v1636_v19  ;;  %v5488_v43 = vld [vmem:[#allocation20_spill] sm:$0xff] }
 0x1e9   : > { %v1978_v27 = vpop.permute.xlu1 %1977 }
 0x1ea   : > { %v1972_v12 = vpop.permute.xlu0 %1971  ;;  %v1994_v41 = vadd.f32 %v1978_v27, %v1946_v16  ;;  %v4855_v25 = vadd.f32 %v5486_v42, %v1668_v15  ;;  %v5487_v16 = vld [vmem:[#allocation40_spill] sm:$0xff]  ;;  %v5489_v27 = vld [vmem:[#allocation35_spill] sm:$0xff]  ;;  %v5499_v15 = vld [vmem:[#allocation21_spill] sm:$0xff] }
 0x1eb   : > { %v1991_v63 = vadd.f32 %v1972_v12, %v1943_v30  ;;  %2317 = vrot.lane.b32.xlu1 %v2300_v47, %s3026_s28  ;;  %v1592_v47 = vadd.f32 %v5489_v27, %v5488_v43 }
 0x1ec   : > { %2279 = vrot.lane.b32.xlu0 %v4827_v28, %s3025_s19 }
 0x1ed   : > { %v1998_v48 = vpop.permute.xlu1 %1997 }
 0x1ee   : > { %v1976_v32 = vpop.permute.xlu0 %1975  ;;  %v2020_v13 = vadd.f32 %v1998_v48, %v1988_v5  ;;  %v5492_v48 = vld [vmem:[#allocation34_spill] sm:$0xff] }
 0x1ef   : > { %v1993_v18 = vadd.f32 %v1976_v32, %v1945_v44  ;;  %2321 = vrot.lane.b32.xlu1 %v2302_v9, %s3026_s28  ;;  %v5491_v44 = vld [vmem:[#allocation19_spill] sm:$0xff] }
 0x1f0   : > { %2315 = vrot.lane.b32.xlu0 %v2299_v29, %s3026_s28  ;;  %v1589_v9 = vadd.f32 %v5492_v48, %v5491_v44  ;;  %v5493_v32 = vld [vmem:[#allocation47_spill] sm:$0xff] }
 0x1f1   : > { %v2002_v55 = vpop.permute.xlu1 %2001 }
 0x1f2   : > { %v1996_v8 = vpop.permute.xlu0 %1995  ;;  %v2022_v62 = vadd.f32 %v2002_v55, %v1990_v24  ;;  %v1590_v24 = vadd.f32 %v3968_v0, %v5483_v22 }
 0x1f3   : > { %v2019_v17 = vadd.f32 %v1996_v8, %v1987_v14  ;;  %2325 = vrot.lane.b32.xlu1 %v2304_v21, %s3026_s28  ;;  %v1587_v14 = vadd.f32 %v3959_v49, %v5484_v54  ;;  %v5490_v49 = vld [vmem:[#allocation46_spill] sm:$0xff] }
 0x1f4   : > { %2319 = vrot.lane.b32.xlu0 %v2301_v58, %s3026_s28  ;;  %v1638_v34 = vadd.f32 %v5485_v20, %v1590_v24 }
 0x1f5   : > { %v2006_v5 = vpop.permute.xlu1 %2005  ;;  %v1635_v30 = vadd.f32 %v5487_v16, %v1587_v14  ;;  %v5501_v14 = vld [vmem:[#allocation15_spill] sm:$0xff] }
 0x1f6   : > { %v2000_v36 = vpop.permute.xlu0 %1999  ;;  %v2024_v1 = vadd.f32 %v2006_v5, %v1992_v59  ;;  %v2305_v59 = vmul.f32 0.2920817, %v4817_v2  ;;  %v1670_v12 = vadd.f32 %v5490_v49, %v1638_v34  ;;  %v1637_v5 = vadd.f32 %v5496_v23, %v1589_v9  ;;  %v5502_v34 = vld [vmem:[#allocation51_spill] sm:$0xff] }
 0x1f7   : > { %v2021_v10 = vadd.f32 %v2000_v36, %v1989_v40  ;;  %2329 = vrot.lane.b32.xlu1 %v2306_v56, %s3026_s28  ;;  %v1667_v29 = vadd.f32 %v5493_v32, %v1635_v30  ;;  %v5497_v56 = vld [vmem:[#allocation25_spill] sm:$0xff]  ;;  %v5504_v30 = vld [vmem:[#allocation52_spill] sm:$0xff]  ;;  %v4961_v23 = vmul.f32 0.120078385, %v4709_v52  ;;  %v4976_v52 = vmul.f32 0.120078385, %v4779_v46 }
 0x1f8   : > { %2323 = vrot.lane.b32.xlu0 %v2303_v38, %s3026_s28  ;;  %v5498_v38 = vld [vmem:[#allocation13_spill] sm:$0xff] }
 0x1f9   : > { %v2010_v39 = vpop.permute.xlu1 %2009  ;;  %v4880_v19 = vadd.f32 %v5497_v56, %v1667_v29  ;;  %5507 = vst [vmem:[#allocation14_spill] sm:$0xff] %v4976_v52 }
 0x1fa   : > { %v2004_v45 = vpop.permute.xlu0 %2003  ;;  %v2026_v40 = vadd.f32 %v2010_v39, %v1994_v41  ;;  %v5494_v41 = vld [vmem:[#allocation41_spill] sm:$0xff]  ;;  %v1669_v39 = vadd.f32 %v5501_v14, %v1637_v5  ;;  %v4964_v5 = vmul.f32 0.120078385, %v4635_v61 }
 0x1fb   : > { %v2023_v0 = vadd.f32 %v2004_v45, %v1991_v63  ;;  %2349 = vrot.lane.b32.xlu1 %v4619_v4, %s3027_s29  ;;  %v1640_v21 = vadd.f32 %v5494_v41, %v1592_v47  ;;  %v4871_v63 = vmul.f32 %v4855_v25, %v4855_v25  ;;  %v5495_v4 = vld [vmem:[#allocation24_spill] sm:$0xff]  ;;  %v4904_v16 = vmul.f32 %v4880_v19, %v4880_v19 }
 0x1fc   : > { %2327 = vrot.lane.b32.xlu0 %v2305_v59, %s3026_s28  ;;  %v4874_v8 = vadd.f32 %v5495_v4, %v1670_v12  ;;  %v4907_v43 = vadd.f32 %v5504_v30, %v1669_v39  ;;  %v5505_v47 = vld [vmem:[#allocation48_spill] sm:$0xff] }
 0x1fd   : > { %v2038_v55 = vpop.permute.xlu1 %2037  ;;  %v1672_v22 = vadd.f32 %v5498_v38, %v1640_v21  ;;  %v4944_v21 = vmul.f32 0.120078385, %v4583_v33 }
 0x1fe   : > { %v2008_v58 = vpop.permute.xlu0 %2007  ;;  %v4876_v50 = vadd.f32 %v2038_v55, %v2020_v13  ;;  %v5500_v13 = vld [vmem:[#allocation36_spill] sm:$0xff] }
 0x1ff   : > { %v2025_v36 = vadd.f32 %v2008_v58, %v1993_v18  ;;  %2353 = vrot.lane.b32.xlu1 %v4761_v7, %s3027_s29  ;;  %v1591_v54 = vadd.f32 %v5500_v13, %v5499_v15  ;;  %v4894_v18 = vmul.f32 %v4874_v8, %v4874_v8  ;;  %v4897_v7 = vadd.f32 %v5502_v34, %v1672_v22 }
 0x200   : > { %2347 = vrot.lane.b32.xlu0 %v4670_v11, %s3027_s29  ;;  %v5503_v11 = vld [vmem:[#allocation44_spill] sm:$0xff]  ;;  %v4986_v15 = vmul.f32 0.120078385, %v4800_v53  ;;  %v4993_v13 = vmul.f32 0.120078385, %v4817_v2  ;;  %v5515_v2 = vld [vmem:[#allocation85_spill] sm:$0xff] }
 0x201   : > { %v2042_v20 = vpop.permute.xlu1 %2041  ;;  %v1639_v59 = vadd.f32 %v5503_v11, %v1591_v54  ;;  %v4922_v48 = vmul.f32 %v4897_v7, %v4897_v7  ;;  %v5511_v54 = vld [vmem:[#allocation81_spill] sm:$0xff] }
 0x202   : > { %v2036_v42 = vpop.permute.xlu0 %2035  ;;  %v4899_v45 = vadd.f32 %v2042_v20, %v2022_v62  ;;  %5509 = vst [vmem:[#allocation17_spill] sm:$0xff] %v4986_v15  ;;  %5510 = vst [vmem:[#allocation39_spill] sm:$0xff] %v4993_v13  ;;  %v5512_v20 = vld [vmem:[#allocation84_spill] sm:$0xff] }
 0x203   : > { %v4909_v27 = vadd.f32 %v2036_v42, %v2019_v17  ;;  %2357 = vrot.lane.b32.xlu1 %v4788_v60, %s3027_s29  ;;  %v1671_v49 = vadd.f32 %v5505_v47, %v1639_v59  ;;  %v4928_v60 = vmul.f32 %v4907_v43, %v4907_v43  ;;  %v5513_v42 = vld [vmem:[#allocation82_spill] sm:$0xff]  ;;  %v5551_v62 = vld [vmem:[#allocation64_spill] sm:$0xff] }
 0x204   : > { %2351 = vrot.lane.b32.xlu0 %v4798_v35, %s3027_s29  ;;  %v5506_v35 = vld [vmem:[#allocation54_spill] sm:$0xff] }
 0x205   : > { %v2046_v44 = vpop.permute.xlu1 %2045  ;;  %v4931_v32 = vadd.f32 %v5506_v35, %v1671_v49 }
 0x206   : > { %v2040_v17 = vpop.permute.xlu0 %2039  ;;  %v4924_v9 = vadd.f32 %v2046_v44, %v2024_v1  ;;  %v5514_v44 = vld [vmem:[#allocation87_spill] sm:$0xff]  ;;  %v5535_v1 = vld [vmem:[#allocation16_spill] sm:$0xff] }
 0x207   : > { %v4933_v29 = vadd.f32 %v2040_v17, %v2021_v10  ;;  %2361 = vrot.lane.b32.xlu1 %v4811_v37, %s3027_s29  ;;  %v4950_v10 = vmul.f32 %v4931_v32, %v4931_v32 }
 0x208   : > { %2355 = vrot.lane.b32.xlu0 %v4815_v31, %s3027_s29  ;;  %v5533_v31 = vld [vmem:[#allocation38_spill] sm:$0xff] }
 0x209   : > { %v2050_v41 = vpop.permute.xlu1 %2049 }
 0x20a   : > { %v2044_v4 = vpop.permute.xlu0 %2043  ;;  %v4946_v58 = vadd.f32 %v2050_v41, %v2026_v40 }
 0x20b   : > { %v4952_v37 = vadd.f32 %v2044_v4, %v2023_v0  ;;  %2389 = vrot.lane.b32.xlu1 %v4944_v21, %s3028_s3  ;;  %v4973_v0 = vmul.f32 0.120078385, %v4768_v3 }
 0x20c   : > { %2359 = vrot.lane.b32.xlu0 %v4827_v28, %s3027_s29 }
 0x20d   : > { %v2094_v33 = vpop.permute.xlu1 %2093 }
 0x20e   : > { %v2048_v40 = vpop.permute.xlu0 %2047  ;;  %v2116_v14 = vadd.f32 %v2094_v33, %v5511_v54 }
 0x20f   : > { %v4966_v56 = vadd.f32 %v2048_v40, %v2025_v36  ;;  %2393 = vrot.lane.b32.xlu1 %v4961_v23, %s3028_s3  ;;  %v4983_v36 = vmul.f32 0.120078385, %v4794_v57 }
 0x210   : > { %2387 = vrot.lane.b32.xlu0 %v4964_v5, %s3028_s3 }
 0x211   : > { %v2098_v28 = vpop.permute.xlu1 %2097  ;;  %5508 = vst [vmem:[#allocation18_spill] sm:$0xff] %v4983_v36 }
 0x212   : > { %v2092_v38 = vpop.permute.xlu0 %2091  ;;  %v2118_v34 = vadd.f32 %v2098_v28, %v5512_v20 }
 0x213   : > { %2397 = vrot.lane.b32.xlu1 %v4973_v0, %s3028_s3  ;;  %v2115_v11 = vadd.f32 %v2092_v38, %v5513_v42 }
 0x214   : > { %2391 = vrot.lane.b32.xlu0 %v4976_v52, %s3028_s3 }
 0x215   : > { %v2102_v61 = vpop.permute.xlu1 %2101 }
 0x216   : > { %v2096_v22 = vpop.permute.xlu0 %2095  ;;  %v2120_v17 = vadd.f32 %v2102_v61, %v5514_v44 }
 0x217   : > { %2401 = vrot.lane.b32.xlu1 %v4983_v36, %s3028_s3  ;;  %v2117_v35 = vadd.f32 %v2096_v22, %v5515_v2  ;;  %v5517_v22 = vld [vmem:[#allocation55_spill] sm:$0xff]  ;;  %v5564_v36 = vld [vmem:[#allocation56_spill] sm:$0xff] }
 0x218   : > { %2395 = vrot.lane.b32.xlu0 %v4986_v15, %s3028_s3 }
 0x219   : > { %v2106_v3 = vpop.permute.xlu1 %2105 }
 0x21a   : > { %v2100_v46 = vpop.permute.xlu0 %2099  ;;  %v2122_v54 = vadd.f32 %v2106_v3, %v4608_v6 }
 0x21c   : > { %2399 = vrot.lane.b32.xlu0 %v4993_v13, %s3028_s3 }
 0x21d   : > { %v2142_v57 = vpop.permute.xlu1 %2141 }
 0x21e   : > { %v2104_v39 = vpop.permute.xlu0 %2103  ;;  %v2164_v53 = vadd.f32 %v2142_v57, %v2116_v14  ;;  %v2119_v14 = vadd.f32 %v2100_v46, %v4591_v26  ;;  %v5519_v26 = vld [vmem:[#allocation28_spill] sm:$0xff]  ;;  %v5520_v46 = vld [vmem:[#allocation57_spill] sm:$0xff] }
 0x21f   : > { %v2121_v42 = vadd.f32 %v2104_v39, %v4611_v51  ;;  %v5522_v51 = vld [vmem:[#allocation22_spill] sm:$0xff]  ;;  %v5523_v39 = vld [vmem:[#allocation37_spill] sm:$0xff] }
 0x221   : > { %v2146_v59 = vpop.permute.xlu1 %2145 }
 0x222   : > { %v2140_v30 = vpop.permute.xlu0 %2139  ;;  %v2166_v47 = vadd.f32 %v2146_v59, %v2118_v34 }
 0x223   : > { %v2163_v49 = vadd.f32 %v2140_v30, %v2115_v11  ;;  %v5516_v30 = vld [vmem:[#allocation26_spill] sm:$0xff] }
 0x224   : > { %v1764_v44 = vadd.f32 %v5517_v22, %v5516_v30  ;;  %v5526_v22 = vld [vmem:[#allocation65_spill] sm:$0xff] }
 0x225   : > { %v2150_v41 = vpop.permute.xlu1 %2149 }
 0x226   : > { %v2144_v4 = vpop.permute.xlu0 %2143  ;;  %v2168_v33 = vadd.f32 %v2150_v41, %v2120_v17  ;;  %v5518_v41 = vld [vmem:[#allocation63_spill] sm:$0xff] }
 0x227   : > { %v2165_v40 = vadd.f32 %v2144_v4, %v2117_v35  ;;  %v1812_v6 = vadd.f32 %v5518_v41, %v1764_v44  ;;  %v1766_v4 = vadd.f32 %v5520_v46, %v5519_v26  ;;  %v5530_v26 = vld [vmem:[#allocation59_spill] sm:$0xff] }
 0x229   : > { %v2154_v57 = vpop.permute.xlu1 %2153 }
 0x22a   : > { %v2148_v28 = vpop.permute.xlu0 %2147  ;;  %v2170_v20 = vadd.f32 %v2154_v57, %v2122_v54  ;;  %v5521_v54 = vld [vmem:[#allocation71_spill] sm:$0xff] }
 0x22b   : > { %v2167_v38 = vadd.f32 %v2148_v28, %v2119_v14  ;;  %v1844_v14 = vadd.f32 %v5521_v54, %v1812_v6  ;;  %v1594_v28 = vadd.f32 %v5523_v39, %v5522_v51  ;;  %v5529_v6 = vld [vmem:[#allocation30_spill] sm:$0xff]  ;;  %v5532_v39 = vld [vmem:[#allocation23_spill] sm:$0xff] }
 0x22c   : > { %v1768_v46 = vadd.f32 %v5530_v26, %v5529_v6  ;;  %v5531_v54 = vld [vmem:[#allocation66_spill] sm:$0xff]  ;;  %v5540_v26 = vld [vmem:[#allocation83_spill] sm:$0xff] }
 0x22d   : > { %v2174_v34 = vpop.permute.xlu1 %2173 }
 0x22e   : > { %v2152_v11 = vpop.permute.xlu0 %2151  ;;  %v2196_v59 = vadd.f32 %v2174_v34, %v2164_v53  ;;  %v5524_v53 = vld [vmem:[#allocation27_spill] sm:$0xff] }
 0x22f   : > { %v2169_v61 = vadd.f32 %v2152_v11, %v2121_v42  ;;  %v5525_v42 = vld [vmem:[#allocation58_spill] sm:$0xff] }
 0x230   : > { %v1763_v34 = vadd.f32 %v5525_v42, %v5524_v53  ;;  %v1593_v53 = vadd.f32 %v5533_v31, %v5532_v39  ;;  %v5534_v42 = vld [vmem:[#allocation73_spill] sm:$0xff] }
 0x231   : > { %v2178_v2 = vpop.permute.xlu1 %2177 }
 0x232   : > { %v2172_v17 = vpop.permute.xlu0 %2171  ;;  %v2198_v35 = vadd.f32 %v2178_v2, %v2166_v47  ;;  %v1814_v47 = vadd.f32 %v5526_v22, %v1766_v4  ;;  %v5527_v2 = vld [vmem:[#allocation79_spill] sm:$0xff]  ;;  %v1811_v51 = vadd.f32 %v5531_v54, %v1763_v34  ;;  %v5541_v54 = vld [vmem:[#allocation32_spill] sm:$0xff] }
 0x233   : > { %v2195_v3 = vadd.f32 %v2172_v17, %v2163_v49  ;;  %v5019_v44 = vadd.f32 %v5527_v2, %v1844_v14  ;;  %v5528_v17 = vld [vmem:[#allocation43_spill] sm:$0xff]  ;;  %v5537_v2 = vld [vmem:[#allocation74_spill] sm:$0xff] }
 0x234   : > { %v1642_v41 = vadd.f32 %v5528_v17, %v1594_v28  ;;  %v5536_v22 = vld [vmem:[#allocation67_spill] sm:$0xff]  ;;  %v5538_v28 = vld [vmem:[#allocation29_spill] sm:$0xff]  ;;  %v5539_v17 = vld [vmem:[#allocation60_spill] sm:$0xff] }
 0x235   : > { %v2182_v57 = vpop.permute.xlu1 %2181  ;;  %v1816_v14 = vadd.f32 %v5536_v22, %v1768_v46  ;;  %v1765_v6 = vadd.f32 %v5539_v17, %v5538_v28  ;;  %v2428_v34 = vmul.f32 %v5019_v44, %v5019_v44  ;;  %v5543_v46 = vld [vmem:[#allocation75_spill] sm:$0xff]  ;;  %v5546_v22 = vld [vmem:[#allocation53_spill] sm:$0xff]  ;;  %v5548_v17 = vld [vmem:[#allocation62_spill] sm:$0xff] }
 0x236   : > { %v2176_v11 = vpop.permute.xlu0 %2175  ;;  %v5015_v30 = vadd.f32 %v2182_v57, %v2168_v33  ;;  %v1846_v33 = vadd.f32 %v5534_v42, %v1814_v47  ;;  %v1674_v4 = vadd.f32 %v5535_v1, %v1642_v41  ;;  %v5542_v1 = vld [vmem:[#allocation61_spill] sm:$0xff]  ;;  %v5547_v28 = vld [vmem:[#allocation31_spill] sm:$0xff] }
 0x237   : > { %v5021_v49 = vadd.f32 %v2176_v11, %v2165_v40  ;;  %v1843_v40 = vadd.f32 %v5537_v2, %v1811_v51  ;;  %v1770_v41 = vadd.f32 %v5542_v1, %v5541_v54  ;;  %v1848_v39 = vadd.f32 %v5543_v46, %v1816_v14  ;;  %v5544_v51 = vld [vmem:[#allocation86_spill] sm:$0xff]  ;;  %v5552_v54 = vld [vmem:[#allocation69_spill] sm:$0xff]  ;;  %v5553_v14 = vld [vmem:[#allocation88_spill] sm:$0xff] }
 0x238   : > { %v5040_v31 = vadd.f32 %v5540_v26, %v1846_v33  ;;  %v5052_v2 = vadd.f32 %v5546_v22, %v1674_v4  ;;  %v1767_v12 = vadd.f32 %v5548_v17, %v5547_v28  ;;  %v5549_v33 = vld [vmem:[#allocation68_spill] sm:$0xff]  ;;  %v2508_v4 = vadd.f32 %v2428_v34, %v4871_v63 }
 0x239   : > { %v2186_v57 = vpop.permute.xlu1 %2185  ;;  %v5048_v42 = vadd.f32 %v5544_v51, %v1843_v40  ;;  %v1813_v26 = vadd.f32 %v5549_v33, %v1765_v6  ;;  %v1818_v1 = vadd.f32 %v5552_v54, %v1770_v41  ;;  %v5061_v46 = vadd.f32 %v5553_v14, %v1848_v39  ;;  %v5555_v6 = vld [vmem:[#allocation50_spill] sm:$0xff]  ;;  %v5559_v14 = vld [vmem:[#allocation89_spill] sm:$0xff] }
 0x23a   : > { %v2180_v11 = vpop.permute.xlu0 %2179  ;;  %v5033_v55 = vadd.f32 %v2186_v57, %v2170_v20  ;;  %v5545_v20 = vld [vmem:[#allocation45_spill] sm:$0xff]  ;;  %v2430_v22 = vmul.f32 %v5040_v31, %v5040_v31  ;;  %v5556_v33 = vld [vmem:[#allocation70_spill] sm:$0xff] }
 0x23b   : > { %v5042_v47 = vadd.f32 %v2180_v11, %v2167_v38  ;;  %v1641_v57 = vadd.f32 %v5545_v20, %v1593_v53  ;;  %v5550_v11 = vld [vmem:[#allocation33_spill] sm:$0xff]  ;;  %v5554_v53 = vld [vmem:[#allocation76_spill] sm:$0xff]  ;;  %v2427_v41 = vmul.f32 %v5048_v42, %v5048_v42 }
 0x23c   : > { %v1769_v24 = vadd.f32 %v5551_v62, %v5550_v11  ;;  %v1845_v20 = vadd.f32 %v5554_v53, %v1813_v26  ;;  %v1815_v62 = vadd.f32 %v5556_v33, %v1767_v12  ;;  %v5558_v11 = vld [vmem:[#allocation77_spill] sm:$0xff]  ;;  %v2432_v12 = vmul.f32 %v5061_v46, %v5061_v46 }
 0x23d   : > { %v2214_v38 = vpop.permute.xlu1 %2213  ;;  %v1673_v17 = vadd.f32 %v5555_v6, %v1641_v57  ;;  %v1850_v54 = vadd.f32 %v5558_v11, %v1818_v1  ;;  %v5561_v57 = vsub.f32 %v4876_v50, %v4871_v63  ;;  %v2516_v33 = vadd.f32 0.0001, %v2508_v4  ;;  %v5565_v63 = vld [vmem:[#allocation80_spill] sm:$0xff] }
 0x23e   : > { %v2184_v40 = vpop.permute.xlu0 %2183  ;;  %v2236_v51 = vadd.f32 %v2214_v38, %v2196_v59  ;;  %v2426_v59 = vmul.f32 %v5052_v2, %v5052_v2  ;;  %v5557_v38 = vld [vmem:[#allocation72_spill] sm:$0xff]  ;;  %v5078_v53 = vadd.f32 %v5559_v14, %v1845_v20  ;;  %v2507_v11 = vadd.f32 %v2427_v41, %v4904_v16  ;;  %v5563_v14 = vld [vmem:[#allocation91_spill] sm:$0xff] }
 0x23f   : > { %v5067_v28 = vadd.f32 %v2184_v40, %v2169_v61  ;;  %v1817_v26 = vadd.f32 %v5557_v38, %v1769_v24  ;;  %v5560_v40 = vld [vmem:[#allocation78_spill] sm:$0xff]  ;;  %v2510_v24 = vadd.f32 %v2430_v22, %v4894_v18  ;;  %v5095_v52 = vadd.f32 %v5564_v36, %v1673_v17 }
 0x240   : > { %v2452_v39 = vsub.f32 %v2236_v51, %v2428_v34  ;;  %v1847_v13 = vadd.f32 %v5560_v40, %v1815_v62  ;;  %v5562_v38 = vld [vmem:[#allocation90_spill] sm:$0xff] }
 0x241   : > { %v2218_v61 = vpop.permute.xlu1 %2217  ;;  %v5088_v1 = vadd.f32 %v5562_v38, %v1850_v54  ;;  %v1849_v50 = vadd.f32 %v5565_v63, %v1817_v26  ;;  %v2512_v54 = vadd.f32 %v2432_v12, %v4922_v48  ;;  %v2518_v36 = vadd.f32 0.0001, %v2510_v24 }
 0x242   : > { %v2524_v34 = vadd.f32 %v2452_v39, %v5561_v57  ;;  %v2212_v51 = vpop.permute.xlu0 %2211  ;;  %v2238_v6 = vadd.f32 %v2218_v61, %v2198_v35  ;;  %v5092_v62 = vadd.f32 %v5563_v14, %v1847_v13  ;;  %v2429_v35 = vmul.f32 %v5078_v53, %v5078_v53 }
 0x243   : > { %v2235_v20 = vadd.f32 %v2212_v51, %v2195_v3  ;;  %v5566_v13 = vsub.f32 %v4899_v45, %v4894_v18  ;;  %v2434_v17 = vmul.f32 %v5088_v1, %v5088_v1  ;;  %v5567_v26 = vsub.f32 %v4909_v27, %v4904_v16 }
 0x244   : > { %v2532_v40 = vadd.f32 0.0009, %v2524_v34  ;;  %v2454_v15 = vsub.f32 %v2238_v6, %v2430_v22  ;;  %v2515_v51 = vadd.f32 0.0001, %v2507_v11  ;;  %v2431_v6 = vmul.f32 %v5092_v62, %v5092_v62 }
 0x245   : > { %v2451_v4 = vsub.f32 %v2235_v20, %v2427_v41  ;;  %v2222_v39 = vpop.permute.xlu1 %2221  ;;  %v2509_v45 = vadd.f32 %v2429_v35, %v4928_v60  ;;  %v2520_v14 = vadd.f32 0.0001, %v2512_v54  ;;  %v5569_v16 = vsub.f32 %v4924_v9, %v4922_v48 }
 0x246   : > { %v5101_v3 = vmul.f32 %v2532_v40, %v2516_v33  ;;  %v2526_v61 = vadd.f32 %v2454_v15, %v5566_v13  ;;  %v2216_v57 = vpop.permute.xlu0 %2215  ;;  %v2240_v22 = vadd.f32 %v2222_v39, %v5015_v30  ;;  %v5568_v15 = vld [vmem:[#allocation92_spill] sm:$0xff]  ;;  %v2514_v63 = vadd.f32 %v2434_v17, %v2426_v59 }
 0x247   : > { %v2523_v41 = vadd.f32 %v2451_v4, %v5567_v26  ;;  %v2237_v34 = vadd.f32 %v2216_v57, %v5021_v49  ;;  %v5117_v30 = vadd.f32 %v5568_v15, %v1849_v50  ;;  %v5570_v50 = vsub.f32 %v4933_v29, %v4928_v60 }
 0x248   : > { %v2534_v33 = vadd.f32 0.0009, %v2526_v61  ;;  %v2456_v18 = vsub.f32 %v2240_v22, %v2432_v12  ;;  %v2511_v39 = vadd.f32 %v2431_v6, %v4950_v10  ;;  %v2450_v54 = vsub.f32 %v4946_v58, %v2426_v59 }
 0x249   : > { %v2531_v24 = vadd.f32 0.0009, %v2523_v41  ;;  %v2453_v38 = vsub.f32 %v2237_v34, %v2429_v35  ;;  %v2226_v20 = vpop.permute.xlu1 %2225  ;;  %v2517_v48 = vadd.f32 0.0001, %v2509_v45  ;;  %v2433_v9 = vmul.f32 %v5117_v30, %v5117_v30 }
 0x24a   : > { %v5119_v40 = vmul.f32 %v2534_v33, %v2518_v36  ;;  %v2528_v27 = vadd.f32 %v2456_v18, %v5569_v16  ;;  %v2220_v49 = vpop.permute.xlu0 %2219  ;;  %v2242_v11 = vadd.f32 %v2226_v20, %v5033_v55  ;;  %v2425_v29 = vmul.f32 %v5095_v52, %v5095_v52 }
 0x24b   : > { %v5125_v12 = vmul.f32 %v2531_v24, %v2515_v51  ;;  %v2525_v4 = vadd.f32 %v2453_v38, %v5570_v50  ;;  %v2239_v35 = vadd.f32 %v2220_v49, %v5042_v47  ;;  %v5571_v58 = vsub.f32 %v4952_v37, %v4950_v10 }
 0x24c   : > { %v2536_v13 = vadd.f32 0.0009, %v2528_v27  ;;  %v2458_v61 = vsub.f32 %v2242_v11, %v2434_v17  ;;  %v2519_v41 = vadd.f32 0.0001, %v2511_v39  ;;  %v2522_v34 = vadd.f32 0.0001, %v2514_v63 }
 0x24d   : > { %v2533_v55 = vadd.f32 0.0009, %v2525_v4  ;;  %v2455_v57 = vsub.f32 %v2239_v35, %v2431_v6  ;;  %v2270_v22 = vpop.permute.xlu1 %2269  ;;  %v2513_v6 = vadd.f32 %v2433_v9, %v2425_v29  ;;  %v2449_v33 = vsub.f32 %v4966_v56, %v2425_v29 }
 0x24e   : > { %v5135_v36 = vmul.f32 %v2536_v13, %v2520_v14  ;;  %v2530_v26 = vadd.f32 %v2458_v61, %v2450_v54  ;;  %v2224_v60 = vpop.permute.xlu0 %2223  ;;  %2837 = vrcp.f32 %v5101_v3 }
 0x24f   : > { %v5139_v47 = vmul.f32 %v2533_v55, %v2517_v48  ;;  %v2527_v59 = vadd.f32 %v2455_v57, %v5571_v58  ;;  %v2241_v17 = vadd.f32 %v2224_v60, %v5067_v28  ;;  %v2521_v16 = vadd.f32 0.0001, %v2513_v6 }
 0x250   : > { %v2538_v51 = vadd.f32 0.0009, %v2530_v26  ;;  %v2436_v57 = vmul.f32 %v5019_v44, %v4855_v25  ;;  %v5168_v26 = vmul.f32 %v5048_v42, %v4880_v19  ;;  %v5172_v60 = vmul.f32 %v5040_v31, %v4874_v8 }
 0x251   : > { %v2535_v18 = vadd.f32 0.0009, %v2527_v59  ;;  %v2457_v45 = vsub.f32 %v2241_v17, %v2433_v9  ;;  %v2274_v15 = vpop.permute.xlu1 %2273  ;;  %v5176_v58 = vmul.f32 %v5061_v46, %v4897_v7  ;;  %v5180_v17 = vmul.f32 %v5078_v53, %v4907_v43 }
 0x252   : > { %v5146_v24 = vmul.f32 %v2538_v51, %v2522_v34  ;;  %v2268_v38 = vpop.permute.xlu0 %2267  ;;  %v5184_v25 = vmul.f32 %v5088_v1, %v5052_v2  ;;  %v2292_v19 = vadd.f32 %v2270_v22, %v4944_v21  ;;  %v2467_v8 = vmul.f32 2.0, %v5168_v26 }
 0x253   : > { %v5148_v20 = vmul.f32 %v2535_v18, %v2519_v41  ;;  %v2529_v14 = vadd.f32 %v2457_v45, %v2449_v33  ;;  %v2468_v41 = vmul.f32 2.0, %v2436_v57  ;;  %v2470_v44 = vmul.f32 2.0, %v5172_v60 }
 0x254   : > { %v5191_v7 = vmul.f32 %v5092_v62, %v4931_v32  ;;  %v2472_v42 = vmul.f32 2.0, %v5176_v58  ;;  %v2469_v2 = vmul.f32 2.0, %v5180_v17  ;;  %v2474_v21 = vmul.f32 2.0, %v5184_v25 }
 0x255   : > { %v2537_v10 = vadd.f32 0.0009, %v2529_v14  ;;  %v2278_v37 = vpop.permute.xlu1 %2277  ;;  %v2476_v53 = vadd.f32 0.0001, %v2468_v41  ;;  %v2294_v1 = vadd.f32 %v2274_v15, %v4961_v23  ;;  %v5200_v34 = vadd.f32 0.0001, %v2467_v8 }
 0x256   : > { %v2272_v27 = vpop.permute.xlu0 %2271  ;;  %v2478_v32 = vadd.f32 0.0001, %v2470_v44  ;;  %v2471_v62 = vmul.f32 2.0, %v5191_v7  ;;  %v2291_v51 = vadd.f32 %v2268_v38, %v4964_v5  ;;  %v5204_v3 = vadd.f32 0.0001, %v2472_v42 }
 0x257   : > { %v5150_v28 = vmul.f32 %v2537_v10, %v2521_v16  ;;  %2839 = vrcp.f32 %v5119_v40  ;;  %v5209_v14 = vadd.f32 0.0001, %v2469_v2  ;;  %v5213_v23 = vmul.f32 %v5117_v30, %v5095_v52 }
 0x258   : > { %2841 = vrcp.f32 %v5125_v12  ;;  %v5216_v16 = vadd.f32 0.0001, %v2474_v21  ;;  %v2296_v5 = vadd.f32 %v2278_v37, %v4973_v0  ;;  %v5219_v40 = vadd.f32 0.0001, %v2471_v62 }
 0x259   : > { %v5152_v49 = vpop.permute.xlu1 %2281  ;;  %2843 = vrcp.f32 %v5135_v36 }
 0x25a   : > { %v5154_v11 = vpop.permute.xlu0 %2275  ;;  %2845 = vrcp.f32 %v5139_v47  ;;  %v5574_v47 = vld [vmem:[#allocation17_spill] sm:$0xff] }
 0x25b   : > { %2847 = vrcp.f32 %v5146_v24 }
 0x25c   : > { %2849 = vrcp.f32 %v5148_v20 }
 0x25d   : > { %v2318_v56 = vpop.permute.xlu1 %2317  ;;  %2851 = vrcp.f32 %v5150_v28 }
 0x25e   : > { %v5156_v63 = vpop.permute.xlu0 %2279  ;;  %v2340_v43 = vadd.f32 %v2318_v56, %v2292_v19  ;;  %v5572_v56 = vld [vmem:[#allocation14_spill] sm:$0xff]  ;;  %v5225_v19 = vmul.f32 2.0, %v5213_v23 }
 0x261   : > { %v2322_v50 = vpop.permute.xlu1 %2321 }
 0x262   : > { %v2316_v4 = vpop.permute.xlu0 %2315  ;;  %v2342_v33 = vadd.f32 %v2322_v50, %v2294_v1  ;;  %v2293_v50 = vadd.f32 %v2272_v27, %v5572_v56 }
 0x263   : > { %v2339_v15 = vadd.f32 %v2316_v4, %v2291_v51 }
 0x265   : > { %v2326_v35 = vpop.permute.xlu1 %2325 }
 0x266   : > { %v2320_v39 = vpop.permute.xlu0 %2319  ;;  %v2344_v52 = vadd.f32 %v2326_v35, %v2296_v5  ;;  %v2295_v35 = vadd.f32 %v5154_v11, %v5574_v47 }
 0x267   : > { %v2341_v0 = vadd.f32 %v2320_v39, %v2293_v50 }
 0x269   : > { %v5158_v54 = vpop.permute.xlu1 %2329 }
 0x26a   : > { %v5160_v13 = vpop.permute.xlu0 %2323 }
 0x26d   : > { %v2350_v61 = vpop.permute.xlu1 %2349 }
 0x26e   : > { %v5162_v48 = vpop.permute.xlu0 %2327  ;;  %v2372_v22 = vadd.f32 %v2350_v61, %v2340_v43 }
 0x271   : > { %v2354_v9 = vpop.permute.xlu1 %2353 }
 0x272   : > { %v2348_v55 = vpop.permute.xlu0 %2347  ;;  %v2374_v38 = vadd.f32 %v2354_v9, %v2342_v33  ;;  %v5573_v9 = vld [vmem:[#allocation18_spill] sm:$0xff] }
 0x273   : > { %v2371_v61 = vadd.f32 %v2348_v55, %v2339_v15  ;;  %v2298_v36 = vadd.f32 %v5152_v49, %v5573_v9  ;;  %v2838_v49 = vpop.eup %2837 }
 0x274   : > { %v2840_v5 = vpop.eup %2839 }
 0x275   : > { %v2358_v29 = vpop.permute.xlu1 %2357  ;;  %v2346_v24 = vadd.f32 %v5158_v54, %v2298_v36  ;;  %v2842_v56 = vpop.eup %2841 }
 0x276   : > { %v2352_v59 = vpop.permute.xlu0 %2351 }
 0x277   : > { %v2373_v8 = vadd.f32 %v2352_v59, %v2341_v0 }
 0x279   : > { %v2362_v31 = vpop.permute.xlu1 %2361 }
 0x27a   : > { %v5195_v46 = vpop.permute.xlu0 %2355  ;;  %v2378_v1 = vadd.f32 %v2362_v31, %v2346_v24 }
 0x27d   : > { %v2390_v6 = vpop.permute.xlu1 %2389 }
 0x27e   : > { %v5207_v18 = vpop.permute.xlu0 %2359  ;;  %v2412_v45 = vadd.f32 %v2390_v6, %v2372_v22  ;;  %v5575_v22 = vld [vmem:[#allocation39_spill] sm:$0xff] }
 0x27f   : > { %v2297_v54 = vadd.f32 %v5156_v63, %v5575_v22 }
 0x280   : > { %v2460_v10 = vsub.f32 %v2412_v45, %v2436_v57  ;;  %v2376_v57 = vadd.f32 %v2358_v29, %v2344_v52 }
 0x281   : > { %v2394_v41 = vpop.permute.xlu1 %2393  ;;  %v2345_v31 = vadd.f32 %v5162_v48, %v2297_v54 }
 0x282   : > { %v2484_v30 = vmul.f32 2.0, %v2460_v10  ;;  %v2388_v12 = vpop.permute.xlu0 %2387  ;;  %v2414_v4 = vadd.f32 %v2394_v41, %v2374_v38 }
 0x283   : > { %v2411_v37 = vadd.f32 %v2388_v12, %v2371_v61 }
 0x284   : > { %v2492_v27 = vadd.f32 0.0009, %v2484_v30  ;;  %v2462_v55 = vsub.f32 %v2414_v4, %v5172_v60  ;;  %v2343_v60 = vadd.f32 %v5160_v13, %v2295_v35  ;;  %v2844_v30 = vpop.eup %2843 }
 0x285   : > { %v2459_v44 = vsub.f32 %v2411_v37, %v5168_v26  ;;  %v2398_v42 = vpop.permute.xlu1 %2397  ;;  %v2846_v37 = vpop.eup %2845 }
 0x286   : > { %v2500_v39 = vmul.f32 %v2492_v27, %v2476_v53  ;;  %v2486_v43 = vmul.f32 2.0, %v2462_v55  ;;  %v2392_v2 = vpop.permute.xlu0 %2391  ;;  %v2416_v21 = vadd.f32 %v2398_v42, %v2376_v57  ;;  %v2375_v53 = vadd.f32 %v5195_v46, %v2343_v60  ;;  %v2848_v27 = vpop.eup %2847 }
 0x287   : > { %v2483_v20 = vmul.f32 2.0, %v2459_v44  ;;  %v2413_v29 = vadd.f32 %v2392_v2, %v2373_v8 }
 0x288   : > { %v2556_v11 = vmul.f32 %v2838_v49, %v2500_v39  ;;  %v2494_v59 = vadd.f32 0.0009, %v2486_v43  ;;  %v2464_v26 = vsub.f32 %v2416_v21, %v5176_v58 }
 0x289   : > { %v2491_v62 = vadd.f32 0.0009, %v2483_v20  ;;  %v2461_v51 = vsub.f32 %v2413_v29, %v5180_v17  ;;  %v2402_v6 = vpop.permute.xlu1 %2401  ;;  %v2377_v17 = vadd.f32 %v5207_v18, %v2345_v31 }
 0x28a   : > { %v2564_v28 = vsub.f32 1.0, %v2556_v11  ;;  %v2502_v33 = vmul.f32 %v2494_v59, %v2478_v32  ;;  %v2488_v13 = vmul.f32 2.0, %v2464_v26  ;;  %v2396_v45 = vpop.permute.xlu0 %2395  ;;  %v2418_v15 = vadd.f32 %v2402_v6, %v2378_v1 }
 0x28b   : > { %v2499_v38 = vmul.f32 %v2491_v62, %v5200_v34  ;;  %v2485_v58 = vmul.f32 2.0, %v2461_v51  ;;  %v2415_v10 = vadd.f32 %v2396_v45, %v2375_v53 }
 0x28c   : > { %v2572_v63 = vmax.f32 %v2564_v28, 0.0  ;;  %v2558_v50 = vmul.f32 %v2840_v5, %v2502_v33  ;;  %v2496_v46 = vadd.f32 0.0009, %v2488_v13  ;;  %v2466_v61 = vsub.f32 %v2418_v15, %v5184_v25 }
 0x28d   : > { %v2555_v41 = vmul.f32 %v2842_v56, %v2499_v38  ;;  %v2493_v32 = vadd.f32 0.0009, %v2485_v58  ;;  %v2463_v52 = vsub.f32 %v2415_v10, %v5191_v7 }
 0x28e   : > { %v2580_v12 = vmin.f32 %v2572_v63, 1.0  ;;  %v2566_v4 = vsub.f32 1.0, %v2558_v50  ;;  %v2504_v48 = vmul.f32 %v2496_v46, %v5204_v3  ;;  %v2490_v34 = vmul.f32 2.0, %v2466_v61  ;;  %v2400_v0 = vpop.permute.xlu0 %2399  ;;  %v2850_v3 = vpop.eup %2849 }
 0x28f   : > { %v2563_v9 = vsub.f32 1.0, %v2555_v41  ;;  %v2501_v36 = vmul.f32 %v2493_v32, %v5209_v14  ;;  %v2487_v57 = vmul.f32 2.0, %v2463_v52  ;;  %v2417_v25 = vadd.f32 %v2400_v0, %v2377_v17  ;;  %v2852_v60 = vpop.eup %2851 }
 0x290   : > { %v2588_v18 = vmul.f32 0.5, %v2580_v12  ;;  %v2574_v55 = vmax.f32 %v2566_v4, 0.0  ;;  %v2560_v47 = vmul.f32 %v2844_v30, %v2504_v48  ;;  %v2498_v35 = vadd.f32 0.0009, %v2490_v34 }
 0x291   : > { %v2571_v7 = vmax.f32 %v2563_v9, 0.0  ;;  %v2557_v8 = vmul.f32 %v2846_v37, %v2501_v36  ;;  %v2495_v44 = vadd.f32 0.0009, %v2487_v57  ;;  %v2465_v42 = vsub.f32 %v2417_v25, %v5213_v23 }
 0x292   : > { %2597 = vst.msk [vmem:[%s5252_s7 + $0x8] sm:$0xff] %vm2595_vm10, %v2588_v18  ;;  %v2582_v24 = vmin.f32 %v2574_v55, 1.0  ;;  %v2568_v14 = vsub.f32 1.0, %v2560_v47  ;;  %v2506_v39 = vmul.f32 %v2498_v35, %v5216_v16  ;;  %v2481_v23 = vadd.f32 0.0001, %v5225_v19 }
 0x293   : > { %v2579_v43 = vmin.f32 %v2571_v7, 1.0  ;;  %v2565_v2 = vsub.f32 1.0, %v2557_v8  ;;  %v2503_v21 = vmul.f32 %v2495_v44, %v5219_v40  ;;  %v2489_v49 = vmul.f32 2.0, %v2465_v42 }
 0x294   : > { %v2590_v20 = vmul.f32 0.5, %v2582_v24  ;;  %v2576_v29 = vmax.f32 %v2568_v14, 0.0  ;;  %v2562_v1 = vmul.f32 %v2848_v27, %v2506_v39 }
 0x295   : > { %v2587_v11 = vmul.f32 0.5, %v2579_v43  ;;  %v2573_v59 = vmax.f32 %v2565_v2, 0.0  ;;  %v2559_v26 = vmul.f32 %v2850_v3, %v2503_v21  ;;  %v2497_v22 = vadd.f32 0.0009, %v2489_v49 }
 0x296   : > { %2599 = vst.msk [vmem:[%s5252_s7 + $0x18] sm:$0xff] %vm2595_vm10, %v2590_v20  ;;  %v2584_v16 = vmin.f32 %v2576_v29, 1.0  ;;  %v2570_v54 = vsub.f32 1.0, %v2562_v1 }
 0x297   : > { %2596 = vst.msk [vmem:[%s5252_s7] sm:$0xff] %vm2595_vm10, %v2587_v11  ;;  %v2581_v40 = vmin.f32 %v2573_v59, 1.0  ;;  %v2567_v53 = vsub.f32 1.0, %v2559_v26  ;;  %v2505_v19 = vmul.f32 %v2497_v22, %v2481_v23 }
 0x298   : > { %v2592_v62 = vmul.f32 0.5, %v2584_v16  ;;  %v2578_v51 = vmax.f32 %v2570_v54, 0.0 }
 0x299   : > { %v2589_v6 = vmul.f32 0.5, %v2581_v40  ;;  %v2575_v28 = vmax.f32 %v2567_v53, 0.0  ;;  %v2561_v33 = vmul.f32 %v2852_v60, %v2505_v19 }
 0x29a   : > { %2601 = vst.msk [vmem:[%s5252_s7 + $0x28] sm:$0xff] %vm2595_vm10, %v2592_v62  ;;  %v2586_v13 = vmin.f32 %v2578_v51, 1.0 }
 0x29b   : > { %2598 = vst.msk [vmem:[%s5252_s7 + $0x10] sm:$0xff] %vm2595_vm10, %v2589_v6  ;;  %v2583_v45 = vmin.f32 %v2575_v28, 1.0  ;;  %v2569_v15 = vsub.f32 1.0, %v2561_v33 }
 0x29c   : > { %v2594_v5 = vmul.f32 0.5, %v2586_v13 }
 0x29d   : > { %v2591_v31 = vmul.f32 0.5, %v2583_v45  ;;  %v2577_v38 = vmax.f32 %v2569_v15, 0.0 }
 0x29e   : > { %2603 = vst.msk [vmem:[%s5252_s7 + $0x38] sm:$0xff] %vm2595_vm10, %v2594_v5 }
 0x29f   : > { %2600 = vst.msk [vmem:[%s5252_s7 + $0x20] sm:$0xff] %vm2595_vm10, %v2591_v31  ;;  %v2585_v58 = vmin.f32 %v2577_v38, 1.0 }
 0x2a1   : > { %v2593_v10 = vmul.f32 0.5, %v2585_v58 }
 0x2a3   : > { %2602 = vst.msk [vmem:[%s5252_s7 + $0x30] sm:$0xff] %vm2595_vm10, %v2593_v10 }
 0x2a4   : > { %2946 = shalt.err (!%p2943_p7)
}
 0x2a5   : > { %s2947_s5 = scalar_lea.hbm %s5276_s4, 1024  ;;  %s2951_s19 = scalar_lea.hbm %s5330_s2, 2048 }
 0x2a6   : > { %p2948_p10 = scmp.ne.s32.totalorder %s5276_s4, %s2947_s5  ;;  %p2952_p3 = scmp.lt.s32.totalorder %s5276_s4, %s5330_s2 }
 0x2a7   : > { %p2953_p8 = scmp.lt.s32.totalorder %s2951_s19, %s2947_s5 }
 0x2a8   : > { %p2949_p1 = pnand %p2948_p10, %p3098_p9 }
 0x2a9   : > { %p2954_p0 = por %p2953_p8, %p2952_p3 }
 0x2aa   : > { %p2950_p13 = pneg %p2949_p1 }
 0x2ac   : > { %p2955_p2 = pnand %p2954_p0, %p2950_p13 }
 0x2ae   : > { %2958 = shalt.err (!%p2955_p2)
}
 0x2af   : > { %s3030_s3 = smov 128   ;;  %s3031_s7 = smov 8  }
 0x2b0   : > { %2764 = dma.vmem_to_hbm [thread:$0]  (%p3098_p9), %s5278_s15, 1024, %s5276_s4, %s2605_s12, %s3030_s3, %s3030_s3, %s3031_s7  }
 0x2b1 PF: > { %s2636_s8 = sand.u32 1, %s2997_s9   ;;  %p2774_p5 = pnand %p2735_p12, %p3105_p11 }
 0x2b2   : > { %s2637_s16 = scalar_lea.sflag [#allocation6], %s2636_s8 }
 0x2b3   : > { %p2775_p6 = pneg %p2774_p5 }
 0x2b5   : > { %2992 = dma.done.wait (%p2775_p6), %s2637_s16, 1024  }
 0x2b6   : > { %2994 = vsyncadd (%p2775_p6), %s2637_s16, 4294966272  ;;  %s21_s14 = sadd.s32 1, %s3017_s14   ;;  %s5576_s9 = smov %s3001_s10 }
 0x2b7   : > { %p18_p4 = scmp.ge.s32.totalorder %s21_s14, 4   ;;  %s5577_s10 = smov %s3005_s11 }
 0x2b8   : > { %s5578_s11 = smov %s3103_s23  ;;  %s5579_s12 = smov %s3013_s13 }
 0x2b9   : > { %s5580_s13 = smov %s5582_s17  ;;  %20 = sbr.rel (!%p18_p4) target bundleno = 8 (0x8), region = 92 }
 0x2be   :  { %2642 = vsyncpa [#allocation5], 1 }
 0x2bf   :  { %2644 = vsyncpa [#allocation5 + $0x1], 1 }
 0x2c0   :  { %2645 = vsyncpa [#allocation8], 1 }
 0x2c1   :  { %2647 = vsyncpa [#allocation8 + $0x1], 1 }
 0x2c2   :  { %2648 = vsyncpa [#allocation6], 1 }
 0x2c3   :  { %2650 = vsyncpa [#allocation6 + $0x1], 1 }

</bundles_post_ra>
